<compile_context>
chip_gen: v5e
topology: v5e:2x2
jax: 0.10.0
libtpu: 0.0.40
codegen_flags: <defaults>
</compile_context>

<pallas_src>
import jax
import jax.numpy as jnp
from jax.experimental import pallas as pl
from jax.experimental.pallas import tpu as pltpu


def channel_attention_kernel(x_ref, w1_ref, b1_ref, w2_ref, b2_ref, o_ref):
    # x_ref : (Nb, C, HW)  slab of Nb images; channels on sublanes, spatial on lanes
    # w1_ref: (Ch, C)      PyTorch Linear1 weight (out_features, in_features)
    # b1_ref: (Ch, 1)      Linear1 bias as a column
    # w2_ref: (C, Ch)      PyTorch Linear2 weight
    # b2_ref: (C, 1)       Linear2 bias as a column
    # o_ref : (Nb, C, HW)
    nb = x_ref.shape[0]
    x = x_ref[...]                                    # model dtype
    xf = x.astype(jnp.float32)                        # no-op for f32 inputs

    # Global average / max pooling over the spatial (lane) axis, per image.
    avg = jnp.mean(xf, axis=2, keepdims=True)         # (Nb, C, 1)
    mx = jnp.max(xf, axis=2, keepdims=True)           # (Nb, C, 1)

    # Pack all pooled columns into one RHS -> single MXU matmul per step.
    # p = [avg_0 .. avg_{Nb-1} | max_0 .. max_{Nb-1}]          (C, 2*Nb)
    p = jnp.concatenate([avg[b] for b in range(nb)]
                        + [mx[b] for b in range(nb)], axis=1)
    h = jnp.maximum(
        jnp.dot(w1_ref[...], p, preferred_element_type=jnp.float32)
        + b1_ref[...], 0.0)                           # (Ch, 2*Nb)

    # Sum the ReLU'd avg/max hiddens BEFORE the second matmul:
    #   W2 @ (relu(h_avg) + relu(h_max)) + 2*b2 == mlp(avg) + mlp(max)
    hs = h[:, :nb] + h[:, nb:]                        # (Ch, Nb)
    z = (jnp.dot(w2_ref[...], hs, preferred_element_type=jnp.float32)
         + 2.0 * b2_ref[...])                         # (C, Nb)
    att = jax.nn.sigmoid(z)                           # (C, Nb)

    # Scale: per-channel attention broadcast over the spatial lanes.
    # Multiply in the model dtype (no full-slab f32 copy on the bf16 path);
    # each store is a lane-dense (C, HW) write.
    for b in range(nb):
        o_ref[b] = x[b] * att[:, b:b + 1].astype(x.dtype)


def _pick_block_batch(n, bytes_per_image, target_bytes=4 << 20):
    """Largest divisor of n whose input slab is <= ~target_bytes, while keeping
    >= 2 grid steps (megacore on v7x) whenever n >= 2."""
    cap = max(1, target_bytes // max(1, bytes_per_image))
    cap = min(cap, n)
    if n >= 2:
        cap = max(1, min(cap, n // 2))
    nb = 1
    for d in range(1, cap + 1):
        if n % d == 0:
            nb = d
    return nb


def channel_attention_pallas(x_nchw, w1, b1, w2, b2, *, block_batch=None):
    # x_nchw: (N, C, H, W); w1: (Ch, C); b1: (Ch,); w2: (C, Ch); b2: (C,)
    N, C, H, W = x_nchw.shape
    HW = H * W
    Ch = w1.shape[0]
    itemsize = jnp.dtype(x_nchw.dtype).itemsize
    if x_nchw.dtype == jnp.bfloat16:
        assert C % 16 == 0, "bf16 path needs C % 16 == 0 (min tile (16, 128))"

    Nb = block_batch if block_batch is not None else _pick_block_batch(
        N, C * HW * itemsize)
    assert N % Nb == 0, "block_batch must divide the batch size"

    x3 = x_nchw.reshape(N, C, HW)                     # free view (contiguous NCHW)
    w1f = jnp.asarray(w1, jnp.float32)                # (Ch, C)
    w2f = jnp.asarray(w2, jnp.float32)                # (C, Ch)
    b1c = jnp.asarray(b1, jnp.float32).reshape(Ch, 1)
    b2c = jnp.asarray(b2, jnp.float32).reshape(C, 1)

    # VMEM budget: in+out slabs double-buffered + f32 pooling temp + weights.
    slab = Nb * C * HW * itemsize
    vmem_need = (4 * slab + Nb * C * HW * 4
                 + 4 * (2 * C * Ch + C + Ch) + (2 << 20))
    vmem_limit = int(min(max(vmem_need, 8 << 20), 112 << 20))

    out3 = pl.pallas_call(
        channel_attention_kernel,
        out_shape=jax.ShapeDtypeStruct((N, C, HW), x_nchw.dtype),
        grid=(N // Nb,),
        in_specs=[
            pl.BlockSpec((Nb, C, HW), lambda n: (n, 0, 0)),   # Nb images / step
            pl.BlockSpec((Ch, C), lambda n: (0, 0)),
            pl.BlockSpec((Ch, 1), lambda n: (0, 0)),
            pl.BlockSpec((C, Ch), lambda n: (0, 0)),
            pl.BlockSpec((C, 1), lambda n: (0, 0)),
        ],
        out_specs=pl.BlockSpec((Nb, C, HW), lambda n: (n, 0, 0)),
        compiler_params=pltpu.CompilerParams(
            dimension_semantics=("parallel",),        # batch blocks independent
            vmem_limit_bytes=vmem_limit),
        cost_estimate=pl.CostEstimate(
            flops=6 * N * C * Ch + 3 * N * C * HW,
            transcendentals=N * C,
            bytes_accessed=2 * N * C * HW * itemsize
                           + 4 * (2 * C * Ch + C + Ch)),
    )(x3, w1f, b1c, w2f, b2c)

    return out3.reshape(N, C, H, W)


# ---------------------------- pure-JAX reference ----------------------------
def channel_attention_ref(x, w1, b1, w2, b2):
    avg = jnp.mean(x, axis=(2, 3))                    # (N, C)
    mx = jnp.max(x, axis=(2, 3))                      # (N, C)

    def mlp(p):
        h = jnp.maximum(p @ w1.T + b1, 0.0)
        return h @ w2.T + b2

    att = jax.nn.sigmoid(mlp(avg) + mlp(mx))          # (N, C)
    return x * att[:, :, None, None]


if __name__ == "__main__":
    # Small shapes consistent with the module: channel_in >= reduction_ratio
    # (16) and divisible by it; H*W a multiple of 128 keeps the streaming pass
    # lane-dense.  N=8 exercises batch-packed blocks (Nb=4 -> 2 grid steps).
    N, C, H, W = 8, 128, 16, 16
    reduction_ratio = 16
    Ch = C // reduction_ratio                         # hidden = 8

    key = jax.random.PRNGKey(0)
    kx, k1, kb1, k2, kb2 = jax.random.split(key, 5)

    x = jax.random.normal(kx, (N, C, H, W), jnp.float32)
    # PyTorch Linear layouts: W1 (Ch, C), b1 (Ch,), W2 (C, Ch), b2 (C,)
    w1 = 0.1 * jax.random.normal(k1, (Ch, C), jnp.float32)
    b1 = 0.1 * jax.random.normal(kb1, (Ch,), jnp.float32)
    w2 = 0.1 * jax.random.normal(k2, (C, Ch), jnp.float32)
    b2 = 0.1 * jax.random.normal(kb2, (C,), jnp.float32)

    # f32 path (matches the PyTorch module's default dtype).
    out = jax.block_until_ready(channel_attention_pallas(x, w1, b1, w2, b2))
    ref = jax.block_until_ready(channel_attention_ref(x, w1, b1, w2, b2))
    assert out.shape == (N, C, H, W)
    assert jnp.max(jnp.abs(out - ref)) < 1e-3, "f32 mismatch vs JAX reference"

    # bf16 I/O path: halves HBM traffic on this HBM-bound kernel.
    x_bf = x.astype(jnp.bfloat16)
    out_bf = jax.block_until_ready(channel_attention_pallas(x_bf, w1, b1, w2, b2))
    ref_bf = channel_attention_ref(x_bf.astype(jnp.float32), w1, b1, w2, b2)
    assert out_bf.dtype == jnp.bfloat16
    assert jnp.max(jnp.abs(out_bf.astype(jnp.float32) - ref_bf)) < 6e-2, \
        "bf16 mismatch vs JAX reference"

    print("KERNEL_OK")
</pallas_src>

<mosaic_0001>
module attributes {stable_mosaic.version = 11 : i64} {
  func.func @channel_attention_kernel(%arg0: i32, %arg1: memref<4x128x256xf32, #tpu.memory_space<vmem>>, %arg2: memref<8x128xf32, #tpu.memory_space<vmem>>, %arg3: memref<8x1xf32, #tpu.memory_space<vmem>>, %arg4: memref<128x8xf32, #tpu.memory_space<vmem>>, %arg5: memref<128x1xf32, #tpu.memory_space<vmem>>, %arg6: memref<4x128x256xf32, #tpu.memory_space<vmem>>) attributes {dimension_semantics = [#tpu.dimension_semantics<parallel>], iteration_bounds = array<i64: 2>, scalar_prefetch = 0 : i64, scratch_operands = 0 : i64, tpu.core_type = #tpu.core_type<tc>, window_params = [{transform_indices = @transform_0, window_bounds = array<i64: 4, 128, 256>}, {pipeline_mode = #tpu.pipeline_mode<synchronous>, transform_indices = @transform_1, window_bounds = array<i64: 8, 128>}, {pipeline_mode = #tpu.pipeline_mode<synchronous>, transform_indices = @transform_2, window_bounds = array<i64: 8, 1>}, {pipeline_mode = #tpu.pipeline_mode<synchronous>, transform_indices = @transform_3, window_bounds = array<i64: 128, 8>}, {pipeline_mode = #tpu.pipeline_mode<synchronous>, transform_indices = @transform_4, window_bounds = array<i64: 128, 1>}, {transform_indices = @transform_5, window_bounds = array<i64: 4, 128, 256>}]} {
    %c0 = arith.constant 0 : index
    %c0_0 = arith.constant 0 : index
    %c0_1 = arith.constant 0 : index
    %0 = vector.load %arg1[%c0, %c0_0, %c0_1] : memref<4x128x256xf32, #tpu.memory_space<vmem>>, vector<4x128x256xf32>
    %cst = arith.constant dense<0.000000e+00> : vector<4x128xf32>
    %1 = vector.multi_reduction <add>, %0, %cst [2] : vector<4x128x256xf32> to vector<4x128xf32>
    %2 = vector.shape_cast %1 : vector<4x128xf32> to vector<4x128x1xf32>
    %cst_2 = arith.constant 2.560000e+02 : f32
    %3 = vector.broadcast %cst_2 : f32 to vector<4x128x1xf32>
    %4 = arith.divf %2, %3 : vector<4x128x1xf32>
    %cst_3 = arith.constant dense<0xFF800000> : vector<4x128xf32>
    %5 = vector.multi_reduction <maximumf>, %0, %cst_3 [2] : vector<4x128x256xf32> to vector<4x128xf32>
    %6 = vector.shape_cast %5 : vector<4x128xf32> to vector<4x128x1xf32>
    %7 = vector.extract_strided_slice %4 {offsets = [0, 0, 0], sizes = [1, 128, 1], strides = [1, 1, 1]} : vector<4x128x1xf32> to vector<1x128x1xf32>
    %8 = vector.shape_cast %7 : vector<1x128x1xf32> to vector<128x1xf32>
    %9 = vector.extract_strided_slice %4 {offsets = [1, 0, 0], sizes = [1, 128, 1], strides = [1, 1, 1]} : vector<4x128x1xf32> to vector<1x128x1xf32>
    %10 = vector.shape_cast %9 : vector<1x128x1xf32> to vector<128x1xf32>
    %11 = vector.extract_strided_slice %4 {offsets = [2, 0, 0], sizes = [1, 128, 1], strides = [1, 1, 1]} : vector<4x128x1xf32> to vector<1x128x1xf32>
    %12 = vector.shape_cast %11 : vector<1x128x1xf32> to vector<128x1xf32>
    %13 = vector.extract_strided_slice %4 {offsets = [3, 0, 0], sizes = [1, 128, 1], strides = [1, 1, 1]} : vector<4x128x1xf32> to vector<1x128x1xf32>
    %14 = vector.shape_cast %13 : vector<1x128x1xf32> to vector<128x1xf32>
    %15 = vector.extract_strided_slice %6 {offsets = [0, 0, 0], sizes = [1, 128, 1], strides = [1, 1, 1]} : vector<4x128x1xf32> to vector<1x128x1xf32>
    %16 = vector.shape_cast %15 : vector<1x128x1xf32> to vector<128x1xf32>
    %17 = vector.extract_strided_slice %6 {offsets = [1, 0, 0], sizes = [1, 128, 1], strides = [1, 1, 1]} : vector<4x128x1xf32> to vector<1x128x1xf32>
    %18 = vector.shape_cast %17 : vector<1x128x1xf32> to vector<128x1xf32>
    %19 = vector.extract_strided_slice %6 {offsets = [2, 0, 0], sizes = [1, 128, 1], strides = [1, 1, 1]} : vector<4x128x1xf32> to vector<1x128x1xf32>
    %20 = vector.shape_cast %19 : vector<1x128x1xf32> to vector<128x1xf32>
    %21 = vector.extract_strided_slice %6 {offsets = [3, 0, 0], sizes = [1, 128, 1], strides = [1, 1, 1]} : vector<4x128x1xf32> to vector<1x128x1xf32>
    %22 = vector.shape_cast %21 : vector<1x128x1xf32> to vector<128x1xf32>
    %23 = tpu.concatenate %8, %10, %12, %14, %16, %18, %20, %22 in 1 : vector<128x1xf32>, vector<128x1xf32>, vector<128x1xf32>, vector<128x1xf32>, vector<128x1xf32>, vector<128x1xf32>, vector<128x1xf32>, vector<128x1xf32> -> vector<128x8xf32>
    %c0_4 = arith.constant 0 : index
    %c0_5 = arith.constant 0 : index
    %24 = vector.load %arg2[%c0_4, %c0_5] : memref<8x128xf32, #tpu.memory_space<vmem>>, vector<8x128xf32>
    %cst_6 = arith.constant dense<0.000000e+00> : vector<8x8xf32>
    %25 = tpu.matmul %24, %23, %cst_6 {dimension_numbers = #tpu.dot_dimension_numbers<[1], [0], [0], [1], [0, 0, 1, 1], [], []>} : vector<8x128xf32>, vector<128x8xf32>, vector<8x8xf32> -> vector<8x8xf32>
    %c0_7 = arith.constant 0 : index
    %c0_8 = arith.constant 0 : index
    %26 = vector.load %arg3[%c0_7, %c0_8] : memref<8x1xf32, #tpu.memory_space<vmem>>, vector<8x1xf32>
    %27 = vector.broadcast %26 : vector<8x1xf32> to vector<8x8xf32>
    %28 = arith.addf %25, %27 : vector<8x8xf32>
    %cst_9 = arith.constant 0.000000e+00 : f32
    %29 = vector.broadcast %cst_9 : f32 to vector<8x8xf32>
    %30 = arith.maximumf %28, %29 : vector<8x8xf32>
    %31 = vector.extract_strided_slice %30 {offsets = [0, 0], sizes = [8, 4], strides = [1, 1]} : vector<8x8xf32> to vector<8x4xf32>
    %32 = vector.extract_strided_slice %30 {offsets = [0, 4], sizes = [8, 4], strides = [1, 1]} : vector<8x8xf32> to vector<8x4xf32>
    %33 = arith.addf %31, %32 : vector<8x4xf32>
    %c0_10 = arith.constant 0 : index
    %c0_11 = arith.constant 0 : index
    %34 = vector.load %arg4[%c0_10, %c0_11] : memref<128x8xf32, #tpu.memory_space<vmem>>, vector<128x8xf32>
    %cst_12 = arith.constant dense<0.000000e+00> : vector<128x4xf32>
    %35 = tpu.matmul %34, %33, %cst_12 {dimension_numbers = #tpu.dot_dimension_numbers<[1], [0], [0], [1], [0, 0, 1, 1], [], []>} : vector<128x8xf32>, vector<8x4xf32>, vector<128x4xf32> -> vector<128x4xf32>
    %c0_13 = arith.constant 0 : index
    %c0_14 = arith.constant 0 : index
    %36 = vector.load %arg5[%c0_13, %c0_14] : memref<128x1xf32, #tpu.memory_space<vmem>>, vector<128x1xf32>
    %cst_15 = arith.constant 2.000000e+00 : f32
    %37 = vector.broadcast %cst_15 : f32 to vector<128x1xf32>
    %38 = arith.mulf %37, %36 : vector<128x1xf32>
    %39 = vector.broadcast %38 : vector<128x1xf32> to vector<128x4xf32>
    %40 = arith.addf %35, %39 : vector<128x4xf32>
    %41 = arith.negf %40 : vector<128x4xf32>
    %42 = math.exp %41 : vector<128x4xf32>
    %cst_16 = arith.constant 1.000000e+00 : f32
    %43 = vector.broadcast %cst_16 : f32 to vector<128x4xf32>
    %44 = arith.addf %43, %42 : vector<128x4xf32>
    %45 = arith.divf %43, %44 : vector<128x4xf32>
    %46 = vector.extract_strided_slice %0 {offsets = [0, 0, 0], sizes = [1, 128, 256], strides = [1, 1, 1]} : vector<4x128x256xf32> to vector<1x128x256xf32>
    %47 = vector.shape_cast %46 : vector<1x128x256xf32> to vector<128x256xf32>
    %48 = vector.extract_strided_slice %45 {offsets = [0, 0], sizes = [128, 1], strides = [1, 1]} : vector<128x4xf32> to vector<128x1xf32>
    %49 = vector.broadcast %48 : vector<128x1xf32> to vector<128x256xf32>
    %50 = arith.mulf %47, %49 : vector<128x256xf32>
    %c0_17 = arith.constant 0 : index
    %c0_18 = arith.constant 0 : index
    %c0_19 = arith.constant 0 : index
    %51 = vector.load %arg6[%c0_17, %c0_18, %c0_19] : memref<4x128x256xf32, #tpu.memory_space<vmem>>, vector<1x128x256xf32>
    %52 = vector.shape_cast %51 : vector<1x128x256xf32> to vector<128x256xf32>
    %53 = vector.shape_cast %50 : vector<128x256xf32> to vector<1x128x256xf32>
    tpu.vector_store %arg6[%c0_17, %c0_18, %c0_19], %53 {strides = array<i32>} : memref<4x128x256xf32, #tpu.memory_space<vmem>>, vector<1x128x256xf32>,
    %54 = vector.extract_strided_slice %0 {offsets = [1, 0, 0], sizes = [1, 128, 256], strides = [1, 1, 1]} : vector<4x128x256xf32> to vector<1x128x256xf32>
    %55 = vector.shape_cast %54 : vector<1x128x256xf32> to vector<128x256xf32>
    %56 = vector.extract_strided_slice %45 {offsets = [0, 1], sizes = [128, 1], strides = [1, 1]} : vector<128x4xf32> to vector<128x1xf32>
    %57 = vector.broadcast %56 : vector<128x1xf32> to vector<128x256xf32>
    %58 = arith.mulf %55, %57 : vector<128x256xf32>
    %c1 = arith.constant 1 : index
    %c0_20 = arith.constant 0 : index
    %c0_21 = arith.constant 0 : index
    %59 = vector.load %arg6[%c1, %c0_20, %c0_21] : memref<4x128x256xf32, #tpu.memory_space<vmem>>, vector<1x128x256xf32>
    %60 = vector.shape_cast %59 : vector<1x128x256xf32> to vector<128x256xf32>
    %61 = vector.shape_cast %58 : vector<128x256xf32> to vector<1x128x256xf32>
    tpu.vector_store %arg6[%c1, %c0_20, %c0_21], %61 {strides = array<i32>} : memref<4x128x256xf32, #tpu.memory_space<vmem>>, vector<1x128x256xf32>,
    %62 = vector.extract_strided_slice %0 {offsets = [2, 0, 0], sizes = [1, 128, 256], strides = [1, 1, 1]} : vector<4x128x256xf32> to vector<1x128x256xf32>
    %63 = vector.shape_cast %62 : vector<1x128x256xf32> to vector<128x256xf32>
    %64 = vector.extract_strided_slice %45 {offsets = [0, 2], sizes = [128, 1], strides = [1, 1]} : vector<128x4xf32> to vector<128x1xf32>
    %65 = vector.broadcast %64 : vector<128x1xf32> to vector<128x256xf32>
    %66 = arith.mulf %63, %65 : vector<128x256xf32>
    %c2 = arith.constant 2 : index
    %c0_22 = arith.constant 0 : index
    %c0_23 = arith.constant 0 : index
    %67 = vector.load %arg6[%c2, %c0_22, %c0_23] : memref<4x128x256xf32, #tpu.memory_space<vmem>>, vector<1x128x256xf32>
    %68 = vector.shape_cast %67 : vector<1x128x256xf32> to vector<128x256xf32>
    %69 = vector.shape_cast %66 : vector<128x256xf32> to vector<1x128x256xf32>
    tpu.vector_store %arg6[%c2, %c0_22, %c0_23], %69 {strides = array<i32>} : memref<4x128x256xf32, #tpu.memory_space<vmem>>, vector<1x128x256xf32>,
    %70 = vector.extract_strided_slice %0 {offsets = [3, 0, 0], sizes = [1, 128, 256], strides = [1, 1, 1]} : vector<4x128x256xf32> to vector<1x128x256xf32>
    %71 = vector.shape_cast %70 : vector<1x128x256xf32> to vector<128x256xf32>
    %72 = vector.extract_strided_slice %45 {offsets = [0, 3], sizes = [128, 1], strides = [1, 1]} : vector<128x4xf32> to vector<128x1xf32>
    %73 = vector.broadcast %72 : vector<128x1xf32> to vector<128x256xf32>
    %74 = arith.mulf %71, %73 : vector<128x256xf32>
    %c3 = arith.constant 3 : index
    %c0_24 = arith.constant 0 : index
    %c0_25 = arith.constant 0 : index
    %75 = vector.load %arg6[%c3, %c0_24, %c0_25] : memref<4x128x256xf32, #tpu.memory_space<vmem>>, vector<1x128x256xf32>
    %76 = vector.shape_cast %75 : vector<1x128x256xf32> to vector<128x256xf32>
    %77 = vector.shape_cast %74 : vector<128x256xf32> to vector<1x128x256xf32>
    tpu.vector_store %arg6[%c3, %c0_24, %c0_25], %77 {strides = array<i32>} : memref<4x128x256xf32, #tpu.memory_space<vmem>>, vector<1x128x256xf32>,
    return
  }
  func.func @transform_0(%arg0: i32) -> (i32, i32, i32) {
    %c0_i32 = arith.constant 0 : i32
    %c0_i32_0 = arith.constant 0 : i32
    %c0_i32_1 = arith.constant 0 : i32
    return %arg0, %c0_i32, %c0_i32_0 : i32, i32, i32
  }
  func.func @transform_1(%arg0: i32) -> (i32, i32) {
    %c0_i32 = arith.constant 0 : i32
    %c0_i32_0 = arith.constant 0 : i32
    %c0_i32_1 = arith.constant 0 : i32
    return %c0_i32, %c0_i32_0 : i32, i32
  }
  func.func @transform_2(%arg0: i32) -> (i32, i32) {
    %c0_i32 = arith.constant 0 : i32
    %c0_i32_0 = arith.constant 0 : i32
    %c0_i32_1 = arith.constant 0 : i32
    return %c0_i32, %c0_i32_0 : i32, i32
  }
  func.func @transform_3(%arg0: i32) -> (i32, i32) {
    %c0_i32 = arith.constant 0 : i32
    %c0_i32_0 = arith.constant 0 : i32
    %c0_i32_1 = arith.constant 0 : i32
    return %c0_i32, %c0_i32_0 : i32, i32
  }
  func.func @transform_4(%arg0: i32) -> (i32, i32) {
    %c0_i32 = arith.constant 0 : i32
    %c0_i32_0 = arith.constant 0 : i32
    %c0_i32_1 = arith.constant 0 : i32
    return %c0_i32, %c0_i32_0 : i32, i32
  }
  func.func @transform_5(%arg0: i32) -> (i32, i32, i32) {
    %c0_i32 = arith.constant 0 : i32
    %c0_i32_0 = arith.constant 0 : i32
    %c0_i32_1 = arith.constant 0 : i32
    return %arg0, %c0_i32, %c0_i32_0 : i32, i32, i32
  }
}

</mosaic_0001>

<bundles_post_ra>
// kernel: tpu_custom_call.1
= control target key start
LH: loop header
LB: loop body
LE: loop exit
PB: predicated region body
PF: predicated region fallthrough
CT: control target
= control target key end

     0   :  { %10 = vsyncpa [#allocation3], 0  ;;  %s4700_s0 = inlined_call_operand.hbm [shape: f32[8,128,256], index: 0, kind: input, shape index: {}]   ;;  %s4701_s1 = inlined_call_operand.vmem [shape: f32[8,128], index: 1, kind: input, shape index: {}]   ;;  %s4702_s2 = inlined_call_operand.vmem [shape: f32[8,1], index: 2, kind: input, shape index: {}]   ;;  %s4703_s3 = inlined_call_operand.vmem [shape: f32[128,8], index: 3, kind: input, shape index: {}]   ;;  %s4704_s4 = inlined_call_operand.vmem [shape: f32[128,1], index: 4, kind: input, shape index: {}]   ;;  %s4705_s5 = inlined_call_operand.hbm [shape: f32[8,128,256], index: 5, kind: output, shape index: {}]  }
   0x1   :  { %12 = vsyncpa [#allocation3 + $0x1], 0 }
   0x2   :  { %13 = vsyncpa [#allocation4], 0 }
   0x3   :  { %15 = vsyncpa [#allocation4 + $0x1], 0  ;;  %s2728_s18 = smov 0   ;;  %s2730_s19 = smov 0  }
   0x4   :  { %s2732_s20 = smov 0   ;;  %s2734_s21 = smov 0  }
   0x5 LB: > { %s2749_s22 = sadd.s32 4294967295, %s2686_s21   ;;  %s2150_s23 = sadd.s32 4294967294, %s2686_s21   ;;  %s2686_s21 = sphi %s2734_s21, %s5008_s21   ;;  %s2682_s20 = sphi %s2732_s20, %s5007_s20   ;;  %s2678_s19 = sphi %s2730_s19, %s5006_s19   ;;  %s2674_s18 = sphi %s2728_s18, %s5005_s18  }
   0x6   : > { %s2753_s24 = sadd.s32 1, %s2686_s21   ;;  %s28_s25 = sadd.s32 1, %s2682_s20 }
   0x7   : > { %s25_s26 = ssub.s32 %s2686_s21, %s2753_s24  ;;  %p35_p0 = scmp.ne.s32.totalorder %s2682_s20, %s2678_s19 }
   0x8   : > { %p26_p1 = scmp.eq.s32.totalorder %s25_s26, 0  ;;  %p36_p2 = scmp.eq.s32.totalorder %s2686_s21, 0 }
   0x9   : > { %p41_p3 = scmp.ne.s32.totalorder %s2678_s19, %s2674_s18  ;;  %p42_p4 = scmp.eq.s32.totalorder %s2749_s22, 0 }
   0xa   : > { %s2765_s27 = scalar_select %p26_p1, %s2682_s20, %s28_s25  }
   0xb   : > { %p2767_p5 = por %p36_p2, %p35_p0  ;;  %p2771_p6 = por %p42_p4, %p41_p3 }
   0xc   : > { %p149_p7 = scmp.eq.s32.totalorder %s2749_s22, 1  ;;  %p155_p8 = scmp.eq.s32.totalorder %s2150_s23, 1 }
   0xd   : > { %p2312_p10 = scmp.lt.s32.totalorder %s2686_s21, 2  ;;  %s187_s7 = sand.u32 1, %s2682_s20  }
   0xe   : > { %p2778_p11 = por %p149_p7, %p35_p0  ;;  %p2782_p12 = por %p155_p8, %p41_p3 }
   0xf   : > { %s2295_s8 = sshll.u32 %s2686_s21, 10  ;;  %s2153_s9 = sshll.u32 %s187_s7, 10 }
  0x10   : > { %s197_s12 = scalar_lea.hbm %s4700_s0, %s2295_s8  ;;  %s191_s14 = scalar_lea.vmem [#allocation2], %s2153_s9 }
  0x11   : > { %s198_s13 = sshll.u32 %s197_s12, 4  ;;  %s200_s15 = sshll.u32 %s191_s14, 4  ;;  %s199_s13 = int_to_ptr.hbm [resolvable:$true] %s198_s13  ;;  %s201_s15 = int_to_ptr.vmem [resolvable:$true] %s200_s15 }
  0x12   : > { %p2793_p13 = pnand %p2312_p10, %p2767_p5  ;;  %p2157_p0 = scmp.ge.s32.totalorder %s2686_s21, 1 }
  0x13   : > { %p208_p1 = scmp.lt.s32.totalorder %s2686_s21, 3  ;;  %s188_s17 = scalar_lea.sflag [#allocation3], %s187_s7 }
  0x14   : > { %s2590_s23 = sshra.s32 %s199_s13, 4  ;;  %p2594_p3 = pneg %p2793_p13  ;;  %s2591_s23 = int_to_ptr.hbm [resolvable:$true] %s2590_s23 }
  0x15   : > { %s2592_s25 = scalar_lea.hbm %s2591_s23, 1024  ;;  %s2597_s28 = scalar_lea.hbm %s4700_s0, 2048 }
  0x16   : > { %p2593_p2 = scmp.ne.s32.totalorder %s2591_s23, %s2592_s25  ;;  %p2598_p5 = scmp.lt.s32.totalorder %s2591_s23, %s4700_s0 }
  0x17   : > { %p2599_p8 = scmp.lt.s32.totalorder %s2597_s28, %s2592_s25 }
  0x18   : > { %p2595_p4 = pnand %p2594_p3, %p2593_p2 }
  0x19   : > { %p2600_p10 = por %p2599_p8, %p2598_p5 }
  0x1a   : > { %p2596_p7 = pneg %p2595_p4 }
  0x1c   : > { %p2601_p9 = pnand %p2600_p10, %p2596_p7 }
  0x1e   : > { %2604 = shalt.err (!%p2601_p9)
}
  0x1f   : > { %s2688_s7 = smov 256   ;;  %s2689_s11 = smov 16  }
  0x20   : > { %2307 = dma.hbm_to_vmem [thread:$0]  (!%p2793_p13), %s199_s13, 16384, %s201_s15, %s188_s17, %s2688_s7, %s2688_s7, %s2689_s11  }
  0x21   : > { %p209_p2 = pnand %p2157_p0, %p208_p1 }
  0x23   : > { %212 = sbr.rel (%p209_p2) target bundleno = 1239 (0x4d7), region = 40 }
  0x28   : > { %s2814_s12 = sand.u32 1, %s2678_s19  }
  0x29   : > { %s2158_s14 = sshll.u32 %s2814_s12, 10  ;;  %s215_s23 = scalar_lea.sflag [#allocation3], %s2814_s12 }
  0x2a   : > { %s2820_s25 = scalar_lea.vmem [#allocation2], %s2158_s14 }
  0x2b   : > { %2665 = dma.done.wait (%p2771_p6), %s215_s23, 16384  }
  0x2c   : > { %2667 = vsyncadd (%p2771_p6), %s215_s23, 4294950912  ;;  %v2827_v0 = vld [vmem:[%s2820_s25 + $0x40] sm:$0xff]  ;;  %v2830_v1 = vld [vmem:[%s2820_s25 + $0x48] sm:$0xff]  ;;  %vm831_vm1 = vcmask 7168   ;;  %vm848_vm2 = vcmask 15360   ;;  %vm865_vm3 = vcmask 23552  }
  0x2d   : > { %v2833_v2 = vld [vmem:[%s2820_s25 + $0x20] sm:$0xff]  ;;  %v388_v3 = vadd.f32 %v2830_v1, %v2827_v0  ;;  %v2838_v4 = vld [vmem:[%s2820_s25 + $0x28] sm:$0xff]  ;;  %v2851_v9 = vld [vmem:[%s2820_s25 + $0x50] sm:$0xff]  ;;  %vm882_vm4 = vcmask 31744   ;;  %vm899_vm5 = vcmask 39936   ;;  %vm916_vm6 = vcmask 48128  }
  0x2e   : > { %v2841_v5 = vld [vmem:[%s2820_s25] sm:$0xff]  ;;  %v2844_v6 = vld [vmem:[%s2820_s25 + $0x8] sm:$0xff]  ;;  %v382_v7 = vadd.f32 %v2838_v4, %v2833_v2  ;;  %v2854_v10 = vld [vmem:[%s2820_s25 + $0x58] sm:$0xff]  ;;  %vm933_vm7 = vcmask 56320   ;;  %s2692_s29 = smov 124   ;;  %vm1111_vm8 = vcmask 64512  }
  0x2f   : > { %v376_v8 = vadd.f32 %v2844_v6, %v2841_v5  ;;  %389 = vadd.xlane.f32.xlu2 %v388_v3  ;;  %v2857_v11 = vld [vmem:[%s2820_s25 + $0x30] sm:$0xff]  ;;  %v2860_v12 = vld [vmem:[%s2820_s25 + $0x38] sm:$0xff]  ;;  %v391_v15 = vadd.f32 %v2854_v10, %v2851_v9  ;;  %v2875_v18 = vld [vmem:[%s2820_s25 + $0x80] sm:$0xff]  ;;  %s4255_s17 = scalar_lea.vmem [#allocation5], %s2158_s14  ;;  %s2297_s14 = sshll.u32 %s2749_s22, 10 }
  0x30   : > { %383 = vadd.xlane.f32.xlu1 %v382_v7  ;;  %v2863_v13 = vld [vmem:[%s2820_s25 + $0x10] sm:$0xff]  ;;  %v2866_v14 = vld [vmem:[%s2820_s25 + $0x18] sm:$0xff]  ;;  %v385_v16 = vadd.f32 %v2860_v12, %v2857_v11  ;;  %v2878_v19 = vld [vmem:[%s2820_s25 + $0x88] sm:$0xff]  ;;  %s2073_s28 = scalar_lea.hbm %s4705_s5, %s2297_s14  ;;  %s2074_s9 = sshll.u32 %s4255_s17, 4  ;;  %s2075_s9 = int_to_ptr.vmem [resolvable:$true] %s2074_s9 }
  0x31   : > { %377 = vadd.xlane.f32.xlu0 %v376_v8  ;;  %v379_v17 = vadd.f32 %v2866_v14, %v2863_v13  ;;  %v2881_v20 = vld [vmem:[%s2820_s25 + $0x70] sm:$0xff]  ;;  %v2884_v21 = vld [vmem:[%s2820_s25 + $0x78] sm:$0xff]  ;;  %v2887_v22 = vld [vmem:[%s2820_s25 + $0x60] sm:$0xff]  ;;  %v400_v24 = vadd.f32 %v2878_v19, %v2875_v18  ;;  %s2076_s10 = sshll.u32 %s2073_s28, 4  ;;  %s2061_s22 = scalar_lea.sflag [#allocation4], %s2814_s12  ;;  %s2077_s10 = int_to_ptr.hbm [resolvable:$true] %s2076_s10 }
  0x32   : > { %v2890_v23 = vld [vmem:[%s2820_s25 + $0x68] sm:$0xff]  ;;  %v397_v25 = vadd.f32 %v2884_v21, %v2881_v20  ;;  %v2899_v27 = vld [vmem:[%s2820_s25 + $0xb0] sm:$0xff]  ;;  %v2902_v28 = vld [vmem:[%s2820_s25 + $0xb8] sm:$0xff]  ;;  %s2634_s7 = sshra.s32 %s2077_s10, 4  ;;  %s2640_s13 = scalar_lea.hbm %s4705_s5, 2048  ;;  %s2635_s7 = int_to_ptr.hbm [resolvable:$true] %s2634_s7 }
  0x33   : > { %v394_v26 = vadd.f32 %v2890_v23, %v2887_v22  ;;  %v2905_v29 = vld [vmem:[%s2820_s25 + $0xa0] sm:$0xff]  ;;  %v2908_v30 = vld [vmem:[%s2820_s25 + $0xa8] sm:$0xff]  ;;  %v2911_v31 = vld [vmem:[%s2820_s25 + $0x90] sm:$0xff]  ;;  %v409_v33 = vadd.f32 %v2902_v28, %v2899_v27  ;;  %s2636_s11 = scalar_lea.hbm %s2635_s7, 1024  ;;  %p2641_p0 = scmp.lt.s32.totalorder %s2635_s7, %s4705_s5 }
  0x34   : > { %v2914_v32 = vld [vmem:[%s2820_s25 + $0x98] sm:$0xff]  ;;  %v406_v34 = vadd.f32 %v2908_v30, %v2905_v29  ;;  %v2923_v36 = vld [vmem:[%s2820_s25 + $0xe0] sm:$0xff]  ;;  %v2926_v37 = vld [vmem:[%s2820_s25 + $0xe8] sm:$0xff]  ;;  %p2637_p6 = scmp.ne.s32.totalorder %s2635_s7, %s2636_s11  ;;  %p2642_p1 = scmp.lt.s32.totalorder %s2640_s13, %s2636_s11 }
  0x35   : > { %v403_v35 = vadd.f32 %v2914_v32, %v2911_v31  ;;  %v2929_v38 = vld [vmem:[%s2820_s25 + $0xd0] sm:$0xff]  ;;  %v2932_v39 = vld [vmem:[%s2820_s25 + $0xd8] sm:$0xff]  ;;  %v2935_v40 = vld [vmem:[%s2820_s25 + $0xc0] sm:$0xff]  ;;  %v418_v42 = vadd.f32 %v2926_v37, %v2923_v36 }
  0x36   : > { %v2938_v41 = vld [vmem:[%s2820_s25 + $0xc8] sm:$0xff]  ;;  %v415_v43 = vadd.f32 %v2932_v39, %v2929_v38  ;;  %v2947_v45 = vld [vmem:[%s2820_s25 + $0x110] sm:$0xff]  ;;  %v2950_v46 = vld [vmem:[%s2820_s25 + $0x118] sm:$0xff]  ;;  %p2638_p9 = pnand %p2637_p6, %p2778_p11  ;;  %p2643_p3 = por %p2642_p1, %p2641_p0 }
  0x37   : > { %392 = vadd.xlane.f32.xlu2 %v391_v15  ;;  %v412_v44 = vadd.f32 %v2938_v41, %v2935_v40  ;;  %v2953_v47 = vld [vmem:[%s2820_s25 + $0x100] sm:$0xff]  ;;  %v2956_v48 = vld [vmem:[%s2820_s25 + $0x108] sm:$0xff]  ;;  %v2959_v49 = vld [vmem:[%s2820_s25 + $0xf0] sm:$0xff]  ;;  %v427_v51 = vadd.f32 %v2950_v46, %v2947_v45 }
  0x38   : > { %386 = vadd.xlane.f32.xlu1 %v385_v16  ;;  %v2962_v50 = vld [vmem:[%s2820_s25 + $0xf8] sm:$0xff]  ;;  %v424_v52 = vadd.f32 %v2956_v48, %v2953_v47  ;;  %v2971_v54 = vld [vmem:[%s2820_s25 + $0x140] sm:$0xff]  ;;  %v2974_v55 = vld [vmem:[%s2820_s25 + $0x148] sm:$0xff]  ;;  %p2639_p13 = pneg %p2638_p9 }
  0x39   : > { %380 = vadd.xlane.f32.xlu0 %v379_v17  ;;  %v421_v53 = vadd.f32 %v2962_v50, %v2959_v49  ;;  %v2977_v56 = vld [vmem:[%s2820_s25 + $0x130] sm:$0xff]  ;;  %v2980_v57 = vld [vmem:[%s2820_s25 + $0x138] sm:$0xff]  ;;  %v2983_v58 = vld [vmem:[%s2820_s25 + $0x120] sm:$0xff]  ;;  %v436_v60 = vadd.f32 %v2974_v55, %v2971_v54 }
  0x3a   : > { %v2986_v59 = vld [vmem:[%s2820_s25 + $0x128] sm:$0xff]  ;;  %v433_v61 = vadd.f32 %v2980_v57, %v2977_v56  ;;  %v2995_v63 = vld [vmem:[%s2820_s25 + $0x170] sm:$0xff]  ;;  %v2998_v3 = vld [vmem:[%s2820_s25 + $0x178] sm:$0xff]  ;;  %p2644_p4 = pnand %p2643_p3, %p2639_p13 }
  0x3b   : > { %v430_v62 = vadd.f32 %v2986_v59, %v2983_v58  ;;  %4784 = vst [vmem:[#allocation8_spill] sm:$0xff] %v2995_v63  ;;  %v3001_v7 = vld [vmem:[%s2820_s25 + $0x160] sm:$0xff]  ;;  %v3004_v8 = vld [vmem:[%s2820_s25 + $0x168] sm:$0xff]  ;;  %v3007_v15 = vld [vmem:[%s2820_s25 + $0x150] sm:$0xff]  ;;  %v445_v17 = vadd.f32 %v2998_v3, %v2995_v63 }
  0x3c   : > { %4785 = vst [vmem:[#allocation9_spill] sm:$0xff] %v2998_v3  ;;  %v3010_v16 = vld [vmem:[%s2820_s25 + $0x158] sm:$0xff]  ;;  %v3217_v63 = vld [vmem:[%s2820_s25 + $0x320] sm:$0xff] }
  0x3d   : > { %4833 = vst [vmem:[#allocation57_spill] sm:$0xff] %v3217_v63  ;;  %v3370_v3 = vld [vmem:[%s2820_s25 + $0x3f8] sm:$0xff] }
  0x3f   : > { %401 = vadd.xlane.f32.xlu2 %v400_v24  ;;  %v442_v24 = vadd.f32 %v3004_v8, %v3001_v7 }
  0x40   : > { %398 = vadd.xlane.f32.xlu1 %v397_v25  ;;  %v439_v25 = vadd.f32 %v3010_v16, %v3007_v15 }
  0x41   : > { %395 = vadd.xlane.f32.xlu0 %v394_v26  ;;  %v3019_v26 = vld [vmem:[%s2820_s25 + $0x1a0] sm:$0xff] }
  0x42   : > { %4786 = vst [vmem:[#allocation10_spill] sm:$0xff] %v3019_v26 }
  0x47   : > { %410 = vadd.xlane.f32.xlu2 %v409_v33  ;;  %v3022_v33 = vld [vmem:[%s2820_s25 + $0x1a8] sm:$0xff] }
  0x48   : > { %407 = vadd.xlane.f32.xlu1 %v406_v34  ;;  %4787 = vst [vmem:[#allocation11_spill] sm:$0xff] %v3022_v33  ;;  %v3025_v34 = vld [vmem:[%s2820_s25 + $0x190] sm:$0xff] }
  0x49   : > { %404 = vadd.xlane.f32.xlu0 %v403_v35  ;;  %v3028_v35 = vld [vmem:[%s2820_s25 + $0x198] sm:$0xff] }
  0x4f   : > { %419 = vadd.xlane.f32.xlu2 %v418_v42  ;;  %v3031_v42 = vld [vmem:[%s2820_s25 + $0x180] sm:$0xff] }
  0x50   : > { %416 = vadd.xlane.f32.xlu1 %v415_v43  ;;  %v3034_v43 = vld [vmem:[%s2820_s25 + $0x188] sm:$0xff] }
  0x51   : > { %413 = vadd.xlane.f32.xlu0 %v412_v44  ;;  %v454_v44 = vadd.f32 %v3022_v33, %v3019_v26  ;;  %v3070_v26 = vld [vmem:[%s2820_s25 + $0x208] sm:$0xff]  ;;  %v3079_v33 = vld [vmem:[%s2820_s25 + $0x1e0] sm:$0xff] }
  0x52   : > { %4795 = vst [vmem:[#allocation19_spill] sm:$0xff] %v3070_v26 }
  0x53   : > { %4798 = vst [vmem:[#allocation22_spill] sm:$0xff] %v3079_v33 }
  0x57   : > { %428 = vadd.xlane.f32.xlu2 %v427_v51  ;;  %v451_v51 = vadd.f32 %v3028_v35, %v3025_v34 }
  0x58   : > { %425 = vadd.xlane.f32.xlu1 %v424_v52  ;;  %v448_v52 = vadd.f32 %v3034_v43, %v3031_v42 }
  0x59   : > { %422 = vadd.xlane.f32.xlu0 %v421_v53  ;;  %v3043_v53 = vld [vmem:[%s2820_s25 + $0x1d0] sm:$0xff] }
  0x5a   : > { %4788 = vst [vmem:[#allocation12_spill] sm:$0xff] %v3043_v53 }
  0x5f   : > { %437 = vadd.xlane.f32.xlu2 %v436_v60  ;;  %v3046_v60 = vld [vmem:[%s2820_s25 + $0x1d8] sm:$0xff] }
  0x60   : > { %434 = vadd.xlane.f32.xlu1 %v433_v61  ;;  %4789 = vst [vmem:[#allocation13_spill] sm:$0xff] %v3046_v60  ;;  %v3049_v61 = vld [vmem:[%s2820_s25 + $0x1c0] sm:$0xff] }
  0x61   : > { %431 = vadd.xlane.f32.xlu0 %v430_v62  ;;  %4790 = vst [vmem:[#allocation14_spill] sm:$0xff] %v3049_v61  ;;  %v3052_v62 = vld [vmem:[%s2820_s25 + $0x1c8] sm:$0xff] }
  0x62   : > { %4791 = vst [vmem:[#allocation15_spill] sm:$0xff] %v3052_v62 }
  0x67   : > { %446 = vadd.xlane.f32.xlu2 %v445_v17  ;;  %v3055_v17 = vld [vmem:[%s2820_s25 + $0x1b0] sm:$0xff] }
  0x68   : > { %443 = vadd.xlane.f32.xlu1 %v442_v24  ;;  %4792 = vst [vmem:[#allocation16_spill] sm:$0xff] %v3055_v17  ;;  %v3058_v24 = vld [vmem:[%s2820_s25 + $0x1b8] sm:$0xff] }
  0x69   : > { %440 = vadd.xlane.f32.xlu0 %v439_v25  ;;  %4793 = vst [vmem:[#allocation17_spill] sm:$0xff] %v3058_v24  ;;  %v463_v25 = vadd.f32 %v3046_v60, %v3043_v53  ;;  %v3073_v53 = vld [vmem:[%s2820_s25 + $0x1f0] sm:$0xff]  ;;  %v3076_v60 = vld [vmem:[%s2820_s25 + $0x1f8] sm:$0xff] }
  0x6a   : > { %4796 = vst [vmem:[#allocation20_spill] sm:$0xff] %v3073_v53 }
  0x6b   : > { %4797 = vst [vmem:[#allocation21_spill] sm:$0xff] %v3076_v60 }
  0x6f   : > { %455 = vadd.xlane.f32.xlu2 %v454_v44  ;;  %v460_v44 = vadd.f32 %v3052_v62, %v3049_v61  ;;  %v3094_v61 = vld [vmem:[%s2820_s25 + $0x238] sm:$0xff]  ;;  %v3193_v62 = vld [vmem:[%s2820_s25 + $0x2e0] sm:$0xff] }
  0x70   : > { %452 = vadd.xlane.f32.xlu1 %v451_v51  ;;  %v457_v51 = vadd.f32 %v3058_v24, %v3055_v17  ;;  %v3082_v17 = vld [vmem:[%s2820_s25 + $0x1e8] sm:$0xff]  ;;  %v3091_v24 = vld [vmem:[%s2820_s25 + $0x230] sm:$0xff]  ;;  %4801 = vst [vmem:[#allocation25_spill] sm:$0xff] %v3094_v61 }
  0x71   : > { %449 = vadd.xlane.f32.xlu0 %v448_v52  ;;  %v3067_v52 = vld [vmem:[%s2820_s25 + $0x200] sm:$0xff]  ;;  %4799 = vst [vmem:[#allocation23_spill] sm:$0xff] %v3082_v17 }
  0x72   : > { %4794 = vst [vmem:[#allocation18_spill] sm:$0xff] %v3067_v52 }
  0x73   : > { %4800 = vst [vmem:[#allocation24_spill] sm:$0xff] %v3091_v24 }
  0x74   : > { %4826 = vst [vmem:[#allocation50_spill] sm:$0xff] %v3193_v62 }
  0x77   : > { %464 = vadd.xlane.f32.xlu2 %v463_v25  ;;  %v472_v25 = vadd.f32 %v3070_v26, %v3067_v52  ;;  %v3097_v52 = vld [vmem:[%s2820_s25 + $0x220] sm:$0xff]  ;;  %v3100_v26 = vld [vmem:[%s2820_s25 + $0x228] sm:$0xff] }
  0x78   : > { %461 = vadd.xlane.f32.xlu1 %v460_v44  ;;  %v469_v44 = vadd.f32 %v3076_v60, %v3073_v53  ;;  %4802 = vst [vmem:[#allocation26_spill] sm:$0xff] %v3097_v52  ;;  %v3103_v53 = vld [vmem:[%s2820_s25 + $0x210] sm:$0xff]  ;;  %v3118_v60 = vld [vmem:[%s2820_s25 + $0x268] sm:$0xff] }
  0x79   : > { %458 = vadd.xlane.f32.xlu0 %v457_v51  ;;  %v466_v51 = vadd.f32 %v3082_v17, %v3079_v33  ;;  %4803 = vst [vmem:[#allocation27_spill] sm:$0xff] %v3100_v26  ;;  %v3106_v33 = vld [vmem:[%s2820_s25 + $0x218] sm:$0xff]  ;;  %v3115_v17 = vld [vmem:[%s2820_s25 + $0x260] sm:$0xff] }
  0x7a   : > { %4804 = vst [vmem:[#allocation28_spill] sm:$0xff] %v3103_v53 }
  0x7b   : > { %4805 = vst [vmem:[#allocation29_spill] sm:$0xff] %v3106_v33 }
  0x7c   : > { %4806 = vst [vmem:[#allocation30_spill] sm:$0xff] %v3115_v17 }
  0x7d   : > { %4807 = vst [vmem:[#allocation31_spill] sm:$0xff] %v3118_v60 }
  0x7f   : > { %473 = vadd.xlane.f32.xlu2 %v472_v25  ;;  %v481_v25 = vadd.f32 %v3094_v61, %v3091_v24  ;;  %v3121_v24 = vld [vmem:[%s2820_s25 + $0x250] sm:$0xff]  ;;  %v3124_v61 = vld [vmem:[%s2820_s25 + $0x258] sm:$0xff] }
  0x80   : > { %470 = vadd.xlane.f32.xlu1 %v469_v44  ;;  %v478_v44 = vadd.f32 %v3100_v26, %v3097_v52  ;;  %4808 = vst [vmem:[#allocation32_spill] sm:$0xff] %v3121_v24  ;;  %v3127_v52 = vld [vmem:[%s2820_s25 + $0x240] sm:$0xff]  ;;  %v3142_v26 = vld [vmem:[%s2820_s25 + $0x298] sm:$0xff] }
  0x81   : > { %467 = vadd.xlane.f32.xlu0 %v466_v51  ;;  %v475_v51 = vadd.f32 %v3106_v33, %v3103_v53  ;;  %4809 = vst [vmem:[#allocation33_spill] sm:$0xff] %v3124_v61  ;;  %v3130_v53 = vld [vmem:[%s2820_s25 + $0x248] sm:$0xff]  ;;  %v3139_v33 = vld [vmem:[%s2820_s25 + $0x290] sm:$0xff] }
  0x82   : > { %4810 = vst [vmem:[#allocation34_spill] sm:$0xff] %v3127_v52 }
  0x83   : > { %4811 = vst [vmem:[#allocation35_spill] sm:$0xff] %v3130_v53 }
  0x84   : > { %4812 = vst [vmem:[#allocation36_spill] sm:$0xff] %v3139_v33 }
  0x85   : > { %4813 = vst [vmem:[#allocation37_spill] sm:$0xff] %v3142_v26 }
  0x87   : > { %482 = vadd.xlane.f32.xlu2 %v481_v25  ;;  %v490_v25 = vadd.f32 %v3118_v60, %v3115_v17  ;;  %v3145_v17 = vld [vmem:[%s2820_s25 + $0x280] sm:$0xff]  ;;  %v3148_v60 = vld [vmem:[%s2820_s25 + $0x288] sm:$0xff] }
  0x88   : > { %479 = vadd.xlane.f32.xlu1 %v478_v44  ;;  %v487_v44 = vadd.f32 %v3124_v61, %v3121_v24  ;;  %4814 = vst [vmem:[#allocation38_spill] sm:$0xff] %v3145_v17  ;;  %v3151_v24 = vld [vmem:[%s2820_s25 + $0x270] sm:$0xff]  ;;  %v3166_v61 = vld [vmem:[%s2820_s25 + $0x2c8] sm:$0xff] }
  0x89   : > { %476 = vadd.xlane.f32.xlu0 %v475_v51  ;;  %v484_v51 = vadd.f32 %v3130_v53, %v3127_v52  ;;  %4815 = vst [vmem:[#allocation39_spill] sm:$0xff] %v3148_v60  ;;  %v3154_v52 = vld [vmem:[%s2820_s25 + $0x278] sm:$0xff]  ;;  %v3163_v53 = vld [vmem:[%s2820_s25 + $0x2c0] sm:$0xff] }
  0x8a   : > { %4816 = vst [vmem:[#allocation40_spill] sm:$0xff] %v3151_v24 }
  0x8b   : > { %4817 = vst [vmem:[#allocation41_spill] sm:$0xff] %v3154_v52 }
  0x8c   : > { %4818 = vst [vmem:[#allocation42_spill] sm:$0xff] %v3163_v53 }
  0x8d   : > { %4819 = vst [vmem:[#allocation43_spill] sm:$0xff] %v3166_v61 }
  0x8f   : > { %491 = vadd.xlane.f32.xlu2 %v490_v25  ;;  %v499_v25 = vadd.f32 %v3142_v26, %v3139_v33  ;;  %v3169_v33 = vld [vmem:[%s2820_s25 + $0x2b0] sm:$0xff]  ;;  %v3172_v26 = vld [vmem:[%s2820_s25 + $0x2b8] sm:$0xff] }
  0x90   : > { %488 = vadd.xlane.f32.xlu1 %v487_v44  ;;  %v496_v44 = vadd.f32 %v3148_v60, %v3145_v17  ;;  %4820 = vst [vmem:[#allocation44_spill] sm:$0xff] %v3169_v33  ;;  %v3175_v17 = vld [vmem:[%s2820_s25 + $0x2a0] sm:$0xff]  ;;  %v3190_v60 = vld [vmem:[%s2820_s25 + $0x2f8] sm:$0xff] }
  0x91   : > { %485 = vadd.xlane.f32.xlu0 %v484_v51  ;;  %v493_v51 = vadd.f32 %v3154_v52, %v3151_v24  ;;  %4821 = vst [vmem:[#allocation45_spill] sm:$0xff] %v3172_v26  ;;  %v3178_v24 = vld [vmem:[%s2820_s25 + $0x2a8] sm:$0xff]  ;;  %v3187_v52 = vld [vmem:[%s2820_s25 + $0x2f0] sm:$0xff] }
  0x92   : > { %4822 = vst [vmem:[#allocation46_spill] sm:$0xff] %v3175_v17 }
  0x93   : > { %4823 = vst [vmem:[#allocation47_spill] sm:$0xff] %v3178_v24 }
  0x94   : > { %4824 = vst [vmem:[#allocation48_spill] sm:$0xff] %v3187_v52 }
  0x95   : > { %4825 = vst [vmem:[#allocation49_spill] sm:$0xff] %v3190_v60 }
  0x97   : > { %500 = vadd.xlane.f32.xlu2 %v499_v25  ;;  %v508_v25 = vadd.f32 %v3166_v61, %v3163_v53  ;;  %v3196_v53 = vld [vmem:[%s2820_s25 + $0x2e8] sm:$0xff]  ;;  %v3199_v61 = vld [vmem:[%s2820_s25 + $0x2d0] sm:$0xff] }
  0x98   : > { %497 = vadd.xlane.f32.xlu1 %v496_v44  ;;  %v505_v44 = vadd.f32 %v3172_v26, %v3169_v33  ;;  %4827 = vst [vmem:[#allocation51_spill] sm:$0xff] %v3196_v53  ;;  %v514_v33 = vadd.f32 %v3196_v53, %v3193_v62  ;;  %v3247_v53 = vld [vmem:[%s2820_s25 + $0x350] sm:$0xff] }
  0x99   : > { %494 = vadd.xlane.f32.xlu0 %v493_v51  ;;  %v502_v51 = vadd.f32 %v3178_v24, %v3175_v17  ;;  %4828 = vst [vmem:[#allocation52_spill] sm:$0xff] %v3199_v61  ;;  %v3202_v17 = vld [vmem:[%s2820_s25 + $0x2d8] sm:$0xff]  ;;  %v517_v24 = vadd.f32 %v3190_v60, %v3187_v52  ;;  %v3229_v52 = vld [vmem:[%s2820_s25 + $0x300] sm:$0xff]  ;;  %v3232_v60 = vld [vmem:[%s2820_s25 + $0x308] sm:$0xff] }
  0x9a   : > { %4829 = vst [vmem:[#allocation53_spill] sm:$0xff] %v3202_v17  ;;  %v511_v26 = vadd.f32 %v3202_v17, %v3199_v61  ;;  %v520_v62 = vadd.f32 %v3232_v60, %v3229_v52 }
  0x9b   : > { %4837 = vst [vmem:[#allocation61_spill] sm:$0xff] %v3229_v52 }
  0x9c   : > { %4838 = vst [vmem:[#allocation62_spill] sm:$0xff] %v3232_v60 }
  0x9d   : > { %4842 = vst [vmem:[#allocation66_spill] sm:$0xff] %v3247_v53 }
  0x9f   : > { %509 = vadd.xlane.f32.xlu2 %v508_v25 }
  0xa0   : > { %506 = vadd.xlane.f32.xlu1 %v505_v44 }
  0xa1   : > { %503 = vadd.xlane.f32.xlu0 %v502_v51 }
  0xa2   : > { %v3204_v25 = vpop.xlane.xlu2 %389 }
  0xa3   : > { %4830 = vst [vmem:[#allocation54_spill] sm:$0xff] %v3204_v25  ;;  %v3206_v44 = vpop.xlane.xlu1 %383  ;;  %v3220_v25 = vld [vmem:[%s2820_s25 + $0x328] sm:$0xff] }
  0xa4   : > { %4831 = vst [vmem:[#allocation55_spill] sm:$0xff] %v3206_v44  ;;  %v3208_v51 = vpop.xlane.xlu0 %377  ;;  %v3226_v44 = vld [vmem:[%s2820_s25 + $0x318] sm:$0xff]  ;;  %v526_v61 = vadd.f32 %v3220_v25, %v3217_v63  ;;  %v3259_v63 = vld [vmem:[%s2820_s25 + $0x330] sm:$0xff] }
  0xa5   : > { %4832 = vst [vmem:[#allocation56_spill] sm:$0xff] %v3208_v51  ;;  %v3223_v51 = vld [vmem:[%s2820_s25 + $0x310] sm:$0xff] }
  0xa6   : > { %4834 = vst [vmem:[#allocation58_spill] sm:$0xff] %v3220_v25  ;;  %v523_v17 = vadd.f32 %v3226_v44, %v3223_v51  ;;  %v3262_v25 = vld [vmem:[%s2820_s25 + $0x338] sm:$0xff] }
  0xa7   : > { %518 = vadd.xlane.f32.xlu2 %v517_v24  ;;  %4835 = vst [vmem:[#allocation59_spill] sm:$0xff] %v3223_v51  ;;  %v529_v51 = vadd.f32 %v3262_v25, %v3259_v63 }
  0xa8   : > { %515 = vadd.xlane.f32.xlu1 %v514_v33  ;;  %4836 = vst [vmem:[#allocation60_spill] sm:$0xff] %v3226_v44  ;;  %v3277_v44 = vld [vmem:[%s2820_s25 + $0x380] sm:$0xff] }
  0xa9   : > { %512 = vadd.xlane.f32.xlu0 %v511_v26  ;;  %4846 = vst [vmem:[#allocation70_spill] sm:$0xff] %v3259_v63 }
  0xaa   : > { %v3234_v33 = vpop.xlane.xlu2 %392  ;;  %4847 = vst [vmem:[#allocation71_spill] sm:$0xff] %v3262_v25 }
  0xab   : > { %4839 = vst [vmem:[#allocation63_spill] sm:$0xff] %v3234_v33  ;;  %v3236_v26 = vpop.xlane.xlu1 %386  ;;  %v3250_v33 = vld [vmem:[%s2820_s25 + $0x358] sm:$0xff] }
  0xac   : > { %4840 = vst [vmem:[#allocation64_spill] sm:$0xff] %v3236_v26  ;;  %v3238_v24 = vpop.xlane.xlu0 %380  ;;  %v3256_v26 = vld [vmem:[%s2820_s25 + $0x348] sm:$0xff]  ;;  %v535_v52 = vadd.f32 %v3250_v33, %v3247_v53  ;;  %v3289_v53 = vld [vmem:[%s2820_s25 + $0x360] sm:$0xff] }
  0xad   : > { %4841 = vst [vmem:[#allocation65_spill] sm:$0xff] %v3238_v24  ;;  %v3253_v24 = vld [vmem:[%s2820_s25 + $0x340] sm:$0xff] }
  0xae   : > { %4843 = vst [vmem:[#allocation67_spill] sm:$0xff] %v3250_v33  ;;  %v532_v60 = vadd.f32 %v3256_v26, %v3253_v24  ;;  %v3292_v33 = vld [vmem:[%s2820_s25 + $0x368] sm:$0xff] }
  0xaf   : > { %527 = vadd.xlane.f32.xlu2 %v526_v61  ;;  %4844 = vst [vmem:[#allocation68_spill] sm:$0xff] %v3253_v24  ;;  %v538_v24 = vadd.f32 %v3292_v33, %v3289_v53 }
  0xb0   : > { %524 = vadd.xlane.f32.xlu1 %v523_v17  ;;  %4845 = vst [vmem:[#allocation69_spill] sm:$0xff] %v3256_v26  ;;  %v3307_v26 = vld [vmem:[%s2820_s25 + $0x3b0] sm:$0xff] }
  0xb1   : > { %521 = vadd.xlane.f32.xlu0 %v520_v62  ;;  %4851 = vst [vmem:[#allocation75_spill] sm:$0xff] %v3277_v44 }
  0xb2   : > { %v3264_v61 = vpop.xlane.xlu2 %401  ;;  %4855 = vst [vmem:[#allocation79_spill] sm:$0xff] %v3289_v53  ;;  %v3322_v53 = vld [vmem:[%s2820_s25 + $0x398] sm:$0xff] }
  0xb3   : > { %4848 = vst [vmem:[#allocation72_spill] sm:$0xff] %v3264_v61  ;;  %v3266_v62 = vpop.xlane.xlu1 %398  ;;  %v3280_v61 = vld [vmem:[%s2820_s25 + $0x388] sm:$0xff] }
  0xb4   : > { %4849 = vst [vmem:[#allocation73_spill] sm:$0xff] %v3266_v62  ;;  %v3268_v17 = vpop.xlane.xlu0 %395  ;;  %v3283_v62 = vld [vmem:[%s2820_s25 + $0x370] sm:$0xff]  ;;  %v544_v63 = vadd.f32 %v3280_v61, %v3277_v44  ;;  %v3316_v44 = vld [vmem:[%s2820_s25 + $0x3a8] sm:$0xff] }
  0xb5   : > { %4850 = vst [vmem:[#allocation74_spill] sm:$0xff] %v3268_v17  ;;  %v3286_v17 = vld [vmem:[%s2820_s25 + $0x378] sm:$0xff] }
  0xb6   : > { %4852 = vst [vmem:[#allocation76_spill] sm:$0xff] %v3280_v61  ;;  %v541_v25 = vadd.f32 %v3286_v17, %v3283_v62  ;;  %v3319_v61 = vld [vmem:[%s2820_s25 + $0x390] sm:$0xff] }
  0xb7   : > { %536 = vadd.xlane.f32.xlu2 %v535_v52  ;;  %4853 = vst [vmem:[#allocation77_spill] sm:$0xff] %v3283_v62 }
  0xb8   : > { %533 = vadd.xlane.f32.xlu1 %v532_v60  ;;  %4854 = vst [vmem:[#allocation78_spill] sm:$0xff] %v3286_v17  ;;  %v547_v17 = vadd.f32 %v3322_v53, %v3319_v61 }
  0xb9   : > { %530 = vadd.xlane.f32.xlu0 %v529_v51  ;;  %4856 = vst [vmem:[#allocation80_spill] sm:$0xff] %v3292_v33 }
  0xba   : > { %v3294_v60 = vpop.xlane.xlu2 %410  ;;  %4860 = vst [vmem:[#allocation84_spill] sm:$0xff] %v3307_v26 }
  0xbb   : > { %4857 = vst [vmem:[#allocation81_spill] sm:$0xff] %v3294_v60  ;;  %v3296_v52 = vpop.xlane.xlu1 %407  ;;  %v3310_v60 = vld [vmem:[%s2820_s25 + $0x3b8] sm:$0xff] }
  0xbc   : > { %4858 = vst [vmem:[#allocation82_spill] sm:$0xff] %v3296_v52  ;;  %v3298_v51 = vpop.xlane.xlu0 %404  ;;  %v3313_v52 = vld [vmem:[%s2820_s25 + $0x3a0] sm:$0xff]  ;;  %v553_v33 = vadd.f32 %v3310_v60, %v3307_v26 }
  0xbd   : > { %4859 = vst [vmem:[#allocation83_spill] sm:$0xff] %v3298_v51  ;;  %v550_v62 = vadd.f32 %v3316_v44, %v3313_v52  ;;  %v3337_v51 = vld [vmem:[%s2820_s25 + $0x3e0] sm:$0xff] }
  0xbe   : > { %4861 = vst [vmem:[#allocation85_spill] sm:$0xff] %v3310_v60  ;;  %v3349_v26 = vld [vmem:[%s2820_s25 + $0x3c0] sm:$0xff]  ;;  %v3352_v60 = vld [vmem:[%s2820_s25 + $0x3c8] sm:$0xff] }
  0xbf   : > { %545 = vadd.xlane.f32.xlu2 %v544_v63  ;;  %4862 = vst [vmem:[#allocation86_spill] sm:$0xff] %v3313_v52 }
  0xc0   : > { %542 = vadd.xlane.f32.xlu1 %v541_v25  ;;  %4863 = vst [vmem:[#allocation87_spill] sm:$0xff] %v3316_v44  ;;  %v3367_v44 = vld [vmem:[%s2820_s25 + $0x3f0] sm:$0xff] }
  0xc1   : > { %539 = vadd.xlane.f32.xlu0 %v538_v24  ;;  %4864 = vst [vmem:[#allocation88_spill] sm:$0xff] %v3319_v61 }
  0xc2   : > { %4865 = vst [vmem:[#allocation89_spill] sm:$0xff] %v3322_v53  ;;  %v3324_v63 = vpop.xlane.xlu2 %419  ;;  %v556_v53 = vadd.f32 %v3352_v60, %v3349_v26 }
  0xc3   : > { %4866 = vst [vmem:[#allocation90_spill] sm:$0xff] %v3324_v63  ;;  %v3326_v25 = vpop.xlane.xlu1 %416  ;;  %v3340_v63 = vld [vmem:[%s2820_s25 + $0x3e8] sm:$0xff] }
  0xc4   : > { %4867 = vst [vmem:[#allocation91_spill] sm:$0xff] %v3326_v25  ;;  %v3328_v24 = vpop.xlane.xlu0 %413  ;;  %v3343_v25 = vld [vmem:[%s2820_s25 + $0x3d0] sm:$0xff] }
  0xc5   : > { %4868 = vst [vmem:[#allocation92_spill] sm:$0xff] %v3328_v24  ;;  %v3346_v24 = vld [vmem:[%s2820_s25 + $0x3d8] sm:$0xff] }
  0xc6   : > { %4869 = vst [vmem:[#allocation93_spill] sm:$0xff] %v3337_v51 }
  0xc7   : > { %554 = vadd.xlane.f32.xlu2 %v553_v33  ;;  %4870 = vst [vmem:[#allocation94_spill] sm:$0xff] %v3340_v63 }
  0xc8   : > { %551 = vadd.xlane.f32.xlu1 %v550_v62  ;;  %4871 = vst [vmem:[#allocation95_spill] sm:$0xff] %v3349_v26  ;;  %v562_v62 = vadd.f32 %v3340_v63, %v3337_v51  ;;  %v642_v51 = vmax.f32 %v2863_v13, %v2866_v14  ;;  %v639_v63 = vmax.f32 %v2841_v5, %v2844_v6 }
  0xc9   : > { %548 = vadd.xlane.f32.xlu0 %v547_v17  ;;  %v559_v17 = vadd.f32 %v3346_v24, %v3343_v25  ;;  %v651_v26 = vmax.f32 %v2827_v0, %v2830_v1  ;;  %v648_v13 = vmax.f32 %v2857_v11, %v2860_v12  ;;  %v645_v5 = vmax.f32 %v2833_v2, %v2838_v4 }
  0xca   : > { %v3354_v52 = vpop.xlane.xlu2 %428  ;;  %v657_v0 = vmax.f32 %v2887_v22, %v2890_v23  ;;  %v654_v1 = vmax.f32 %v2851_v9, %v2854_v10  ;;  %v669_v12 = vmax.f32 %v2905_v29, %v2908_v30  ;;  %v678_v23 = vmax.f32 %v2929_v38, %v2932_v39 }
  0xcb   : > { %4872 = vst [vmem:[#allocation96_spill] sm:$0xff] %v3354_v52  ;;  %v3356_v61 = vpop.xlane.xlu1 %425  ;;  %v675_v29 = vmax.f32 %v2935_v40, %v2938_v41  ;;  %v672_v30 = vmax.f32 %v2899_v27, %v2902_v28  ;;  %v684_v38 = vmax.f32 %v2959_v49, %v2962_v50  ;;  %v681_v39 = vmax.f32 %v2923_v36, %v2926_v37 }
  0xcc   : > { %4873 = vst [vmem:[#allocation97_spill] sm:$0xff] %v3356_v61  ;;  %v3358_v33 = vpop.xlane.xlu0 %422  ;;  %v696_v41 = vmax.f32 %v2977_v56, %v2980_v57  ;;  %v705_v50 = vmax.f32 %v3001_v7, %v3004_v8  ;;  %v702_v56 = vmax.f32 %v3007_v15, %v3010_v16  ;;  %v699_v57 = vmax.f32 %v2971_v54, %v2974_v55  ;;  %v4879_v8 = vld [vmem:[#allocation9_spill] sm:$0xff]  ;;  %v4880_v15 = vld [vmem:[#allocation8_spill] sm:$0xff] }
  0xcd   : > { %4874 = vst [vmem:[#allocation98_spill] sm:$0xff] %v3358_v33  ;;  %v711_v7 = vmax.f32 %v3031_v42, %v3034_v43  ;;  %v708_v16 = vmax.f32 %v4880_v15, %v4879_v8  ;;  %v4888_v42 = vld [vmem:[#allocation10_spill] sm:$0xff]  ;;  %v4899_v8 = vld [vmem:[#allocation29_spill] sm:$0xff]  ;;  %v4900_v15 = vld [vmem:[#allocation28_spill] sm:$0xff] }
  0xcf   : > { %563 = vadd.xlane.f32.xlu2 %v562_v62  ;;  %v565_v62 = vadd.f32 %v3370_v3, %v3367_v44 }
  0xd0   : > { %560 = vadd.xlane.f32.xlu1 %v559_v17 }
  0xd1   : > { %557 = vadd.xlane.f32.xlu0 %v556_v53 }
  0xd2   : > { %v3372_v52 = vpop.xlane.xlu2 %437 }
  0xd3   : > { %4875 = vst [vmem:[#allocation99_spill] sm:$0xff] %v3372_v52  ;;  %v3374_v61 = vpop.xlane.xlu1 %434 }
  0xd4   : > { %v3376_v33 = vpop.xlane.xlu0 %431 }
  0xd7   : > { %643 = vmax.xlane.f32.xlu2 %v642_v51 }
  0xd8   : > { %640 = vmax.xlane.f32.xlu1 %v639_v63  ;;  %v660_v63 = vmax.f32 %v2881_v20, %v2884_v21  ;;  %v666_v20 = vmax.f32 %v2911_v31, %v2914_v32  ;;  %v663_v21 = vmax.f32 %v2875_v18, %v2878_v19  ;;  %v687_v32 = vmax.f32 %v2953_v47, %v2956_v48 }
  0xd9   : > { %566 = vadd.xlane.f32.xlu0 %v565_v62  ;;  %v693_v47 = vmax.f32 %v2983_v58, %v2986_v59  ;;  %v690_v48 = vmax.f32 %v2947_v45, %v2950_v46  ;;  %v714_v59 = vmax.f32 %v3025_v34, %v3028_v35  ;;  %v4883_v62 = vld [vmem:[#allocation15_spill] sm:$0xff]  ;;  %v4886_v34 = vld [vmem:[#allocation16_spill] sm:$0xff] }
  0xda   : > { %v3384_v53 = vpop.xlane.xlu2 %446 }
  0xdb   : > { %v3386_v17 = vpop.xlane.xlu1 %443 }
  0xdc   : > { %v3388_v52 = vpop.xlane.xlu0 %440 }
  0xdf   : > { %652 = vmax.xlane.f32.xlu2 %v651_v26 }
  0xe0   : > { %649 = vmax.xlane.f32.xlu1 %v648_v13  ;;  %v4884_v13 = vld [vmem:[#allocation14_spill] sm:$0xff] }
  0xe1   : > { %646 = vmax.xlane.f32.xlu0 %v645_v5  ;;  %v723_v5 = vmax.f32 %v4884_v13, %v4883_v62  ;;  %v4901_v62 = vld [vmem:[#allocation19_spill] sm:$0xff]  ;;  %v4902_v13 = vld [vmem:[#allocation18_spill] sm:$0xff] }
  0xe2   : > { %v3396_v6 = vpop.xlane.xlu2 %455 }
  0xe3   : > { %v3398_v14 = vpop.xlane.xlu1 %452 }
  0xe4   : > { %v3400_v51 = vpop.xlane.xlu0 %449 }
  0xe7   : > { %661 = vmax.xlane.f32.xlu2 %v660_v63  ;;  %v4885_v63 = vld [vmem:[#allocation17_spill] sm:$0xff] }
  0xe8   : > { %658 = vmax.xlane.f32.xlu1 %v657_v0  ;;  %v720_v35 = vmax.f32 %v4886_v34, %v4885_v63  ;;  %v4887_v0 = vld [vmem:[#allocation11_spill] sm:$0xff] }
  0xe9   : > { %655 = vmax.xlane.f32.xlu0 %v654_v1  ;;  %v717_v43 = vmax.f32 %v4888_v42, %v4887_v0  ;;  %v4903_v0 = vld [vmem:[#allocation33_spill] sm:$0xff]  ;;  %v4904_v42 = vld [vmem:[#allocation32_spill] sm:$0xff] }
  0xea   : > { %v3408_v2 = vpop.xlane.xlu2 %464 }
  0xeb   : > { %v3410_v4 = vpop.xlane.xlu1 %461 }
  0xec   : > { %v3412_v11 = vpop.xlane.xlu0 %458 }
  0xef   : > { %670 = vmax.xlane.f32.xlu2 %v669_v12 }
  0xf0   : > { %667 = vmax.xlane.f32.xlu1 %v666_v20 }
  0xf1   : > { %664 = vmax.xlane.f32.xlu0 %v663_v21  ;;  %v4891_v21 = vld [vmem:[#allocation21_spill] sm:$0xff] }
  0xf2   : > { %v3420_v9 = vpop.xlane.xlu2 %473 }
  0xf3   : > { %4876 = vst [vmem:[#allocation100_spill] sm:$0xff] %v3420_v9  ;;  %v3422_v10 = vpop.xlane.xlu1 %470  ;;  %v4933_v9 = vld [vmem:[#allocation62_spill] sm:$0xff] }
  0xf4   : > { %v3424_v22 = vpop.xlane.xlu0 %467 }
  0xf5   : > { %4877 = vst [vmem:[#allocation101_spill] sm:$0xff] %v3424_v22 }
  0xf7   : > { %679 = vmax.xlane.f32.xlu2 %v678_v23  ;;  %v4892_v23 = vld [vmem:[#allocation20_spill] sm:$0xff] }
  0xf8   : > { %676 = vmax.xlane.f32.xlu1 %v675_v29  ;;  %v732_v29 = vmax.f32 %v4892_v23, %v4891_v21  ;;  %v4905_v21 = vld [vmem:[#allocation35_spill] sm:$0xff]  ;;  %v4906_v23 = vld [vmem:[#allocation34_spill] sm:$0xff] }
  0xf9   : > { %673 = vmax.xlane.f32.xlu0 %v672_v30  ;;  %v4893_v30 = vld [vmem:[#allocation23_spill] sm:$0xff] }
  0xfa   : > { %v3432_v18 = vpop.xlane.xlu2 %482 }
  0xfb   : > { %v3434_v19 = vpop.xlane.xlu1 %479 }
  0xfc   : > { %v3436_v31 = vpop.xlane.xlu0 %476 }
  0xfd   : > { %4878 = vst [vmem:[#allocation102_spill] sm:$0xff] %v3436_v31  ;;  %v4930_v31 = vld [vmem:[#allocation42_spill] sm:$0xff] }
  0xff   : > { %688 = vmax.xlane.f32.xlu2 %v687_v32  ;;  %v4894_v32 = vld [vmem:[#allocation22_spill] sm:$0xff] }
 0x100   : > { %685 = vmax.xlane.f32.xlu1 %v684_v38  ;;  %v729_v38 = vmax.f32 %v4894_v32, %v4893_v30  ;;  %v4907_v30 = vld [vmem:[#allocation25_spill] sm:$0xff]  ;;  %v4908_v32 = vld [vmem:[#allocation24_spill] sm:$0xff] }
 0x101   : > { %682 = vmax.xlane.f32.xlu0 %v681_v39  ;;  %v4895_v39 = vld [vmem:[#allocation13_spill] sm:$0xff] }
 0x102   : > { %v3444_v27 = vpop.xlane.xlu2 %491 }
 0x103   : > { %v3446_v28 = vpop.xlane.xlu1 %488 }
 0x104   : > { %v3448_v40 = vpop.xlane.xlu0 %485 }
 0x107   : > { %697 = vmax.xlane.f32.xlu2 %v696_v41  ;;  %v4896_v41 = vld [vmem:[#allocation12_spill] sm:$0xff] }
 0x108   : > { %694 = vmax.xlane.f32.xlu1 %v693_v47  ;;  %v726_v47 = vmax.f32 %v4896_v41, %v4895_v39 }
 0x109   : > { %691 = vmax.xlane.f32.xlu0 %v690_v48 }
 0x10a   : > { %v3456_v36 = vpop.xlane.xlu2 %500 }
 0x10b   : > { %v3458_v37 = vpop.xlane.xlu1 %497 }
 0x10c   : > { %v3460_v49 = vpop.xlane.xlu0 %494 }
 0x10f   : > { %706 = vmax.xlane.f32.xlu2 %v705_v50 }
 0x110   : > { %703 = vmax.xlane.f32.xlu1 %v702_v56 }
 0x111   : > { %700 = vmax.xlane.f32.xlu0 %v699_v57  ;;  %v4897_v57 = vld [vmem:[#allocation27_spill] sm:$0xff] }
 0x112   : > { %v3468_v45 = vpop.xlane.xlu2 %509 }
 0x113   : > { %v3470_v46 = vpop.xlane.xlu1 %506 }
 0x114   : > { %v3472_v58 = vpop.xlane.xlu0 %503 }
 0x117   : > { %715 = vmax.xlane.f32.xlu2 %v714_v59  ;;  %v4898_v59 = vld [vmem:[#allocation26_spill] sm:$0xff] }
 0x118   : > { %712 = vmax.xlane.f32.xlu1 %v711_v7  ;;  %v741_v7 = vmax.f32 %v4898_v59, %v4897_v57  ;;  %v4909_v57 = vld [vmem:[#allocation39_spill] sm:$0xff]  ;;  %v4910_v59 = vld [vmem:[#allocation38_spill] sm:$0xff] }
 0x119   : > { %709 = vmax.xlane.f32.xlu0 %v708_v16  ;;  %v738_v16 = vmax.f32 %v4900_v15, %v4899_v8  ;;  %v4911_v8 = vld [vmem:[#allocation41_spill] sm:$0xff]  ;;  %v4912_v15 = vld [vmem:[#allocation40_spill] sm:$0xff] }
 0x11a   : > { %v3480_v54 = vpop.xlane.xlu2 %518 }
 0x11b   : > { %v3482_v55 = vpop.xlane.xlu1 %515 }
 0x11c   : > { %4881 = vst [vmem:[#allocation9_spill] sm:$0xff] %v3482_v55  ;;  %v3484_v26 = vpop.xlane.xlu0 %512 }
 0x11d   : > { %4882 = vst [vmem:[#allocation8_spill] sm:$0xff] %v3484_v26 }
 0x11f   : > { %724 = vmax.xlane.f32.xlu2 %v723_v5  ;;  %v735_v5 = vmax.f32 %v4902_v13, %v4901_v62  ;;  %v4913_v62 = vld [vmem:[#allocation31_spill] sm:$0xff]  ;;  %v4914_v13 = vld [vmem:[#allocation30_spill] sm:$0xff] }
 0x120   : > { %721 = vmax.xlane.f32.xlu1 %v720_v35 }
 0x121   : > { %718 = vmax.xlane.f32.xlu0 %v717_v43  ;;  %v750_v43 = vmax.f32 %v4904_v42, %v4903_v0  ;;  %v2690_v42 = vmov 256.0  }
 0x122   : > { %v3492_v1 = vpop.xlane.xlu2 %527  ;;  %2396 = vrcp.f32 %v2690_v42  ;;  %v4926_v42 = vld [vmem:[#allocation50_spill] sm:$0xff] }
 0x123   : > { %v3494_v12 = vpop.xlane.xlu1 %524 }
 0x124   : > { %4889 = vst [vmem:[#allocation15_spill] sm:$0xff] %v3494_v12  ;;  %v3496_v20 = vpop.xlane.xlu0 %521  ;;  %v4928_v12 = vld [vmem:[#allocation52_spill] sm:$0xff] }
 0x125   : > { %4890 = vst [vmem:[#allocation14_spill] sm:$0xff] %v3496_v20 }
 0x127   : > { %733 = vmax.xlane.f32.xlu2 %v732_v29  ;;  %v747_v29 = vmax.f32 %v4906_v23, %v4905_v21  ;;  %v4917_v23 = vld [vmem:[#allocation45_spill] sm:$0xff] }
 0x128   : > { %730 = vmax.xlane.f32.xlu1 %v729_v38  ;;  %v744_v38 = vmax.f32 %v4908_v32, %v4907_v30  ;;  %v4919_v32 = vld [vmem:[#allocation47_spill] sm:$0xff] }
 0x129   : > { %727 = vmax.xlane.f32.xlu0 %v726_v47 }
 0x12a   : > { %v3504_v48 = vpop.xlane.xlu2 %536 }
 0x12b   : > { %v3506_v50 = vpop.xlane.xlu1 %533 }
 0x12c   : > { %v3508_v56 = vpop.xlane.xlu0 %530 }
 0x12f   : > { %742 = vmax.xlane.f32.xlu2 %v741_v7  ;;  %v759_v7 = vmax.f32 %v4910_v59, %v4909_v57  ;;  %v4921_v59 = vld [vmem:[#allocation37_spill] sm:$0xff] }
 0x130   : > { %739 = vmax.xlane.f32.xlu1 %v738_v16  ;;  %v756_v16 = vmax.f32 %v4912_v15, %v4911_v8  ;;  %v4922_v8 = vld [vmem:[#allocation36_spill] sm:$0xff] }
 0x131   : > { %736 = vmax.xlane.f32.xlu0 %v735_v5  ;;  %v753_v5 = vmax.f32 %v4914_v13, %v4913_v62  ;;  %v762_v15 = vmax.f32 %v4922_v8, %v4921_v59 }
 0x132   : > { %v3516_v63 = vpop.xlane.xlu2 %545 }
 0x133   : > { %v3518_v34 = vpop.xlane.xlu1 %542 }
 0x134   : > { %v3520_v35 = vpop.xlane.xlu0 %539 }
 0x137   : > { %751 = vmax.xlane.f32.xlu2 %v750_v43 }
 0x138   : > { %748 = vmax.xlane.f32.xlu1 %v747_v29  ;;  %v4918_v29 = vld [vmem:[#allocation44_spill] sm:$0xff] }
 0x139   : > { %745 = vmax.xlane.f32.xlu0 %v744_v38  ;;  %v768_v30 = vmax.f32 %v4918_v29, %v4917_v23  ;;  %v4920_v38 = vld [vmem:[#allocation46_spill] sm:$0xff]  ;;  %v4927_v29 = vld [vmem:[#allocation53_spill] sm:$0xff] }
 0x13a   : > { %v3528_v39 = vpop.xlane.xlu2 %554  ;;  %v765_v57 = vmax.f32 %v4920_v38, %v4919_v32  ;;  %v774_v32 = vmax.f32 %v4928_v12, %v4927_v29  ;;  %v4929_v38 = vld [vmem:[#allocation43_spill] sm:$0xff]  ;;  %v4935_v29 = vld [vmem:[#allocation49_spill] sm:$0xff] }
 0x13b   : > { %v3530_v41 = vpop.xlane.xlu1 %551  ;;  %v771_v59 = vmax.f32 %v4930_v31, %v4929_v38 }
 0x13c   : > { %v549_v47 = vpop.xlane.xlu0 %548 }
 0x13f   : > { %760 = vmax.xlane.f32.xlu2 %v759_v7  ;;  %v2397_v7 = vpop.eup %2396 }
 0x140   : > { %757 = vmax.xlane.f32.xlu1 %v756_v16  ;;  %v569_v23 = vmul.f32 256.0, %v2397_v7  ;;  %vm573_vm0 = vweird.f32 %v2397_v7 }
 0x141   : > { %754 = vmax.xlane.f32.xlu0 %v753_v5  ;;  %v4925_v5 = vld [vmem:[#allocation51_spill] sm:$0xff] }
 0x142   : > { %v3538_v0 = vpop.xlane.xlu2 %563  ;;  %v777_v20 = vmax.f32 %v4926_v42, %v4925_v5 }
 0x143   : > { %4915 = vst [vmem:[#allocation17_spill] sm:$0xff] %v3538_v0  ;;  %v3540_v43 = vpop.xlane.xlu1 %560  ;;  %v4936_v0 = vld [vmem:[#allocation48_spill] sm:$0xff] }
 0x144   : > { %4916 = vst [vmem:[#allocation16_spill] sm:$0xff] %v3540_v43  ;;  %v558_v21 = vpop.xlane.xlu0 %557  ;;  %v4934_v43 = vld [vmem:[#allocation61_spill] sm:$0xff]  ;;  %v780_v31 = vmax.f32 %v4936_v0, %v4935_v29  ;;  %v4941_v0 = vld [vmem:[#allocation58_spill] sm:$0xff] }
 0x145   : > { %v783_v12 = vmax.f32 %v4934_v43, %v4933_v9  ;;  %v4939_v9 = vld [vmem:[#allocation71_spill] sm:$0xff]  ;;  %v4940_v43 = vld [vmem:[#allocation70_spill] sm:$0xff] }
 0x146   : > { %v792_v26 = vmax.f32 %v4940_v43, %v4939_v9  ;;  %v4944_v9 = vld [vmem:[#allocation78_spill] sm:$0xff]  ;;  %v4946_v43 = vld [vmem:[#allocation80_spill] sm:$0xff] }
 0x147   : > { %769 = vmax.xlane.f32.xlu2 %v768_v30  ;;  %v570_v30 = vsub.f32 1.0, %v569_v23 }
 0x148   : > { %766 = vmax.xlane.f32.xlu1 %v765_v57 }
 0x149   : > { %763 = vmax.xlane.f32.xlu0 %v762_v15  ;;  %v571_v42 = vmul.f32 %v2397_v7, %v570_v30 }
 0x14a   : > { %v3548_v16 = vpop.xlane.xlu2 %643 }
 0x14b   : > { %4923 = vst [vmem:[#allocation11_spill] sm:$0xff] %v3548_v16  ;;  %v3550_v62 = vpop.xlane.xlu1 %640  ;;  %v4932_v16 = vld [vmem:[#allocation59_spill] sm:$0xff] }
 0x14c   : > { %4924 = vst [vmem:[#allocation10_spill] sm:$0xff] %v3550_v62  ;;  %v3552_v13 = vpop.xlane.xlu0 %566  ;;  %v4931_v62 = vld [vmem:[#allocation60_spill] sm:$0xff] }
 0x14d   : > { %v786_v5 = vmax.f32 %v4932_v16, %v4931_v62  ;;  %v4938_v16 = vld [vmem:[#allocation68_spill] sm:$0xff] }
 0x14f   : > { %778 = vmax.xlane.f32.xlu2 %v777_v20  ;;  %v572_v20 = vadd.f32 %v2397_v7, %v571_v42 }
 0x150   : > { %775 = vmax.xlane.f32.xlu1 %v774_v32 }
 0x151   : > { %772 = vmax.xlane.f32.xlu0 %v771_v59  ;;  %v4937_v59 = vld [vmem:[#allocation69_spill] sm:$0xff]  ;;  %v3580_v30 = vsel %vm573_vm0, %v2397_v7, %v572_v20 }
 0x152   : > { %v3560_v57 = vpop.xlane.xlu2 %652  ;;  %v795_v62 = vmax.f32 %v4938_v16, %v4937_v59  ;;  %v616_v29 = vmul.f32 %v3580_v30, %v3456_v36  ;;  %v632_v22 = vmul.f32 %v3580_v30, %v549_v47  ;;  %v4945_v47 = vld [vmem:[#allocation77_spill] sm:$0xff] }
 0x153   : > { %v3562_v8 = vpop.xlane.xlu1 %649 }
 0x154   : > { %v3564_v15 = vpop.xlane.xlu0 %646 }
 0x157   : > { %787 = vmax.xlane.f32.xlu2 %v786_v5  ;;  %v4942_v5 = vld [vmem:[#allocation57_spill] sm:$0xff] }
 0x158   : > { %784 = vmax.xlane.f32.xlu1 %v783_v12  ;;  %v789_v42 = vmax.f32 %v4942_v5, %v4941_v0  ;;  %v600_v12 = vmul.f32 %v3580_v30, %v3398_v14  ;;  %v4948_v5 = vld [vmem:[#allocation67_spill] sm:$0xff] }
 0x159   : > { %781 = vmax.xlane.f32.xlu0 %v780_v31  ;;  %v4943_v31 = vld [vmem:[#allocation83_spill] sm:$0xff] }
 0x15a   : > { %v3572_v23 = vpop.xlane.xlu2 %661  ;;  %v584_v55 = vmul.f32 %v3580_v30, %v4943_v31  ;;  %v4950_v31 = vld [vmem:[#allocation92_spill] sm:$0xff] }
 0x15b   : > { %v3574_v32 = vpop.xlane.xlu1 %658 }
 0x15c   : > { %v3576_v38 = vpop.xlane.xlu0 %655  ;;  %v841_v7 = vsel %vm831_vm1, %v584_v55, %v600_v12  ;;  %v4947_v55 = vld [vmem:[#allocation79_spill] sm:$0xff] }
 0x15d   : > { %v858_v14 = vsel %vm848_vm2, %v841_v7, %v616_v29  ;;  %v801_v0 = vmax.f32 %v4947_v55, %v4946_v43  ;;  %v603_v29 = vmul.f32 %v3580_v30, %v3410_v4  ;;  %v587_v7 = vmul.f32 %v3580_v30, %v4950_v31  ;;  %v4952_v55 = vld [vmem:[#allocation86_spill] sm:$0xff] }
 0x15e   : > { %v875_v36 = vsel %vm865_vm3, %v858_v14, %v632_v22  ;;  %v619_v22 = vmul.f32 %v3580_v30, %v3468_v45  ;;  %v635_v14 = vmul.f32 %v3580_v30, %v558_v21  ;;  %v4951_v45 = vld [vmem:[#allocation87_spill] sm:$0xff]  ;;  %v4953_v21 = vld [vmem:[#allocation89_spill] sm:$0xff] }
 0x15f   : > { %796 = vmax.xlane.f32.xlu2 %v795_v62  ;;  %v804_v62 = vmax.f32 %v4945_v47, %v4944_v9 }
 0x160   : > { %793 = vmax.xlane.f32.xlu1 %v792_v26 }
 0x161   : > { %790 = vmax.xlane.f32.xlu0 %v789_v42  ;;  %v4949_v42 = vld [vmem:[#allocation66_spill] sm:$0xff] }
 0x162   : > { %v3594_v20 = vpop.xlane.xlu2 %670  ;;  %v798_v12 = vmax.f32 %v4949_v42, %v4948_v5  ;;  %v813_v5 = vmax.f32 %v4952_v55, %v4951_v45 }
 0x163   : > { %v668_v59 = vpop.xlane.xlu1 %667 }
 0x164   : > { %v3598_v16 = vpop.xlane.xlu0 %664  ;;  %v3603_v26 = vsel %vm882_vm4, %v875_v36, %v668_v59  ;;  %v844_v59 = vsel %vm831_vm1, %v587_v7, %v603_v29  ;;  %v4956_v29 = vld [vmem:[#allocation75_spill] sm:$0xff]  ;;  %v622_v7 = vmul.f32 %v3580_v30, %v3480_v54  ;;  %v593_v54 = vmul.f32 %v3580_v30, %v3376_v33 }
 0x165   : > { %v861_v9 = vsel %vm848_vm2, %v844_v59, %v619_v22  ;;  %v606_v22 = vmul.f32 %v3580_v30, %v3422_v10  ;;  %v594_v10 = vmul.f32 %v3580_v30, %v3374_v61 }
 0x166   : > { %v878_v4 = vsel %vm865_vm3, %v861_v9, %v635_v14  ;;  %v4957_v14 = vld [vmem:[#allocation98_spill] sm:$0xff]  ;;  %v638_v9 = vmul.f32 %v3580_v30, %v3552_v13  ;;  %v822_v13 = vmax.f32 %v3343_v25, %v3346_v24  ;;  %v626_v25 = vmul.f32 %v3580_v30, %v3508_v56  ;;  %v4962_v24 = vld [vmem:[#allocation55_spill] sm:$0xff] }
 0x167   : > { %805 = vmax.xlane.f32.xlu2 %v804_v62  ;;  %v4954_v62 = vld [vmem:[#allocation88_spill] sm:$0xff]  ;;  %v590_v59 = vmul.f32 %v3580_v30, %v4957_v14  ;;  %v609_v14 = vmul.f32 %v3580_v30, %v3434_v19  ;;  %v4963_v56 = vld [vmem:[#allocation99_spill] sm:$0xff] }
 0x168   : > { %802 = vmax.xlane.f32.xlu1 %v801_v0  ;;  %v810_v0 = vmax.f32 %v4954_v62, %v4953_v21 }
 0x169   : > { %799 = vmax.xlane.f32.xlu0 %v798_v12  ;;  %v4955_v12 = vld [vmem:[#allocation76_spill] sm:$0xff] }
 0x16a   : > { %v3617_v36 = vpop.xlane.xlu2 %679  ;;  %v807_v31 = vmax.f32 %v4956_v29, %v4955_v12  ;;  %v4958_v12 = vld [vmem:[#allocation95_spill] sm:$0xff]  ;;  %v4959_v29 = vld [vmem:[#allocation85_spill] sm:$0xff] }
 0x16b   : > { %v677_v47 = vpop.xlane.xlu1 %676  ;;  %v819_v61 = vmax.f32 %v4958_v12, %v3352_v60 }
 0x16c   : > { %v3621_v43 = vpop.xlane.xlu0 %673  ;;  %v3626_v42 = vsel %vm882_vm4, %v878_v4, %v677_v47  ;;  %v847_v47 = vsel %vm831_vm1, %v590_v59, %v606_v22  ;;  %v4961_v22 = vld [vmem:[#allocation64_spill] sm:$0xff]  ;;  %v625_v59 = vmul.f32 %v3580_v30, %v3492_v1 }
 0x16d   : > { %v864_v45 = vsel %vm848_vm2, %v847_v47, %v622_v7  ;;  %v578_v7 = vmul.f32 %v3580_v30, %v4961_v22 }
 0x16e   : > { %v881_v21 = vsel %vm865_vm3, %v864_v45, %v638_v9 }
 0x16f   : > { %814 = vmax.xlane.f32.xlu2 %v813_v5  ;;  %v610_v5 = vmul.f32 %v3580_v30, %v3432_v18  ;;  %v577_v18 = vmul.f32 %v3580_v30, %v4962_v24  ;;  %v835_v60 = vsel %vm831_vm1, %v578_v7, %v594_v10  ;;  %v4966_v7 = vld [vmem:[#allocation74_spill] sm:$0xff] }
 0x170   : > { %811 = vmax.xlane.f32.xlu1 %v810_v0  ;;  %v4967_v24 = vld [vmem:[#allocation54_spill] sm:$0xff] }
 0x171   : > { %808 = vmax.xlane.f32.xlu0 %v807_v31  ;;  %v4960_v31 = vld [vmem:[#allocation84_spill] sm:$0xff]  ;;  %v834_v9 = vsel %vm831_vm1, %v577_v18, %v593_v54  ;;  %v852_v47 = vsel %vm848_vm2, %v835_v60, %v610_v5  ;;  %v597_v54 = vmul.f32 %v3580_v30, %v3386_v17  ;;  %v828_v17 = vmax.f32 %v3367_v44, %v3370_v3 }
 0x172   : > { %v3641_v4 = vpop.xlane.xlu2 %688  ;;  %v816_v33 = vmax.f32 %v4960_v31, %v4959_v29  ;;  %v869_v19 = vsel %vm865_vm3, %v852_v47, %v626_v25  ;;  %v851_v45 = vsel %vm848_vm2, %v834_v9, %v609_v14  ;;  %v612_v14 = vmul.f32 %v3580_v30, %v3446_v28 }
 0x173   : > { %v686_v55 = vpop.xlane.xlu1 %685  ;;  %v868_v1 = vsel %vm865_vm3, %v851_v45, %v625_v59  ;;  %v611_v25 = vmul.f32 %v3580_v30, %v3448_v40  ;;  %v579_v18 = vmul.f32 %v3580_v30, %v4967_v24  ;;  %v4968_v59 = vld [vmem:[#allocation63_spill] sm:$0xff]  ;;  %v628_v44 = vmul.f32 %v3580_v30, %v3504_v48 }
 0x174   : > { %v3649_v62 = vpop.xlane.xlu0 %682  ;;  %v3656_v0 = vsel %vm882_vm4, %v881_v21, %v686_v55  ;;  %v595_v55 = vmul.f32 %v3580_v30, %v4963_v56  ;;  %v886_v21 = vsel %vm882_vm4, %v869_v19, %v3562_v8  ;;  %v885_v5 = vsel %vm882_vm4, %v868_v1, %v3564_v15 }
 0x175   : > { %v613_v8 = vmul.f32 %v3580_v30, %v3444_v27  ;;  %v581_v15 = vmul.f32 %v3580_v30, %v4966_v7  ;;  %v629_v27 = vmul.f32 %v3580_v30, %v3520_v35  ;;  %v580_v3 = vmul.f32 %v3580_v30, %v4968_v59 }
 0x176   : > { %v627_v60 = vmul.f32 %v3580_v30, %v3506_v50  ;;  %v836_v9 = vsel %vm831_vm1, %v579_v18, %v595_v55 }
 0x177   : > { %823 = vmax.xlane.f32.xlu2 %v822_v13  ;;  %v596_v13 = vmul.f32 %v3580_v30, %v3388_v52  ;;  %v4965_v52 = vld [vmem:[#allocation93_spill] sm:$0xff]  ;;  %v838_v28 = vsel %vm831_vm1, %v581_v15, %v597_v54  ;;  %v853_v47 = vsel %vm848_vm2, %v836_v9, %v611_v25 }
 0x178   : > { %820 = vmax.xlane.f32.xlu1 %v819_v61  ;;  %v855_v35 = vsel %vm848_vm2, %v838_v28, %v613_v8  ;;  %v870_v48 = vsel %vm865_vm3, %v853_v47, %v627_v60  ;;  %v4971_v28 = vld [vmem:[#allocation81_spill] sm:$0xff] }
 0x179   : > { %817 = vmax.xlane.f32.xlu0 %v816_v33  ;;  %v4964_v33 = vld [vmem:[#allocation94_spill] sm:$0xff]  ;;  %v837_v40 = vsel %vm831_vm1, %v580_v3, %v596_v13  ;;  %v872_v19 = vsel %vm865_vm3, %v855_v35, %v629_v27  ;;  %v601_v3 = vmul.f32 %v3580_v30, %v3396_v6  ;;  %v586_v9 = vmul.f32 %v3580_v30, %v4971_v28 }
 0x17a   : > { %v698_v10 = vpop.xlane.xlu2 %697  ;;  %v825_v22 = vmax.f32 %v4965_v52, %v4964_v33  ;;  %v854_v45 = vsel %vm848_vm2, %v837_v40, %v612_v14  ;;  %v889_v50 = vsel %vm882_vm4, %v872_v19, %v3574_v32  ;;  %v599_v32 = vmul.f32 %v3580_v30, %v3400_v51  ;;  %v4970_v52 = vld [vmem:[#allocation73_spill] sm:$0xff]  ;;  %v4972_v40 = vld [vmem:[#allocation82_spill] sm:$0xff] }
 0x17b   : > { %v3689_v12 = vsel %vm899_vm5, %v886_v21, %v698_v10  ;;  %v695_v61 = vpop.xlane.xlu1 %694  ;;  %v871_v56 = vsel %vm865_vm3, %v854_v45, %v628_v44  ;;  %v887_v21 = vsel %vm882_vm4, %v870_v48, %v3560_v57  ;;  %v615_v57 = vmul.f32 %v3580_v30, %v3458_v37 }
 0x17c   : > { %v3691_v29 = vpop.xlane.xlu0 %691  ;;  %v3696_v31 = vsel %vm899_vm5, %v885_v5, %v695_v61  ;;  %v888_v1 = vsel %vm882_vm4, %v871_v56, %v3576_v38  ;;  %v598_v5 = vmul.f32 %v3580_v30, %v3384_v53  ;;  %v614_v38 = vmul.f32 %v3580_v30, %v3460_v49 }
 0x17d   : > { %v582_v53 = vmul.f32 %v3580_v30, %v4970_v52  ;;  %v631_v51 = vmul.f32 %v3580_v30, %v3516_v63  ;;  %v602_v44 = vmul.f32 %v3580_v30, %v3412_v11  ;;  %v585_v6 = vmul.f32 %v3580_v30, %v4972_v40  ;;  %v4978_v52 = vld [vmem:[#allocation17_spill] sm:$0xff] }
 0x17e   : > { %v634_v11 = vmul.f32 %v3580_v30, %v3528_v39  ;;  %v633_v35 = vmul.f32 %v3580_v30, %v3530_v41 }
 0x17f   : > { %v839_v7 = vsel %vm831_vm1, %v582_v53, %v598_v5  ;;  %v842_v47 = vsel %vm831_vm1, %v585_v6, %v601_v3  ;;  %v843_v19 = vsel %vm831_vm1, %v586_v9, %v602_v44  ;;  %v637_v53 = vmul.f32 %v3580_v30, %v4978_v52  ;;  %v4982_v9 = vld [vmem:[#allocation100_spill] sm:$0xff]  ;;  %v4983_v6 = vld [vmem:[#allocation102_spill] sm:$0xff] }
 0x180   : > { %829 = vmax.xlane.f32.xlu1 %v828_v17  ;;  %v4969_v17 = vld [vmem:[#allocation72_spill] sm:$0xff]  ;;  %v856_v37 = vsel %vm848_vm2, %v839_v7, %v614_v38  ;;  %v4976_v38 = vld [vmem:[#allocation90_spill] sm:$0xff]  ;;  %v607_v40 = vmul.f32 %v3580_v30, %v4982_v9 }
 0x181   : > { %826 = vmax.xlane.f32.xlu0 %v825_v22  ;;  %v583_v33 = vmul.f32 %v3580_v30, %v4969_v17  ;;  %v630_v22 = vmul.f32 %v3580_v30, %v3518_v34  ;;  %v589_v17 = vmul.f32 %v3580_v30, %v4976_v38 }
 0x182   : > { %v707_v55 = vpop.xlane.xlu2 %706 }
 0x183   : > { %v3734_v10 = vsel %vm899_vm5, %v889_v50, %v707_v55  ;;  %v704_v54 = vpop.xlane.xlu1 %703  ;;  %v840_v15 = vsel %vm831_vm1, %v583_v33, %v599_v32  ;;  %v873_v14 = vsel %vm865_vm3, %v856_v37, %v630_v22  ;;  %v4974_v32 = vld [vmem:[#allocation9_spill] sm:$0xff]  ;;  %v4977_v33 = vld [vmem:[#allocation91_spill] sm:$0xff] }
 0x184   : > { %v701_v13 = vpop.xlane.xlu0 %700  ;;  %v3741_v61 = vsel %vm899_vm5, %v888_v1, %v704_v54  ;;  %v857_v49 = vsel %vm848_vm2, %v840_v15, %v615_v57  ;;  %v890_v24 = vsel %vm882_vm4, %v873_v14, %v3572_v23  ;;  %v604_v1 = vmul.f32 %v3580_v30, %v3408_v2  ;;  %v4973_v54 = vld [vmem:[#allocation101_spill] sm:$0xff]  ;;  %v4975_v57 = vld [vmem:[#allocation8_spill] sm:$0xff] }
 0x185   : > { %v3744_v8 = vsel %vm899_vm5, %v887_v21, %v701_v13  ;;  %v874_v25 = vsel %vm865_vm3, %v857_v49, %v631_v51  ;;  %v605_v13 = vmul.f32 %v3580_v30, %v4973_v54  ;;  %v588_v2 = vmul.f32 %v3580_v30, %v4977_v33  ;;  %v4979_v51 = vld [vmem:[#allocation16_spill] sm:$0xff]  ;;  %v4988_v54 = vld [vmem:[#allocation11_spill] sm:$0xff] }
 0x186   : > { %v891_v63 = vsel %vm882_vm4, %v874_v25, %v3598_v16  ;;  %v618_v16 = vmul.f32 %v3580_v30, %v3470_v46  ;;  %v636_v22 = vmul.f32 %v3580_v30, %v4979_v51  ;;  %v4980_v14 = vld [vmem:[#allocation96_spill] sm:$0xff] }
 0x187   : > { %v845_v7 = vsel %vm831_vm1, %v588_v2, %v604_v1  ;;  %v846_v15 = vsel %vm831_vm1, %v589_v17, %v605_v13  ;;  %v592_v25 = vmul.f32 %v3580_v30, %v4980_v14 }
 0x18a   : > { %v716_v27 = vpop.xlane.xlu2 %715 }
 0x18b   : > { %v3770_v34 = vsel %vm899_vm5, %v3603_v26, %v716_v27  ;;  %v713_v18 = vpop.xlane.xlu1 %712  ;;  %v617_v26 = vmul.f32 %v3580_v30, %v3472_v58  ;;  %v860_v58 = vsel %vm848_vm2, %v843_v19, %v618_v16  ;;  %v4985_v19 = vld [vmem:[#allocation65_spill] sm:$0xff] }
 0x18c   : > { %v710_v59 = vpop.xlane.xlu0 %709  ;;  %v3777_v60 = vsel %vm899_vm5, %v891_v63, %v713_v18  ;;  %v877_v48 = vsel %vm865_vm3, %v860_v58, %v634_v11  ;;  %v4981_v18 = vld [vmem:[#allocation97_spill] sm:$0xff]  ;;  %v608_v11 = vmul.f32 %v3580_v30, %v4983_v6 }
 0x18d   : > { %v3780_v23 = vsel %vm899_vm5, %v890_v24, %v710_v59  ;;  %v859_v46 = vsel %vm848_vm2, %v842_v47, %v617_v26  ;;  %v894_v39 = vsel %vm882_vm4, %v877_v48, %v3621_v43  ;;  %v621_v43 = vmul.f32 %v3580_v30, %v4974_v32  ;;  %v4984_v47 = vld [vmem:[#allocation56_spill] sm:$0xff]  ;;  %v4989_v32 = vld [vmem:[#allocation10_spill] sm:$0xff] }
 0x18e   : > { %v876_v45 = vsel %vm865_vm3, %v859_v46, %v633_v35  ;;  %v591_v59 = vmul.f32 %v3580_v30, %v4981_v18  ;;  %v4986_v46 = vld [vmem:[#allocation15_spill] sm:$0xff] }
 0x18f   : > { %v893_v56 = vsel %vm882_vm4, %v876_v45, %v3594_v20  ;;  %v863_v49 = vsel %vm848_vm2, %v846_v15, %v621_v43  ;;  %v624_v58 = vmul.f32 %v3580_v30, %v4986_v46  ;;  %v4987_v45 = vld [vmem:[#allocation14_spill] sm:$0xff]  ;;  %v1000_v46 = vld [vmem:[%s4704_s4 + $0x8] sm:$0xff] }
 0x190   : > { %v880_v24 = vsel %vm865_vm3, %v863_v49, %v637_v53  ;;  %v623_v48 = vmul.f32 %v3580_v30, %v4987_v45 }
 0x191   : > { %v897_v44 = vsel %vm882_vm4, %v880_v24, %v3649_v62  ;;  %v575_v62 = vmul.f32 %v3580_v30, %v4984_v47  ;;  %v2691_v47 = vmov 0  }
 0x192   : > { %v725_v50 = vpop.xlane.xlu2 %724  ;;  %2356 = vset.pattern.permute.xlu2 %v2691_v47  ;;  %2357 = vset.pattern.permute.xlu1 %v2691_v47 }
 0x193   : > { %v3806_v41 = vsel %vm899_vm5, %v3626_v42, %v725_v50  ;;  %v722_v55 = vpop.xlane.xlu1 %721  ;;  %v620_v42 = vmul.f32 %v3580_v30, %v4975_v57  ;;  %2358 = vset.pattern.permute.xlu0 %v2691_v47 }
 0x194   : > { %v719_v21 = vpop.xlane.xlu0 %718  ;;  %v3813_v5 = vsel %vm899_vm5, %v894_v39, %v722_v55 }
 0x195   : > { %v910_v20 = vsel %vm899_vm5, %v893_v56, %v719_v21  ;;  %v862_v37 = vsel %vm848_vm2, %v845_v7, %v620_v42  ;;  %v832_v56 = vsel %vm831_vm1, %v575_v62, %v591_v59 }
 0x196   : > { %v879_v27 = vsel %vm865_vm3, %v862_v37, %v636_v22  ;;  %v849_v55 = vsel %vm848_vm2, %v832_v56, %v607_v40 }
 0x197   : > { %v896_v3 = vsel %vm882_vm4, %v879_v27, %v3617_v36  ;;  %v866_v1 = vsel %vm865_vm3, %v849_v55, %v623_v48 }
 0x198   : > { %v883_v43 = vsel %vm882_vm4, %v866_v1, %v4989_v32  ;;  %v1004_v32 = vld [vmem:[%s4704_s4 + $0x28] sm:$0xff] }
 0x199   : > { %v900_v57 = vsel %vm899_vm5, %v883_v43, %v3641_v4 }
 0x19a   : > { %v734_v63 = vpop.xlane.xlu2 %733 }
 0x19b   : > { %v3844_v16 = vsel %vm899_vm5, %v3656_v0, %v734_v63  ;;  %v731_v26 = vpop.xlane.xlu1 %730  ;;  %v576_v0 = vmul.f32 %v3580_v30, %v4985_v19 }
 0x19c   : > { %v728_v28 = vpop.xlane.xlu0 %727  ;;  %v3851_v35 = vsel %vm899_vm5, %v897_v44, %v731_v26 }
 0x19d   : > { %v3854_v36 = vsel %vm899_vm5, %v896_v3, %v728_v28  ;;  %v833_v50 = vsel %vm831_vm1, %v576_v0, %v592_v25 }
 0x19e   : > { %v850_v39 = vsel %vm848_vm2, %v833_v50, %v608_v11  ;;  %v951_v11 = vld [vmem:[%s4702_s2] sm:$0xff] }
 0x19f   : > { %v867_v21 = vsel %vm865_vm3, %v850_v39, %v624_v58  ;;  %954 = vperm.xlu2 %2356, %v951_v11   ;;  %v1016_v58 = vmul.f32 2.0, %v1000_v46  ;;  %v1002_v39 = vld [vmem:[%s4704_s4 + $0x18] sm:$0xff]  ;;  %v989_v46 = vld [vmem:[%s4703_s3 + $0x30] sm:$0xff] }
 0x1a0   : > { %v884_v13 = vsel %vm882_vm4, %v867_v21, %v4988_v54  ;;  %v1018_v1 = vmul.f32 2.0, %v1002_v39  ;;  %v991_v39 = vld [vmem:[%s4703_s3 + $0x40] sm:$0xff] }
 0x1a1   : > { %v901_v42 = vsel %vm899_vm5, %v884_v13, %v3691_v29 }
 0x1a2   : > { %v743_v30 = vpop.xlane.xlu2 %742 }
 0x1a3   : > { %v3880_v38 = vsel %vm916_vm6, %v3696_v31, %v743_v30  ;;  %v740_v17 = vpop.xlane.xlu1 %739 }
 0x1a4   : > { %v737_v33 = vpop.xlane.xlu0 %736  ;;  %v3883_v2 = vsel %vm916_vm6, %v901_v42, %v740_v17 }
 0x1a5   : > { %v917_v52 = vsel %vm916_vm6, %v900_v57, %v737_v33  ;;  %v1020_v57 = vmul.f32 2.0, %v1004_v32  ;;  %v988_v32 = vld [vmem:[%s4703_s3 + $0x28] sm:$0xff] }
 0x1a7   : > { %1038 = vperm.xlu2 %2356, %v1016_v58   ;;  %v995_v58 = vld [vmem:[%s4703_s3 + $0x60] sm:$0xff] }
 0x1aa   : > { %v752_v53 = vpop.xlane.xlu2 %751 }
 0x1ab   : > { %v3888_v51 = vsel %vm916_vm6, %v3741_v61, %v752_v53  ;;  %v749_v4 = vpop.xlane.xlu1 %748 }
 0x1ac   : > { %v746_v22 = vpop.xlane.xlu0 %745  ;;  %v3892_v29 = vsel %vm916_vm6, %v3744_v8, %v749_v4 }
 0x1ad   : > { %v3896_v31 = vsel %vm916_vm6, %v3689_v12, %v746_v22  ;;  %v1010_v22 = vld [vmem:[%s4704_s4 + $0x58] sm:$0xff] }
 0x1af   : > { %1048 = vperm.xlu2 %2356, %v1018_v1   ;;  %v992_v1 = vld [vmem:[%s4703_s3 + $0x48] sm:$0xff] }
 0x1b2   : > { %v761_v7 = vpop.xlane.xlu2 %760 }
 0x1b3   : > { %v3900_v15 = vsel %vm916_vm6, %v3777_v60, %v761_v7  ;;  %v758_v37 = vpop.xlane.xlu1 %757 }
 0x1b4   : > { %v755_v49 = vpop.xlane.xlu0 %754  ;;  %v3904_v61 = vsel %vm916_vm6, %v3780_v23, %v758_v37 }
 0x1b5   : > { %v3908_v14 = vsel %vm916_vm6, %v3734_v10, %v755_v49 }
 0x1b7   : > { %1058 = vperm.xlu2 %2356, %v1020_v57  }
 0x1ba   : > { %v770_v8 = vpop.xlane.xlu2 %769 }
 0x1bb   : > { %v767_v25 = vpop.xlane.xlu1 %766  ;;  %v928_v30 = vsel %vm916_vm6, %v3813_v5, %v770_v8 }
 0x1bc   : > { %v764_v27 = vpop.xlane.xlu0 %763  ;;  %v927_v12 = vsel %vm916_vm6, %v910_v20, %v767_v25  ;;  %v1005_v25 = vld [vmem:[%s4704_s4 + $0x30] sm:$0xff] }
 0x1bd   : > { %v926_v24 = vsel %vm916_vm6, %v3770_v34, %v764_v27  ;;  %v1021_v27 = vmul.f32 2.0, %v1005_v25 }
 0x1c2   : > { %v779_v60 = vpop.xlane.xlu2 %778 }
 0x1c3   : > { %v776_v63 = vpop.xlane.xlu1 %775  ;;  %v931_v55 = vsel %vm916_vm6, %v3851_v35, %v779_v60 }
 0x1c4   : > { %v773_v18 = vpop.xlane.xlu0 %772  ;;  %v930_v13 = vsel %vm916_vm6, %v3854_v36, %v776_v63 }
 0x1c5   : > { %v929_v43 = vsel %vm916_vm6, %v3806_v41, %v773_v18  ;;  %v1007_v41 = vld [vmem:[%s4704_s4 + $0x40] sm:$0xff] }
 0x1c6   : > { %v1023_v5 = vmul.f32 2.0, %v1007_v41 }
 0x1c8   : > { %1073 = vperm.xlu2 %2356, %v1023_v5   ;;  %v2693_v5 = vmov 1  }
 0x1ca   : > { %v3913_v23 = vpop.xlane.xlu2 %787 }
 0x1cb   : > { %v785_v59 = vpop.xlane.xlu1 %784 }
 0x1cc   : > { %v782_v3 = vpop.xlane.xlu0 %781  ;;  %v3916_v44 = vsel %vm933_vm7, %v917_v52, %v785_v59  ;;  %v1011_v59 = vld [vmem:[%s4704_s4 + $0x60] sm:$0xff] }
 0x1cd   : > { %v932_v45 = vsel %vm916_vm6, %v3844_v16, %v782_v3 }
 0x1d2   : > { %v797_v28 = vpop.xlane.xlu2 %796 }
 0x1d3   : > { %v3918_v10 = vpop.xlane.xlu1 %793  ;;  %v938_v7 = vsel %vm933_vm7, %v3892_v29, %v797_v28  ;;  %v1013_v29 = vld [vmem:[%s4704_s4 + $0x70] sm:$0xff] }
 0x1d4   : > { %v3920_v26 = vpop.xlane.xlu0 %790  ;;  %v937_v37 = vsel %vm933_vm7, %v3896_v31, %v3918_v10  ;;  %v950_v31 = vld [vmem:[%s4701_s1] sm:$0xff] }
 0x1d5   : > { %v936_v49 = vsel %vm933_vm7, %v3880_v38, %v3920_v26  ;;  %v999_v38 = vld [vmem:[%s4704_s4] sm:$0xff]  ;;  %v1001_v26 = vld [vmem:[%s4704_s4 + $0x10] sm:$0xff] }
 0x1d6   : > { %v1017_v28 = vmul.f32 2.0, %v1001_v26 }
 0x1da   : > { %v806_v40 = vpop.xlane.xlu2 %805 }
 0x1db   : > { %v803_v20 = vpop.xlane.xlu1 %802  ;;  %v941_v52 = vsel %vm933_vm7, %v3904_v61, %v806_v40  ;;  %v1029_v61 = vmul.f32 2.0, %v1013_v29  ;;  %v1009_v40 = vld [vmem:[%s4704_s4 + $0x50] sm:$0xff] }
 0x1dc   : > { %v800_v9 = vpop.xlane.xlu0 %799  ;;  %v940_v53 = vsel %vm933_vm7, %v3908_v14, %v803_v20  ;;  %v1015_v14 = vmul.f32 2.0, %v999_v38  ;;  %v1006_v20 = vld [vmem:[%s4704_s4 + $0x38] sm:$0xff] }
 0x1dd   : > { %v939_v4 = vsel %vm933_vm7, %v3888_v51, %v800_v9  ;;  %v935_v51 = vsel %vm933_vm7, %v3883_v2, %v3913_v23  ;;  %v1003_v2 = vld [vmem:[%s4704_s4 + $0x20] sm:$0xff]  ;;  %v1027_v23 = vmul.f32 2.0, %v1011_v59  ;;  %v1022_v9 = vmul.f32 2.0, %v1006_v20 }
 0x1de   : > { %1033 = vperm.xlu1 %2357, %v1015_v14   ;;  %v1019_v8 = vmul.f32 2.0, %v1003_v2 }
 0x1e2   : > { %v815_v62 = vpop.xlane.xlu2 %814 }
 0x1e3   : > { %v812_v34 = vpop.xlane.xlu1 %811  ;;  %v944_v42 = vsel %vm933_vm7, %v927_v12, %v815_v62  ;;  %v1008_v12 = vld [vmem:[%s4704_s4 + $0x48] sm:$0xff] }
 0x1e4   : > { %v809_v6 = vpop.xlane.xlu0 %808  ;;  %v943_v17 = vsel %vm933_vm7, %v926_v24, %v812_v34  ;;  %v1024_v24 = vmul.f32 2.0, %v1008_v12  ;;  %v1025_v34 = vmul.f32 2.0, %v1009_v40 }
 0x1e5   : > { %v942_v33 = vsel %vm933_vm7, %v3900_v15, %v809_v6  ;;  %v1026_v15 = vmul.f32 2.0, %v1010_v22  ;;  %v1012_v6 = vld [vmem:[%s4704_s4 + $0x68] sm:$0xff] }
 0x1e6   : > { %1053 = vperm.xlu1 %2357, %v1019_v8   ;;  %v1028_v11 = vmul.f32 2.0, %v1012_v6 }
 0x1e7   : > { %1088 = vperm.xlu2 %2356, %v1026_v15  }
 0x1ea   : > { %v824_v21 = vpop.xlane.xlu2 %823 }
 0x1eb   : > { %v821_v19 = vpop.xlane.xlu1 %820  ;;  %v947_v16 = vsel %vm933_vm7, %v930_v13, %v824_v21  ;;  %v986_v21 = vld [vmem:[%s4703_s3 + $0x18] sm:$0xff]  ;;  %v987_v13 = vld [vmem:[%s4703_s3 + $0x20] sm:$0xff] }
 0x1ec   : > { %v818_v0 = vpop.xlane.xlu0 %817  ;;  %v946_v35 = vsel %vm933_vm7, %v929_v43, %v821_v19  ;;  %v994_v43 = vld [vmem:[%s4703_s3 + $0x58] sm:$0xff] }
 0x1ed   : > { %v945_v36 = vsel %vm933_vm7, %v928_v30, %v818_v0  ;;  %v983_v0 = vld [vmem:[%s4703_s3] sm:$0xff] }
 0x1ee   : > { %1063 = vperm.xlu1 %2357, %v1021_v27  }
 0x1ef   : > { %1103 = vperm.xlu2 %2356, %v1029_v61  }
 0x1f3   : > { %v830_v48 = vpop.xlane.xlu1 %829 }
 0x1f4   : > { %v827_v50 = vpop.xlane.xlu0 %826  ;;  %v949_v56 = vsel %vm933_vm7, %v932_v45, %v830_v48  ;;  %v984_v45 = vld [vmem:[%s4703_s3 + $0x8] sm:$0xff]  ;;  %v990_v48 = vld [vmem:[%s4703_s3 + $0x38] sm:$0xff] }
 0x1f5   : > { %957 = vmatpush.msra.mxu0 %v949_v56  ;;  %v948_v54 = vsel %vm933_vm7, %v931_v55, %v827_v50  ;;  %v996_v50 = vld [vmem:[%s4703_s3 + $0x68] sm:$0xff]  ;;  %v985_v56 = vld [vmem:[%s4703_s3 + $0x10] sm:$0xff] }
 0x1f6   : > { %1078 = vperm.xlu1 %2357, %v1024_v24   ;;  %v997_v55 = vld [vmem:[%s4703_s3 + $0x70] sm:$0xff] }
 0x1f7   : > { %958 = vmatpush.msra.mxu0 %v948_v54  ;;  %v998_v54 = vld [vmem:[%s4703_s3 + $0x78] sm:$0xff]  ;;  %2359 = vset.pattern.permute.xlu2 %v2693_v5 }
 0x1f9   : > { %959 = vmatpush.msra.mxu0 %v947_v16  ;;  %v955_v60 = vpop.permute.xlu2 %954  ;;  %v993_v16 = vld [vmem:[%s4703_s3 + $0x50] sm:$0xff] }
 0x1fb   : > { %960 = vmatpush.msra.mxu0 %v946_v35 }
 0x1fd   : > { %961 = vmatpush.msra.mxu0 %v945_v36 }
 0x1fe   : > { %1093 = vperm.xlu1 %2357, %v1027_v23  }
 0x1ff   : > { %962 = vmatpush.msra.mxu0 %v944_v42 }
 0x201   : > { %963 = vmatpush.msra.mxu0 %v943_v17 }
 0x203   : > { %964 = vmatpush.msra.mxu0 %v942_v33 }
 0x205   : > { %965 = vmatpush.msra.mxu0 %v941_v52  ;;  %v2694_v52 = vmov 3  }
 0x207   : > { %966 = vmatpush.msra.mxu0 %v940_v53 }
 0x209   : > { %967 = vmatpush.msra.mxu0 %v939_v4  ;;  %v1039_v4 = vpop.permute.xlu2 %1038 }
 0x20b   : > { %968 = vmatpush.msra.mxu0 %v938_v7 }
 0x20d   : > { %969 = vmatpush.msra.mxu0 %v937_v37 }
 0x20f   : > { %970 = vmatpush.msra.mxu0 %v936_v49 }
 0x211   : > { %971 = vmatpush.msra.mxu0 %v935_v51  ;;  %v4090_v12 = vpop.permute.xlu2 %1048 }
 0x213   : > { %972 = vmatpush.msra.mxu0 %v3916_v44  ;;  %v1014_v44 = vld [vmem:[%s4704_s4 + $0x78] sm:$0xff] }
 0x214   : > { %973 = vmatmul.f32.vlgmr.msra.gmra.mxu0 %v950_v31  ;;  %v1030_v10 = vmul.f32 2.0, %v1014_v44 }
 0x216   : > { %1108 = vperm.xlu1 %2357, %v1030_v10  }
 0x21e   : > { %2361 = vset.pattern.permute.xlu1 %v2694_v52 }
 0x250   : > { %v1034_v35 = vpop.permute.xlu1 %1033 }
 0x258   : > { %v4080_v30 = vpop.permute.xlu1 %1053 }
 0x260   : > { %v1064_v57 = vpop.permute.xlu1 %1063 }
 0x268   : > { %v4084_v42 = vpop.permute.xlu1 %1078 }
 0x270   : > { %v1094_v22 = vpop.permute.xlu1 %1093 }
 0x291   : > { %v974_v63 = vpop.f32.mrf.mxu0 }
 0x292   : > { %v975_v18 = vadd.f32 %v974_v63, %v955_v60 }
 0x294   : > { %v977_v3 = vmax.f32 %v975_v18, 0.0 }
 0x296   : > { %979 = vrot.lane.b32.xlu0 %v977_v3, %s2692_s29 }
 0x29e   : > { %1043 = vperm.xlu0 %2358, %v1017_v28  }
 0x2a6   : > { %1068 = vperm.xlu0 %2358, %v1022_v9  }
 0x2ae   : > { %1083 = vperm.xlu0 %2358, %v1025_v34  }
 0x2b6   : > { %1098 = vperm.xlu0 %2358, %v1028_v11  }
 0x308   : > { %v980_v62 = vpop.permute.xlu0 %979 }
 0x309   : > { %v982_v19 = vadd.f32 %v980_v62, %v977_v3  ;;  %v4097_v62 = vpop.permute.xlu2 %1058 }
 0x30b   : > { %1175 = vmatpush.msra.mxu1 %v982_v19  ;;  %2298 = vmatpush.msra.mxu2 %v982_v19 }
 0x30c   : > { %2299 = vmatpush.msra.mxu3 %v982_v19  ;;  %2160 = vmatmul.msk.f32.vlgmr.msra.gmra.mxu1 %vm1111_vm8, %v983_v0 }
 0x30d   : > { %2166 = vmatmul.msk.f32.vlgmr.msra.gmra.mxu2 %vm1111_vm8, %v989_v46  ;;  %2172 = vmatmul.msk.f32.vlgmr.msra.gmra.mxu3 %vm1111_vm8, %v995_v58 }
 0x310   : > { %v4082_v36 = vpop.permute.xlu0 %1043 }
 0x314   : > { %2161 = vmatmul.msk.f32.gmra.mxu1 %vm1111_vm8, %v984_v45 }
 0x315   : > { %2167 = vmatmul.msk.f32.gmra.mxu2 %vm1111_vm8, %v990_v48  ;;  %2173 = vmatmul.msk.f32.gmra.mxu3 %vm1111_vm8, %v996_v50 }
 0x318   : > { %v1069_v17 = vpop.permute.xlu0 %1068 }
 0x31c   : > { %2162 = vmatmul.msk.f32.gmra.mxu1 %vm1111_vm8, %v985_v56 }
 0x31d   : > { %2168 = vmatmul.msk.f32.gmra.mxu2 %vm1111_vm8, %v991_v39  ;;  %2174 = vmatmul.msk.f32.gmra.mxu3 %vm1111_vm8, %v997_v55 }
 0x320   : > { %v4088_v38 = vpop.permute.xlu0 %1083 }
 0x324   : > { %2163 = vmatmul.msk.f32.gmra.mxu1 %vm1111_vm8, %v986_v21 }
 0x325   : > { %2169 = vmatmul.msk.f32.gmra.mxu2 %vm1111_vm8, %v992_v1  ;;  %2175 = vmatmul.msk.f32.gmra.mxu3 %vm1111_vm8, %v998_v54 }
 0x328   : > { %v1099_v44 = vpop.permute.xlu0 %1098 }
 0x32c   : > { %2164 = vmatmul.msk.f32.gmra.mxu1 %vm1111_vm8, %v987_v13 }
 0x32d   : > { %2170 = vmatmul.msk.f32.gmra.mxu2 %vm1111_vm8, %v993_v16 }
 0x334   : > { %2165 = vmatmul.msk.f32.gmra.mxu1 %vm1111_vm8, %v988_v32 }
 0x335   : > { %2171 = vmatmul.msk.f32.gmra.mxu2 %vm1111_vm8, %v994_v43 }
 0x389   : > { %v1177_v41 = vpop.f32.mrf.mxu1 }
 0x38a   : > { %v1178_v33 = vadd.f32 %v1177_v41, %v1034_v35 }
 0x38c   : > { %v2176_v53 = vmul.f32 -1.442695, %v1178_v33 }
 0x38e   : > { %2398 = vpow2.f32 %v2176_v53  ;;  %v1074_v53 = vpop.permute.xlu2 %1073 }
 0x390   : > { %v1195_v7 = vpop.f32.mrf.mxu2  ;;  %v1213_v15 = vpop.f32.mrf.mxu3 }
 0x391   : > { %v1196_v37 = vadd.f32 %v1195_v7, %v1064_v57  ;;  %v1214_v49 = vadd.f32 %v1213_v15, %v1094_v22  ;;  %v1180_v51 = vpop.f32.mrf.mxu1  ;;  %v2695_v7 = vmov 2  }
 0x392   : > { %v1181_v29 = vadd.f32 %v1180_v51, %v1039_v4 }
 0x393   : > { %v2182_v31 = vmul.f32 -1.442695, %v1196_v37  ;;  %v2188_v61 = vmul.f32 -1.442695, %v1214_v49 }
 0x394   : > { %v2399_v14 = vpop.eup %2398  ;;  %v2177_v2 = vmul.f32 -1.442695, %v1181_v29 }
 0x395   : > { %v1273_v8 = vadd.f32 1.0, %v2399_v14  ;;  %2400 = vpow2.f32 %v2182_v31 }
 0x396   : > { %2402 = vpow2.f32 %v2188_v61 }
 0x397   : > { %2404 = vrcp.f32 %v1273_v8  ;;  %v1300_v40 = vand.u32 2147483648, %v1273_v8  ;;  %v1298_v6 = vand.u32 2147483647, %v1273_v8  ;;  %vm1294_vm10 = vweird.f32 %v1273_v8 }
 0x398   : > { %2406 = vpow2.f32 %v2177_v2  ;;  %v1198_v25 = vpop.f32.mrf.mxu2  ;;  %v1216_v23 = vpop.f32.mrf.mxu3 }
 0x399   : > { %v1199_v27 = vadd.f32 %v1198_v25, %v1069_v17  ;;  %v1217_v20 = vadd.f32 %v1216_v23, %v1099_v44  ;;  %v1183_v58 = vpop.f32.mrf.mxu1  ;;  %v1301_v45 = vor.u32 1.1754944e-38, %v1300_v40  ;;  %vm1299_vm12 = vcmp.eq.f32.partialorder %v1298_v6, 8.507059e+37 }
 0x39a   : > { %v1184_v1 = vadd.f32 %v1183_v58, %v4082_v36 }
 0x39b   : > { %v2401_v24 = vpop.eup %2400  ;;  %v2183_v18 = vmul.f32 -1.442695, %v1199_v27  ;;  %v2189_v19 = vmul.f32 -1.442695, %v1217_v20 }
 0x39c   : > { %v2403_v60 = vpop.eup %2402  ;;  %v1279_v63 = vadd.f32 1.0, %v2401_v24  ;;  %v2178_v57 = vmul.f32 -1.442695, %v1184_v1  ;;  %v4131_v24 = vpop.permute.xlu2 %1088 }
 0x39d   : > { %v2405_v59 = vpop.eup %2404  ;;  %v4092_v3 = vadd.f32 1.0, %v2403_v60 }
 0x39e   : > { %v2407_v10 = vpop.eup %2406  ;;  %2408 = vrcp.f32 %v1279_v63  ;;  %v1290_v26 = vmul.f32 %v2405_v59, %v1273_v8  ;;  %vm1295_vm9 = vweird.f32 %v2405_v59  ;;  %v1390_v43 = vand.u32 2147483648, %v1279_v63 }
 0x39f   : > { %2410 = vrcp.f32 %v4092_v3  ;;  %v4095_v28 = vadd.f32 1.0, %v2407_v10  ;;  %vm1296_vm11 = vmor %vm1294_vm10, %vm1295_vm9  ;;  %v1388_v35 = vand.u32 2147483647, %v1279_v63  ;;  %vm1384_vm14 = vweird.f32 %v1279_v63 }
 0x3a0   : > { %2412 = vpow2.f32 %v2183_v18  ;;  %v1291_v9 = vsub.f32 1.0, %v1290_v26  ;;  %v1391_v22 = vor.u32 1.1754944e-38, %v1390_v43  ;;  %v1480_v29 = vand.u32 2147483648, %v4092_v3  ;;  %v1201_v60 = vpop.f32.mrf.mxu2 }
 0x3a1   : > { %2414 = vrcp.f32 %v4095_v28  ;;  %vm1389_vm0 = vcmp.eq.f32.partialorder %v1388_v35, 8.507059e+37  ;;  %vm1474_vm2 = vweird.f32 %v4092_v3  ;;  %v1478_v61 = vand.u32 2147483647, %v4092_v3 }
 0x3a2   : > { %v1292_v34 = vmul.f32 %v2405_v59, %v1291_v9  ;;  %2416 = vpow2.f32 %v2189_v19  ;;  %v1481_v25 = vor.u32 1.1754944e-38, %v1480_v29  ;;  %v1202_v10 = vadd.f32 %v1201_v60, %v1074_v53  ;;  %v1186_v53 = vpop.f32.mrf.mxu1 }
 0x3a3   : > { %vm1479_vm4 = vcmp.eq.f32.partialorder %v1478_v61, 8.507059e+37  ;;  %vm1309_vm6 = vweird.f32 %v4095_v28  ;;  %v1313_v26 = vand.u32 2147483647, %v4095_v28 }
 0x3a4   : > { %v2409_v11 = vpop.eup %2408  ;;  %v1293_v0 = vadd.f32 %v2405_v59, %v1292_v34  ;;  %v2184_v6 = vmul.f32 -1.442695, %v1202_v10 }
 0x3a5   : > { %v4100_v46 = vpop.eup %2410  ;;  %v1380_v48 = vmul.f32 %v2409_v11, %v1279_v63  ;;  %vm1385_vm13 = vweird.f32 %v2409_v11  ;;  %vm1314_vm8 = vcmp.eq.f32.partialorder %v1313_v26, 8.507059e+37 }
 0x3a6   : > { %v2413_v50 = vpop.eup %2412  ;;  %v1297_v56 = vsel %vm1296_vm11, %v2405_v59, %v1293_v0  ;;  %v1470_v39 = vmul.f32 %v4100_v46, %v4092_v3  ;;  %vm1386_vm15 = vmor %vm1384_vm14, %vm1385_vm13  ;;  %vm1475_vm1 = vweird.f32 %v4100_v46  ;;  %v1315_v3 = vand.u32 2147483648, %v4095_v28  ;;  %v1104_v0 = vpop.permute.xlu2 %1103 }
 0x3a7   : > { %v1302_v55 = vsel %vm1299_vm12, %v1301_v45, %v1297_v56  ;;  %v1381_v21 = vsub.f32 1.0, %v1380_v48  ;;  %v4105_v54 = vadd.f32 1.0, %v2413_v50  ;;  %v4107_v16 = vpop.eup %2414  ;;  %vm1476_vm3 = vmor %vm1474_vm2, %vm1475_vm1 }
 0x3a8   : > { %1932 = vperm.xlu1 %2361, %v1302_v55   ;;  %1674 = vperm.xlu2 %2359, %v1302_v55   ;;  %v1471_v13 = vsub.f32 1.0, %v1470_v39  ;;  %v1305_v41 = vmul.f32 %v4107_v16, %v4095_v28  ;;  %v2417_v33 = vpop.eup %2416  ;;  %vm1310_vm5 = vweird.f32 %v4107_v16  ;;  %v1316_v9 = vor.u32 1.1754944e-38, %v1315_v3 }
 0x3a9   : > { %1531 = vperm.xlu0 %2358, %v1302_v55   ;;  %v1382_v32 = vmul.f32 %v2409_v11, %v1381_v21  ;;  %2418 = vrcp.f32 %v4105_v54  ;;  %v4117_v37 = vadd.f32 1.0, %v2417_v33  ;;  %vm1311_vm7 = vmor %vm1309_vm6, %vm1310_vm5  ;;  %v1405_v45 = vand.u32 2147483648, %v4105_v54 }
 0x3aa   : > { %v1472_v36 = vmul.f32 %v4100_v46, %v1471_v13  ;;  %2420 = vpow2.f32 %v2178_v57  ;;  %v1306_v51 = vsub.f32 1.0, %v1305_v41  ;;  %vm1399_vm10 = vweird.f32 %v4105_v54 }
 0x3ab   : > { %v1383_v17 = vadd.f32 %v2409_v11, %v1382_v32  ;;  %2422 = vrcp.f32 %v4117_v37  ;;  %v1403_v50 = vand.u32 2147483647, %v4105_v54  ;;  %v1406_v21 = vor.u32 1.1754944e-38, %v1405_v45 }
 0x3ac   : > { %v1473_v49 = vadd.f32 %v4100_v46, %v1472_v36  ;;  %v1307_v2 = vmul.f32 %v4107_v16, %v1306_v51  ;;  %vm1489_vm14 = vweird.f32 %v4117_v37  ;;  %v1493_v57 = vand.u32 2147483647, %v4117_v37 }
 0x3ad   : > { %v1387_v4 = vsel %vm1386_vm15, %v2409_v11, %v1383_v17  ;;  %v1219_v11 = vpop.f32.mrf.mxu3  ;;  %vm1404_vm12 = vcmp.eq.f32.partialorder %v1403_v50, 8.507059e+37 }
 0x3ae   : > { %v4115_v15 = vsel %vm1389_vm0, %v1391_v22, %v1387_v4  ;;  %v1477_v14 = vsel %vm1476_vm3, %v4100_v46, %v1473_v49  ;;  %v1308_v18 = vadd.f32 %v4107_v16, %v1307_v2  ;;  %v1220_v58 = vadd.f32 %v1219_v11, %v1104_v0  ;;  %v1189_v0 = vpop.f32.mrf.mxu1 }
 0x3af   : > { %v2419_v31 = vpop.eup %2418  ;;  %v4133_v63 = vsel %vm1479_vm4, %v1481_v25, %v1477_v14  ;;  %vm1494_vm0 = vcmp.eq.f32.partialorder %v1493_v57, 8.507059e+37  ;;  %v1187_v49 = vadd.f32 %v1186_v53, %v4090_v12  ;;  %v1190_v45 = vadd.f32 %v1189_v0, %v4080_v30  ;;  %v2465_v0 = vld [vmem:[%s2820_s25 + $0x268] sm:$0xff] }
 0x3b0   : > { %2363 = vset.pattern.permute.xlu1 %v2693_v5  ;;  %2364 = vset.pattern.permute.xlu2 %v2695_v7  ;;  %v2421_v8 = vpop.eup %2420  ;;  %v1395_v27 = vmul.f32 %v2419_v31, %v4105_v54  ;;  %v1312_v20 = vsel %vm1311_vm7, %v4107_v16, %v1308_v18  ;;  %vm1400_vm9 = vweird.f32 %v2419_v31  ;;  %v1495_v54 = vand.u32 2147483648, %v4117_v37 }
 0x3b1   : > { %2360 = vset.pattern.permute.xlu0 %v2695_v7  ;;  %1698 = vperm.xlu1 %2363, %v4115_v15   ;;  %v4138_v59 = vadd.f32 1.0, %v2421_v8  ;;  %v2423_v44 = vpop.eup %2422  ;;  %v4149_v19 = vsel %vm1314_vm8, %v1316_v9, %v1312_v20  ;;  %vm1401_vm11 = vmor %vm1399_vm10, %vm1400_vm9  ;;  %v2179_v61 = vmul.f32 -1.442695, %v1187_v49  ;;  %v1204_v8 = vpop.f32.mrf.mxu2 }
 0x3b2   : > { %1827 = vperm.xlu2 %2364, %v4115_v15   ;;  %1803 = vperm.xlu0 %2360, %v1302_v55   ;;  %v1396_v23 = vsub.f32 1.0, %v1395_v27  ;;  %v1485_v34 = vmul.f32 %v2423_v44, %v4117_v37  ;;  %v2190_v55 = vmul.f32 -1.442695, %v1220_v58  ;;  %vm1490_vm13 = vweird.f32 %v2423_v44 }
 0x3b3   : > { %2424 = vrcp.f32 %v4138_v59  ;;  %vm1491_vm15 = vmor %vm1489_vm14, %vm1490_vm13  ;;  %v1496_v36 = vor.u32 1.1754944e-38, %v1495_v54  ;;  %v1330_v37 = vand.u32 2147483648, %v4138_v59  ;;  %vm1324_vm2 = vweird.f32 %v4138_v59 }
 0x3b4   : > { %v1397_v40 = vmul.f32 %v2419_v31, %v1396_v23  ;;  %v1486_v46 = vsub.f32 1.0, %v1485_v34  ;;  %2426 = vpow2.f32 %v2184_v6  ;;  %v1328_v51 = vand.u32 2147483647, %v4138_v59 }
 0x3b5   : > { %2428 = vpow2.f32 %v2190_v55  ;;  %v1331_v14 = vor.u32 1.1754944e-38, %v1330_v37  ;;  %v1205_v60 = vadd.f32 %v1204_v8, %v4084_v42  ;;  %v1222_v23 = vpop.f32.mrf.mxu3 }
 0x3b6   : > { %v1398_v28 = vadd.f32 %v2419_v31, %v1397_v40  ;;  %v1487_v39 = vmul.f32 %v2423_v44, %v1486_v46  ;;  %vm1329_vm4 = vcmp.eq.f32.partialorder %v1328_v51, 8.507059e+37 }
 0x3b7   : > { %v2185_v3 = vmul.f32 -1.442695, %v1205_v60 }
 0x3b8   : > { %v1402_v56 = vsel %vm1401_vm11, %v2419_v31, %v1398_v28  ;;  %v1488_v32 = vadd.f32 %v2423_v44, %v1487_v39 }
 0x3b9   : > { %1722 = vperm.xlu1 %2363, %v4133_v63   ;;  %v2425_v48 = vpop.eup %2424  ;;  %v4160_v16 = vsel %vm1404_vm12, %v1406_v21, %v1402_v56  ;;  %v2180_v21 = vmul.f32 -1.442695, %v1190_v45  ;;  %v1207_v57 = vpop.f32.mrf.mxu2 }
 0x3ba   : > { %1851 = vperm.xlu2 %2364, %v4133_v63   ;;  %2362 = vset.pattern.permute.xlu0 %v2691_v47  ;;  %v1320_v1 = vmul.f32 %v2425_v48, %v4138_v59  ;;  %v2427_v13 = vpop.eup %2426  ;;  %v1492_v17 = vsel %vm1491_vm15, %v2423_v44, %v1488_v32  ;;  %vm1325_vm1 = vweird.f32 %v2425_v48  ;;  %v1109_v44 = vpop.permute.xlu1 %1108 }
 0x3bb   : > { %1561 = vperm.xlu0 %2362, %v4115_v15   ;;  %v4166_v35 = vadd.f32 1.0, %v2427_v13  ;;  %v2429_v33 = vpop.eup %2428  ;;  %v4173_v4 = vsel %vm1494_vm0, %v1496_v36, %v1492_v17  ;;  %vm1326_vm3 = vmor %vm1324_vm2, %vm1325_vm1  ;;  %v1223_v20 = vadd.f32 %v1222_v23, %v1109_v44 }
 0x3bc   : > { %v1321_v43 = vsub.f32 1.0, %v1320_v1 }
 0x3bd   : > { %2430 = vrcp.f32 %v4166_v35  ;;  %v1420_v9 = vand.u32 2147483648, %v4166_v35  ;;  %vm1414_vm6 = vweird.f32 %v4166_v35  ;;  %v1418_v40 = vand.u32 2147483647, %v4166_v35 }
 0x3be   : > { %v1322_v41 = vmul.f32 %v2425_v48, %v1321_v43  ;;  %v2191_v11 = vmul.f32 -1.442695, %v1223_v20 }
 0x3bf   : > { %vm1419_vm8 = vcmp.eq.f32.partialorder %v1418_v40, 8.507059e+37 }
 0x3c0   : > { %v1323_v22 = vadd.f32 %v2425_v48, %v1322_v41  ;;  %v1208_v41 = vadd.f32 %v1207_v57, %v4088_v38  ;;  %v2467_v57 = vld [vmem:[%s2820_s25 + $0x2c8] sm:$0xff]  ;;  %v2468_v38 = vld [vmem:[%s2820_s25 + $0x300] sm:$0xff] }
 0x3c1   : > { %1678 = vperm.xlu1 %2363, %v4149_v19  }
 0x3c2   : > { %2366 = vset.pattern.permute.xlu2 %v2691_v47  ;;  %v1327_v31 = vsel %vm1326_vm3, %v2425_v48, %v1323_v22  ;;  %v2186_v51 = vmul.f32 -1.442695, %v1208_v41 }
 0x3c3   : > { %1536 = vperm.xlu2 %2366, %v4149_v19   ;;  %1591 = vperm.xlu0 %2362, %v4133_v63   ;;  %v2431_v29 = vpop.eup %2430  ;;  %v4188_v2 = vsel %vm1329_vm4, %v1331_v14, %v1327_v31 }
 0x3c4   : > { %v1410_v12 = vmul.f32 %v2431_v29, %v4166_v35  ;;  %vm1415_vm5 = vweird.f32 %v2431_v29 }
 0x3c5   : > { %vm1416_vm7 = vmor %vm1414_vm6, %vm1415_vm5 }
 0x3c6   : > { %v1411_v25 = vsub.f32 1.0, %v1410_v12  ;;  %v2463_v12 = vld [vmem:[%s2820_s25 + $0x108] sm:$0xff] }
 0x3c9   : > { %2370 = vset.pattern.permute.xlu1 %v2695_v7 }
 0x3ca   : > { %1831 = vperm.xlu1 %2370, %v4160_v16  }
 0x3cb   : > { %2367 = vset.pattern.permute.xlu2 %v2695_v7  ;;  %2365 = vset.pattern.permute.xlu0 %v2694_v52 }
 0x3cc   : > { %1807 = vperm.xlu2 %2367, %v4149_v19   ;;  %1956 = vperm.xlu0 %2365, %v4115_v15   ;;  %v4176_v15 = vadd.f32 1.0, %v2429_v33 }
 0x3ce   : > { %2432 = vrcp.f32 %v4176_v15  ;;  %v1510_v48 = vand.u32 2147483648, %v4176_v15  ;;  %vm1504_vm10 = vweird.f32 %v4176_v15  ;;  %v1508_v39 = vand.u32 2147483647, %v4176_v15 }
 0x3cf   : > { %2434 = vpow2.f32 %v2179_v61  ;;  %v2462_v61 = vld [vmem:[%s2820_s25 + $0x100] sm:$0xff] }
 0x3d0   : > { %2436 = vpow2.f32 %v2185_v3  ;;  %v1511_v1 = vor.u32 1.1754944e-38, %v1510_v48  ;;  %vm1509_vm12 = vcmp.eq.f32.partialorder %v1508_v39, 8.507059e+37 }
 0x3d2   : > { %1855 = vperm.xlu1 %2370, %v4173_v4  }
 0x3d4   : > { %2368 = vset.pattern.permute.xlu2 %v2691_v47  ;;  %1980 = vperm.xlu0 %2365, %v4133_v63   ;;  %v2433_v27 = vpop.eup %2432  ;;  %v1412_v63 = vmul.f32 %v2431_v29, %v1411_v25  ;;  %v1192_v25 = vpop.f32.mrf.mxu1 }
 0x3d5   : > { %1566 = vperm.xlu2 %2368, %v4160_v16   ;;  %v1500_v18 = vmul.f32 %v2433_v27, %v4176_v15  ;;  %v2435_v59 = vpop.eup %2434  ;;  %vm1505_vm9 = vweird.f32 %v2433_v27 }
 0x3d6   : > { %v4198_v10 = vadd.f32 1.0, %v2435_v59  ;;  %v1413_v42 = vadd.f32 %v2431_v29, %v1412_v63  ;;  %v2437_v28 = vpop.eup %2436  ;;  %vm1506_vm11 = vmor %vm1504_vm10, %vm1505_vm9 }
 0x3d7   : > { %v1501_v26 = vsub.f32 1.0, %v1500_v18  ;;  %v4212_v56 = vadd.f32 1.0, %v2437_v28  ;;  %v1193_v18 = vadd.f32 %v1192_v25, %v4097_v62  ;;  %v1210_v62 = vpop.f32.mrf.mxu2 }
 0x3d8   : > { %2438 = vrcp.f32 %v4198_v10  ;;  %v1417_v34 = vsel %vm1416_vm7, %v2431_v29, %v1413_v42  ;;  %v1345_v22 = vand.u32 2147483648, %v4198_v10  ;;  %vm1339_vm14 = vweird.f32 %v4198_v10 }
 0x3d9   : > { %v1502_v6 = vmul.f32 %v2433_v27, %v1501_v26  ;;  %2440 = vpow2.f32 %v2191_v11  ;;  %v1343_v15 = vand.u32 2147483647, %v4198_v10  ;;  %v1435_v44 = vand.u32 2147483648, %v4212_v56  ;;  %v2464_v11 = vld [vmem:[%s2820_s25 + $0x260] sm:$0xff] }
 0x3da   : > { %2372 = vset.pattern.permute.xlu1 %v2691_v47  ;;  %2442 = vrcp.f32 %v4212_v56  ;;  %v1346_v8 = vor.u32 1.1754944e-38, %v1345_v22  ;;  %vm1429_vm2 = vweird.f32 %v4212_v56  ;;  %v2181_v42 = vmul.f32 -1.442695, %v1193_v18 }
 0x3db   : > { %1541 = vperm.xlu1 %2372, %v4188_v2   ;;  %v1503_v58 = vadd.f32 %v2433_v27, %v1502_v6  ;;  %2444 = vpow2.f32 %v2180_v21  ;;  %vm1344_vm0 = vcmp.eq.f32.partialorder %v1343_v15, 8.507059e+37 }
 0x3dc   : > { %1936 = vperm.xlu0 %2365, %v4149_v19   ;;  %v1421_v19 = vor.u32 1.1754944e-38, %v1420_v9 }
 0x3dd   : > { %1596 = vperm.xlu2 %2368, %v4173_v4   ;;  %v1507_v55 = vsel %vm1506_vm11, %v2433_v27, %v1503_v58  ;;  %v1211_v58 = vadd.f32 %v1210_v62, %v4131_v24 }
 0x3de   : > { %v1422_v46 = vsel %vm1419_vm8, %v1421_v19, %v1417_v34  ;;  %v2439_v50 = vpop.eup %2438 }
 0x3df   : > { %v1335_v13 = vmul.f32 %v2439_v50, %v4198_v10  ;;  %v2441_v30 = vpop.eup %2440  ;;  %vm1340_vm13 = vweird.f32 %v2439_v50  ;;  %v1433_v10 = vand.u32 2147483647, %v4212_v56  ;;  %v2187_v21 = vmul.f32 -1.442695, %v1211_v58 }
 0x3e0   : > { %v4223_v54 = vadd.f32 1.0, %v2441_v30  ;;  %v4225_v43 = vpop.eup %2442  ;;  %vm4241_vm15 = vmor %vm1339_vm14, %vm1340_vm13 }
 0x3e1   : > { %v1336_v32 = vsub.f32 1.0, %v1335_v13  ;;  %v2445_v17 = vpop.eup %2444  ;;  %v1425_v36 = vmul.f32 %v4225_v43, %v4212_v56  ;;  %vm1430_vm1 = vweird.f32 %v4225_v43  ;;  %vm1434_vm4 = vcmp.eq.f32.partialorder %v1433_v10, 8.507059e+37 }
 0x3e2   : > { %2446 = vrcp.f32 %v4223_v54  ;;  %v4233_v53 = vadd.f32 1.0, %v2445_v17  ;;  %vm4268_vm3 = vmor %vm1429_vm2, %vm1430_vm1  ;;  %v1525_v24 = vand.u32 2147483648, %v4223_v54  ;;  %vm1519_vm6 = vweird.f32 %v4223_v54 }
 0x3e3   : > { %2373 = vset.pattern.permute.xlu1 %v2695_v7  ;;  %v1337_v35 = vmul.f32 %v2439_v50, %v1336_v32  ;;  %v1426_v49 = vsub.f32 1.0, %v1425_v36  ;;  %v1523_v39 = vand.u32 2147483647, %v4223_v54 }
 0x3e4   : > { %2369 = vset.pattern.permute.xlu0 %v2693_v5  ;;  %1811 = vperm.xlu1 %2373, %v4188_v2   ;;  %2448 = vrcp.f32 %v4233_v53  ;;  %v1526_v17 = vor.u32 1.1754944e-38, %v1525_v24  ;;  %v1360_v22 = vand.u32 2147483648, %v4233_v53  ;;  %vm1354_vm10 = vweird.f32 %v4233_v53  ;;  %v2478_v24 = vld [vmem:[%s2820_s25 + $0x210] sm:$0xff] }
 0x3e5   : > { %1702 = vperm.xlu0 %2369, %v4160_v16   ;;  %2371 = vset.pattern.permute.xlu2 %v2694_v52  ;;  %v1338_v33 = vadd.f32 %v2439_v50, %v1337_v35  ;;  %v1427_v27 = vmul.f32 %v4225_v43, %v1426_v49  ;;  %2450 = vpow2.f32 %v2186_v51  ;;  %vm1524_vm8 = vcmp.eq.f32.partialorder %v1523_v39, 8.507059e+37 }
 0x3e6   : > { %1960 = vperm.xlu2 %2371, %v4160_v16   ;;  %v4218_v16 = vsel %vm1509_vm12, %v1511_v1, %v1507_v55  ;;  %2452 = vpow2.f32 %v2181_v42  ;;  %v2479_v55 = vld [vmem:[%s2820_s25 + $0x218] sm:$0xff] }
 0x3e7   : > { %v1342_v31 = vsel %vm4241_vm15, %v2439_v50, %v1338_v33  ;;  %v1428_v59 = vadd.f32 %v4225_v43, %v1427_v27 }
 0x3e8   : > { %v4239_v37 = vpop.eup %2446  ;;  %v1347_v63 = vsel %vm1344_vm0, %v1346_v8, %v1342_v31  ;;  %v2471_v8 = vld [vmem:[%s2820_s25 + $0x8] sm:$0xff] }
 0x3e9   : > { %v1515_v60 = vmul.f32 %v4239_v37, %v4223_v54  ;;  %v1432_v9 = vsel %vm4268_vm3, %v4225_v43, %v1428_v59  ;;  %vm1520_vm5 = vweird.f32 %v4239_v37  ;;  %v2466_v43 = vld [vmem:[%s2820_s25 + $0x2c0] sm:$0xff]  ;;  %v2472_v59 = vld [vmem:[%s2820_s25 + $0x10] sm:$0xff] }
 0x3ea   : > { %v4263_v23 = vpop.eup %2448  ;;  %vm4296_vm7 = vmor %vm1519_vm6, %vm1520_vm5 }
 0x3eb   : > { %v1516_v3 = vsub.f32 1.0, %v1515_v60  ;;  %v1350_v34 = vmul.f32 %v4263_v23, %v4233_v53  ;;  %v2451_v6 = vpop.eup %2450  ;;  %vm1355_vm9 = vweird.f32 %v4263_v23  ;;  %v1361_v60 = vor.u32 1.1754944e-38, %v1360_v22 }
 0x3ec   : > { %2374 = vset.pattern.permute.xlu1 %v2691_v47  ;;  %v4287_v48 = vadd.f32 1.0, %v2451_v6  ;;  %v2453_v32 = vpop.eup %2452  ;;  %vm4325_vm11 = vmor %vm1354_vm10, %vm1355_vm9 }
 0x3ed   : > { %1726 = vperm.xlu0 %2369, %v4173_v4   ;;  %1571 = vperm.xlu1 %2374, %v1422_v46   ;;  %v1517_v40 = vmul.f32 %v4239_v37, %v1516_v3  ;;  %v1351_v56 = vsub.f32 1.0, %v1350_v34  ;;  %v4316_v33 = vadd.f32 1.0, %v2453_v32  ;;  %v2475_v34 = vld [vmem:[%s2820_s25 + $0x168] sm:$0xff] }
 0x3ee   : > { %1940 = vperm.xlu2 %2371, %v4188_v2   ;;  %2454 = vrcp.f32 %v4287_v48  ;;  %vm1444_vm14 = vweird.f32 %v4287_v48 }
 0x3ef   : > { %v1518_v50 = vadd.f32 %v4239_v37, %v1517_v40  ;;  %v1352_v30 = vmul.f32 %v4263_v23, %v1351_v56  ;;  %2456 = vpow2.f32 %v2187_v21  ;;  %vm1369_vm2 = vweird.f32 %v4316_v33 }
 0x3f0   : > { %2458 = vrcp.f32 %v4316_v33 }
 0x3f1   : > { %v1522_v13 = vsel %vm4296_vm7, %v4239_v37, %v1518_v50  ;;  %v1353_v41 = vadd.f32 %v4263_v23, %v1352_v30  ;;  %v1358_v37 = vand.u32 2147483647, %v4233_v53 }
 0x3f2   : > { %v4309_v36 = vsel %vm1524_vm8, %v1526_v17, %v1522_v13  ;;  %v1450_v13 = vand.u32 2147483648, %v4287_v48 }
 0x3f3   : > { %v1357_v53 = vsel %vm4325_vm11, %v4263_v23, %v1353_v41  ;;  %vm1359_vm12 = vcmp.eq.f32.partialorder %v1358_v37, 8.507059e+37  ;;  %v2496_v41 = vld [vmem:[%s2820_s25 + $0x370] sm:$0xff] }
 0x3f4   : > { %v4319_v15 = vpop.eup %2454  ;;  %v4343_v23 = vsel %vm1359_vm12, %v1361_v60, %v1357_v53  ;;  %v1451_v37 = vor.u32 1.1754944e-38, %v1450_v13  ;;  %v2516_v13 = vld [vmem:[%s2820_s25 + $0x1d0] sm:$0xff] }
 0x3f5   : > { %1682 = vperm.xlu0 %2369, %v4188_v2   ;;  %1601 = vperm.xlu1 %2374, %v4218_v16   ;;  %v2457_v18 = vpop.eup %2456  ;;  %vm1445_vm13 = vweird.f32 %v4319_v15 }
 0x3f6   : > { %2375 = vset.pattern.permute.xlu2 %v2693_v5  ;;  %v4348_v42 = vadd.f32 1.0, %v2457_v18  ;;  %v4352_v62 = vpop.eup %2458  ;;  %vm4385_vm15 = vmor %vm1444_vm14, %vm1445_vm13  ;;  %v2486_v18 = vld [vmem:[%s2820_s25 + $0x110] sm:$0xff] }
 0x3f7   : > { %1706 = vperm.xlu2 %2375, %v1422_v46   ;;  %v1365_v56 = vmul.f32 %v4352_v62, %v4316_v33  ;;  %vm1370_vm1 = vweird.f32 %v4352_v62 }
 0x3f8   : > { %2460 = vrcp.f32 %v4348_v42  ;;  %vm4419_vm3 = vmor %vm1369_vm2, %vm1370_vm1  ;;  %vm1459_vm6 = vweird.f32 %v4348_v42 }
 0x3f9   : > { %v1366_v30 = vsub.f32 1.0, %v1365_v56 }
 0x3fd   : > { %2376 = vset.pattern.permute.xlu0 %v2695_v7  ;;  %2377 = vset.pattern.permute.xlu1 %v2694_v52 }
 0x3fe   : > { %1835 = vperm.xlu0 %2376, %v1422_v46   ;;  %1964 = vperm.xlu1 %2377, %v1422_v46   ;;  %v1436_v46 = vor.u32 1.1754944e-38, %v1435_v44  ;;  %v2473_v44 = vld [vmem:[%s2820_s25 + $0x18] sm:$0xff]  ;;  %v4378_v32 = vpop.eup %2460 }
 0x3ff   : > { %1730 = vperm.xlu2 %2375, %v4218_v16   ;;  %vm1460_vm5 = vweird.f32 %v4378_v32 }
 0x400   : > { %v4285_v45 = vsel %vm1434_vm4, %v1436_v46, %v1432_v9  ;;  %v2474_v9 = vld [vmem:[%s2820_s25 + $0x160] sm:$0xff]  ;;  %vm4452_vm7 = vmor %vm1459_vm6, %vm1460_vm5 }
 0x402   : > { %v1675_v29 = vpop.permute.xlu2 %1674 }
 0x403   : > { %v1737_v14 = vmul.f32 %v2462_v61, %v1675_v29  ;;  %v1738_v2 = vmul.f32 %v2463_v12, %v1675_v29  ;;  %v2469_v29 = vld [vmem:[%s2820_s25 + $0x308] sm:$0xff]  ;;  %v2470_v12 = vld [vmem:[%s2820_s25] sm:$0xff] }
 0x405   : > { %2192 = vst [vmem:[%s4255_s17 + $0x100] sm:$0xff] %v1737_v14 }
 0x406   : > { %2193 = vst [vmem:[%s4255_s17 + $0x108] sm:$0xff] %v1738_v2  ;;  %1859 = vperm.xlu0 %2376, %v4218_v16   ;;  %1944 = vperm.xlu1 %2377, %v1347_v63  }
 0x407   : > { %1686 = vperm.xlu2 %2375, %v1347_v63  }
 0x40c   : > { %v1828_v20 = vpop.permute.xlu2 %1827 }
 0x40d   : > { %v1878_v19 = vmul.f32 %v2464_v11, %v1828_v20  ;;  %v1879_v28 = vmul.f32 %v2465_v0, %v1828_v20 }
 0x40e   : > { %2378 = vset.pattern.permute.xlu0 %v2691_v47  ;;  %2380 = vset.pattern.permute.xlu1 %v2693_v5 }
 0x40f   : > { %2236 = vst [vmem:[%s4255_s17 + $0x260] sm:$0xff] %v1878_v19  ;;  %1546 = vperm.xlu0 %2378, %v1347_v63   ;;  %2379 = vset.pattern.permute.xlu2 %v2695_v7  ;;  %v2476_v19 = vld [vmem:[%s2820_s25 + $0x200] sm:$0xff] }
 0x410   : > { %2237 = vst [vmem:[%s4255_s17 + $0x268] sm:$0xff] %v1879_v28  ;;  %1710 = vperm.xlu1 %2380, %v4285_v45   ;;  %1815 = vperm.xlu2 %2379, %v1347_v63   ;;  %v1440_v63 = vmul.f32 %v4319_v15, %v4287_v48  ;;  %v2477_v28 = vld [vmem:[%s2820_s25 + $0x208] sm:$0xff] }
 0x412   : > { %v1441_v26 = vsub.f32 1.0, %v1440_v63  ;;  %v1375_v63 = vand.u32 2147483648, %v4316_v33 }
 0x414   : > { %v1852_v1 = vpop.permute.xlu2 %1851  ;;  %v1442_v58 = vmul.f32 %v4319_v15, %v1441_v26 }
 0x415   : > { %v1890_v35 = vmul.f32 %v2466_v43, %v1852_v1  ;;  %v1891_v54 = vmul.f32 %v2467_v57, %v1852_v1  ;;  %v1448_v43 = vand.u32 2147483647, %v4287_v48  ;;  %v2482_v48 = vld [vmem:[%s2820_s25 + $0x60] sm:$0xff] }
 0x416   : > { %v1443_v1 = vadd.f32 %v4319_v15, %v1442_v58 }
 0x417   : > { %2248 = vst [vmem:[%s4255_s17 + $0x2c0] sm:$0xff] %v1890_v35  ;;  %1576 = vperm.xlu0 %2378, %v4285_v45   ;;  %v2480_v35 = vld [vmem:[%s2820_s25 + $0x1c0] sm:$0xff]  ;;  %vm1449_vm0 = vcmp.eq.f32.partialorder %v1448_v43, 8.507059e+37 }
 0x418   : > { %2249 = vst [vmem:[%s4255_s17 + $0x2c8] sm:$0xff] %v1891_v54  ;;  %1734 = vperm.xlu1 %2380, %v4309_v36   ;;  %1839 = vperm.xlu2 %2379, %v4285_v45   ;;  %v2481_v54 = vld [vmem:[%s2820_s25 + $0x1c8] sm:$0xff]  ;;  %v2494_v43 = vld [vmem:[%s2820_s25 + $0x360] sm:$0xff] }
 0x41a   : > { %v1933_v49 = vpop.permute.xlu1 %1932 }
 0x41b   : > { %v1995_v51 = vmul.f32 %v2468_v38, %v1933_v49  ;;  %v1996_v31 = vmul.f32 %v2469_v29, %v1933_v49  ;;  %v1532_v61 = vpop.permute.xlu0 %1531  ;;  %v1447_v49 = vsel %vm4385_vm15, %v4319_v15, %v1443_v1 }
 0x41c   : > { %v1609_v2 = vmul.f32 %v2470_v12, %v1532_v61  ;;  %v1610_v25 = vmul.f32 %v2471_v8, %v1532_v61  ;;  %v1455_v61 = vmul.f32 %v4378_v32, %v4348_v42  ;;  %v2484_v12 = vld [vmem:[%s2820_s25 + $0x70] sm:$0xff] }
 0x41d   : > { %2256 = vst [vmem:[%s4255_s17 + $0x300] sm:$0xff] %v1995_v51  ;;  %v1537_v27 = vpop.permute.xlu2 %1536  ;;  %v2483_v51 = vld [vmem:[%s2820_s25 + $0x68] sm:$0xff] }
 0x41e   : > { %2257 = vst [vmem:[%s4255_s17 + $0x308] sm:$0xff] %v1996_v31  ;;  %v1611_v3 = vmul.f32 %v2472_v59, %v1537_v27  ;;  %v1612_v10 = vmul.f32 %v2473_v44, %v1537_v27  ;;  %v1367_v31 = vmul.f32 %v4352_v62, %v1366_v30  ;;  %v1456_v27 = vsub.f32 1.0, %v1455_v61 }
 0x41f   : > { %1641 = vst [vmem:[%s4255_s17] sm:$0xff] %v1609_v2  ;;  %1606 = vperm.xlu0 %2378, %v4309_v36   ;;  %v2485_v2 = vld [vmem:[%s2820_s25 + $0x78] sm:$0xff] }
 0x420   : > { %1642 = vst [vmem:[%s4255_s17 + $0x8] sm:$0xff] %v1610_v25  ;;  %1690 = vperm.xlu1 %2380, %v4343_v23   ;;  %1863 = vperm.xlu2 %2379, %v4309_v36   ;;  %v4403_v25 = vsel %vm1449_vm0, %v1451_v37, %v1447_v49  ;;  %v1368_v53 = vadd.f32 %v4352_v62, %v1367_v31  ;;  %v2497_v49 = vld [vmem:[%s2820_s25 + $0x378] sm:$0xff] }
 0x421   : > { %1643 = vst [vmem:[%s4255_s17 + $0x10] sm:$0xff] %v1611_v3  ;;  %v2487_v3 = vld [vmem:[%s2820_s25 + $0x118] sm:$0xff] }
 0x422   : > { %1644 = vst [vmem:[%s4255_s17 + $0x18] sm:$0xff] %v1612_v10  ;;  %v1373_v10 = vand.u32 2147483647, %v4316_v33 }
 0x423   : > { %v1699_v20 = vpop.permute.xlu1 %1698 }
 0x424   : > { %v1749_v40 = vmul.f32 %v2474_v9, %v1699_v20  ;;  %v1750_v6 = vmul.f32 %v2475_v34, %v1699_v20  ;;  %v1804_v11 = vpop.permute.xlu0 %1803  ;;  %vm1374_vm4 = vcmp.eq.f32.partialorder %v1373_v10, 8.507059e+37 }
 0x425   : > { %v1866_v0 = vmul.f32 %v2476_v19, %v1804_v11  ;;  %v1867_v46 = vmul.f32 %v2477_v28, %v1804_v11  ;;  %v1457_v11 = vmul.f32 %v4378_v32, %v1456_v27  ;;  %v1376_v19 = vor.u32 1.1754944e-38, %v1375_v63  ;;  %v2503_v27 = vld [vmem:[%s2820_s25 + $0x328] sm:$0xff] }
 0x426   : > { %2204 = vst [vmem:[%s4255_s17 + $0x160] sm:$0xff] %v1749_v40  ;;  %v1808_v50 = vpop.permute.xlu2 %1807  ;;  %v2489_v40 = vld [vmem:[%s2820_s25 + $0xc8] sm:$0xff] }
 0x427   : > { %2205 = vst [vmem:[%s4255_s17 + $0x168] sm:$0xff] %v1750_v6  ;;  %v1868_v39 = vmul.f32 %v2478_v24, %v1808_v50  ;;  %v1869_v21 = vmul.f32 %v2479_v55, %v1808_v50  ;;  %2381 = vset.pattern.permute.xlu0 %v2694_v52  ;;  %v1372_v6 = vsel %vm4419_vm3, %v4352_v62, %v1368_v53  ;;  %v1463_v24 = vand.u32 2147483647, %v4348_v42  ;;  %v2502_v53 = vld [vmem:[%s2820_s25 + $0x320] sm:$0xff] }
 0x428   : > { %2224 = vst [vmem:[%s4255_s17 + $0x200] sm:$0xff] %v1866_v0  ;;  %2383 = vset.pattern.permute.xlu1 %v2695_v7  ;;  %1968 = vperm.xlu0 %2381, %v4285_v45   ;;  %v2490_v0 = vld [vmem:[%s2820_s25 + $0xd0] sm:$0xff]  ;;  %v4437_v62 = vsel %vm1374_vm4, %v1376_v19, %v1372_v6  ;;  %v1458_v50 = vadd.f32 %v4378_v32, %v1457_v11  ;;  %v2510_v11 = vld [vmem:[%s2820_s25 + $0x220] sm:$0xff]  ;;  %v2511_v19 = vld [vmem:[%s2820_s25 + $0x228] sm:$0xff] }
 0x429   : > { %2225 = vst [vmem:[%s4255_s17 + $0x208] sm:$0xff] %v1867_v46  ;;  %2382 = vset.pattern.permute.xlu2 %v2691_v47  ;;  %1819 = vperm.xlu1 %2383, %v4343_v23   ;;  %v2491_v46 = vld [vmem:[%s2820_s25 + $0xd8] sm:$0xff]  ;;  %vm1464_vm8 = vcmp.eq.f32.partialorder %v1463_v24, 8.507059e+37 }
 0x42a   : > { %2226 = vst [vmem:[%s4255_s17 + $0x210] sm:$0xff] %v1868_v39  ;;  %1551 = vperm.xlu2 %2382, %v4343_v23   ;;  %v2492_v39 = vld [vmem:[%s2820_s25 + $0x270] sm:$0xff] }
 0x42b   : > { %2227 = vst [vmem:[%s4255_s17 + $0x218] sm:$0xff] %v1869_v21  ;;  %v1723_v45 = vpop.permute.xlu1 %1722  ;;  %v2493_v21 = vld [vmem:[%s2820_s25 + $0x278] sm:$0xff] }
 0x42c   : > { %v1761_v57 = vmul.f32 %v2480_v35, %v1723_v45  ;;  %v1762_v17 = vmul.f32 %v2481_v54, %v1723_v45  ;;  %v1462_v45 = vsel %vm4452_vm7, %v4378_v32, %v1458_v50  ;;  %v2495_v35 = vld [vmem:[%s2820_s25 + $0x368] sm:$0xff] }
 0x42d   : > { %v1562_v22 = vpop.permute.xlu0 %1561 }
 0x42e   : > { %2216 = vst [vmem:[%s4255_s17 + $0x1c0] sm:$0xff] %v1761_v57  ;;  %v1621_v38 = vmul.f32 %v2482_v48, %v1562_v22  ;;  %v1622_v29 = vmul.f32 %v2483_v51, %v1562_v22 }
 0x42f   : > { %2217 = vst [vmem:[%s4255_s17 + $0x1c8] sm:$0xff] %v1762_v17  ;;  %v1567_v14 = vpop.permute.xlu2 %1566 }
 0x430   : > { %1653 = vst [vmem:[%s4255_s17 + $0x60] sm:$0xff] %v1621_v38  ;;  %v1623_v15 = vmul.f32 %v2484_v12, %v1567_v14  ;;  %v1624_v8 = vmul.f32 %v2485_v2, %v1567_v14  ;;  %2386 = vset.pattern.permute.xlu0 %v2693_v5  ;;  %v2498_v38 = vld [vmem:[%s2820_s25 + $0x2d0] sm:$0xff]  ;;  %v2500_v14 = vld [vmem:[%s2820_s25 + $0x3c0] sm:$0xff] }
 0x431   : > { %1654 = vst [vmem:[%s4255_s17 + $0x68] sm:$0xff] %v1622_v29  ;;  %1843 = vperm.xlu1 %2383, %v4403_v25   ;;  %1714 = vperm.xlu0 %2386, %v4403_v25   ;;  %v2499_v29 = vld [vmem:[%s2820_s25 + $0x2d8] sm:$0xff] }
 0x432   : > { %1655 = vst [vmem:[%s4255_s17 + $0x70] sm:$0xff] %v1623_v15  ;;  %2384 = vset.pattern.permute.xlu2 %v2694_v52  ;;  %v2501_v15 = vld [vmem:[%s2820_s25 + $0x3c8] sm:$0xff] }
 0x433   : > { %1656 = vst [vmem:[%s4255_s17 + $0x78] sm:$0xff] %v1624_v8  ;;  %1948 = vperm.xlu2 %2384, %v4343_v23   ;;  %v1679_v60 = vpop.permute.xlu1 %1678  ;;  %v2488_v23 = vld [vmem:[%s2820_s25 + $0xc0] sm:$0xff] }
 0x434   : > { %v1739_v59 = vmul.f32 %v2486_v18, %v1679_v60  ;;  %v1740_v44 = vmul.f32 %v2487_v3, %v1679_v60  ;;  %v2504_v18 = vld [vmem:[%s2820_s25 + $0x20] sm:$0xff]  ;;  %v2505_v3 = vld [vmem:[%s2820_s25 + $0x28] sm:$0xff] }
 0x435   : > { %v1592_v26 = vpop.permute.xlu0 %1591 }
 0x436   : > { %2194 = vst [vmem:[%s4255_s17 + $0x110] sm:$0xff] %v1739_v59  ;;  %v1633_v9 = vmul.f32 %v2488_v23, %v1592_v26  ;;  %v1634_v34 = vmul.f32 %v2489_v40, %v1592_v26  ;;  %v2507_v26 = vld [vmem:[%s2820_s25 + $0x318] sm:$0xff]  ;;  %v2508_v23 = vld [vmem:[%s2820_s25 + $0x180] sm:$0xff]  ;;  %v2509_v40 = vld [vmem:[%s2820_s25 + $0x188] sm:$0xff] }
 0x437   : > { %2195 = vst [vmem:[%s4255_s17 + $0x118] sm:$0xff] %v1740_v44  ;;  %v1597_v33 = vpop.permute.xlu2 %1596 }
 0x438   : > { %1665 = vst [vmem:[%s4255_s17 + $0xc0] sm:$0xff] %v1633_v9  ;;  %v1635_v28 = vmul.f32 %v2490_v0, %v1597_v33  ;;  %v1636_v58 = vmul.f32 %v2491_v46, %v1597_v33  ;;  %v2512_v46 = vld [vmem:[%s2820_s25 + $0x170] sm:$0xff] }
 0x439   : > { %1666 = vst [vmem:[%s4255_s17 + $0xc8] sm:$0xff] %v1634_v34  ;;  %2388 = vset.pattern.permute.xlu1 %v2691_v47  ;;  %2390 = vset.pattern.permute.xlu0 %v2695_v7  ;;  %v1465_v7 = vand.u32 2147483648, %v4348_v42 }
 0x43a   : > { %1667 = vst [vmem:[%s4255_s17 + $0xd0] sm:$0xff] %v1635_v28  ;;  %1556 = vperm.xlu1 %2388, %v4437_v62   ;;  %1823 = vperm.xlu0 %2390, %v4437_v62  }
 0x43b   : > { %1668 = vst [vmem:[%s4255_s17 + $0xd8] sm:$0xff] %v1636_v58  ;;  %2385 = vset.pattern.permute.xlu2 %v2691_v47  ;;  %v1466_v54 = vor.u32 1.1754944e-38, %v1465_v7 }
 0x43c   : > { %1581 = vperm.xlu2 %2385, %v4403_v25   ;;  %v1832_v56 = vpop.permute.xlu1 %1831 }
 0x43d   : > { %v1880_v55 = vmul.f32 %v2492_v39, %v1832_v56  ;;  %v1881_v1 = vmul.f32 %v2493_v21, %v1832_v56  ;;  %v1467_v32 = vsel %vm1464_vm8, %v1466_v54, %v1462_v45  ;;  %v2514_v56 = vld [vmem:[%s2820_s25 + $0x1e0] sm:$0xff]  ;;  %v2515_v39 = vld [vmem:[%s2820_s25 + $0x1e8] sm:$0xff]  ;;  %v2517_v45 = vld [vmem:[%s2820_s25 + $0x1d8] sm:$0xff] }
 0x43e   : > { %v1957_v30 = vpop.permute.xlu0 %1956 }
 0x43f   : > { %2238 = vst [vmem:[%s4255_s17 + $0x270] sm:$0xff] %v1880_v55  ;;  %v2007_v42 = vmul.f32 %v2494_v43, %v1957_v30  ;;  %v2008_v57 = vmul.f32 %v2495_v35, %v1957_v30  ;;  %v2519_v35 = vld [vmem:[%s2820_s25 + $0x88] sm:$0xff] }
 0x440   : > { %2239 = vst [vmem:[%s4255_s17 + $0x278] sm:$0xff] %v1881_v1  ;;  %v1961_v17 = vpop.permute.xlu2 %1960 }
 0x441   : > { %2268 = vst [vmem:[%s4255_s17 + $0x360] sm:$0xff] %v2007_v42  ;;  %v2009_v22 = vmul.f32 %v2496_v41, %v1961_v17  ;;  %v2010_v37 = vmul.f32 %v2497_v49, %v1961_v17  ;;  %v2518_v42 = vld [vmem:[%s2820_s25 + $0x80] sm:$0xff]  ;;  %v2521_v17 = vld [vmem:[%s2820_s25 + $0x138] sm:$0xff] }
 0x442   : > { %2269 = vst [vmem:[%s4255_s17 + $0x368] sm:$0xff] %v2008_v57  ;;  %2391 = vset.pattern.permute.xlu1 %v2694_v52  ;;  %1847 = vperm.xlu0 %2390, %v1467_v32  }
 0x443   : > { %2270 = vst [vmem:[%s4255_s17 + $0x370] sm:$0xff] %v2009_v22  ;;  %1952 = vperm.xlu1 %2391, %v4437_v62  }
 0x444   : > { %2271 = vst [vmem:[%s4255_s17 + $0x378] sm:$0xff] %v2010_v37  ;;  %2387 = vset.pattern.permute.xlu2 %v2694_v52  ;;  %v1856_v48 = vpop.permute.xlu1 %1855  ;;  %v2522_v37 = vld [vmem:[%s2820_s25 + $0x120] sm:$0xff] }
 0x445   : > { %1972 = vperm.xlu2 %2387, %v4403_v25   ;;  %v1892_v51 = vmul.f32 %v2498_v38, %v1856_v48  ;;  %v1893_v31 = vmul.f32 %v2499_v29, %v1856_v48  ;;  %v2523_v48 = vld [vmem:[%s2820_s25 + $0x128] sm:$0xff] }
 0x446   : > { %v1981_v61 = vpop.permute.xlu0 %1980 }
 0x447   : > { %2250 = vst [vmem:[%s4255_s17 + $0x2d0] sm:$0xff] %v1892_v51  ;;  %v2019_v12 = vmul.f32 %v2500_v14, %v1981_v61  ;;  %v2020_v2 = vmul.f32 %v2501_v15, %v1981_v61  ;;  %v2524_v51 = vld [vmem:[%s2820_s25 + $0xe0] sm:$0xff] }
 0x448   : > { %2251 = vst [vmem:[%s4255_s17 + $0x2d8] sm:$0xff] %v1893_v31  ;;  %v1941_v8 = vpop.permute.xlu2 %1940  ;;  %v2525_v31 = vld [vmem:[%s2820_s25 + $0xe8] sm:$0xff] }
 0x449   : > { %2280 = vst [vmem:[%s4255_s17 + $0x3c0] sm:$0xff] %v2019_v12  ;;  %v1999_v25 = vmul.f32 %v2502_v53, %v1941_v8  ;;  %v2000_v60 = vmul.f32 %v2503_v27, %v1941_v8  ;;  %v2526_v12 = vld [vmem:[%s2820_s25 + $0x230] sm:$0xff]  ;;  %v2528_v27 = vld [vmem:[%s2820_s25 + $0x280] sm:$0xff] }
 0x44a   : > { %2281 = vst [vmem:[%s4255_s17 + $0x3c8] sm:$0xff] %v2020_v2  ;;  %2395 = vset.pattern.permute.xlu0 %v2694_v52  ;;  %v2527_v2 = vld [vmem:[%s2820_s25 + $0x238] sm:$0xff] }
 0x44b   : > { %2260 = vst [vmem:[%s4255_s17 + $0x320] sm:$0xff] %v1999_v25  ;;  %2392 = vset.pattern.permute.xlu1 %v2691_v47  ;;  %1992 = vperm.xlu0 %2395, %v4309_v36   ;;  %v2506_v36 = vld [vmem:[%s2820_s25 + $0x310] sm:$0xff] }
 0x44c   : > { %2261 = vst [vmem:[%s4255_s17 + $0x328] sm:$0xff] %v2000_v60  ;;  %1586 = vperm.xlu1 %2392, %v1467_v32  }
 0x44d   : > { %2389 = vset.pattern.permute.xlu2 %v2693_v5  ;;  %v1542_v63 = vpop.permute.xlu1 %1541 }
 0x44e   : > { %1694 = vperm.xlu2 %2389, %v4437_v62   ;;  %v1613_v59 = vmul.f32 %v2504_v18, %v1542_v63  ;;  %v1614_v47 = vmul.f32 %v2505_v3, %v1542_v63  ;;  %v1937_v44 = vpop.permute.xlu0 %1936  ;;  %v2513_v62 = vld [vmem:[%s2820_s25 + $0x178] sm:$0xff]  ;;  %v2529_v63 = vld [vmem:[%s2820_s25 + $0x288] sm:$0xff] }
 0x44f   : > { %v1997_v10 = vmul.f32 %v2506_v36, %v1937_v44  ;;  %v1998_v20 = vmul.f32 %v2507_v26, %v1937_v44 }
 0x450   : > { %1645 = vst [vmem:[%s4255_s17 + $0x20] sm:$0xff] %v1613_v59  ;;  %v2530_v59 = vld [vmem:[%s2820_s25 + $0x380] sm:$0xff] }
 0x451   : > { %1646 = vst [vmem:[%s4255_s17 + $0x28] sm:$0xff] %v1614_v47  ;;  %v1707_v5 = vpop.permute.xlu2 %1706  ;;  %v2531_v47 = vld [vmem:[%s2820_s25 + $0x388] sm:$0xff] }
 0x452   : > { %2258 = vst [vmem:[%s4255_s17 + $0x310] sm:$0xff] %v1997_v10  ;;  %v1753_v9 = vmul.f32 %v2508_v23, %v1707_v5  ;;  %v1754_v34 = vmul.f32 %v2509_v40, %v1707_v5  ;;  %v2532_v10 = vld [vmem:[%s2820_s25 + $0x290] sm:$0xff]  ;;  %v2534_v40 = vld [vmem:[%s2820_s25 + $0x2e0] sm:$0xff] }
 0x453   : > { %2259 = vst [vmem:[%s4255_s17 + $0x318] sm:$0xff] %v1998_v20  ;;  %v2533_v20 = vld [vmem:[%s2820_s25 + $0x298] sm:$0xff] }
 0x454   : > { %2208 = vst [vmem:[%s4255_s17 + $0x180] sm:$0xff] %v1753_v9  ;;  %2393 = vset.pattern.permute.xlu1 %v2694_v52 }
 0x455   : > { %2209 = vst [vmem:[%s4255_s17 + $0x188] sm:$0xff] %v1754_v34  ;;  %1976 = vperm.xlu1 %2393, %v1467_v32  }
 0x456   : > { %1718 = vperm.xlu2 %2389, %v1467_v32   ;;  %v1812_v6 = vpop.permute.xlu1 %1811 }
 0x457   : > { %v1870_v33 = vmul.f32 %v2510_v11, %v1812_v6  ;;  %v1871_v0 = vmul.f32 %v2511_v19, %v1812_v6  ;;  %v1703_v28 = vpop.permute.xlu0 %1702  ;;  %v2535_v6 = vld [vmem:[%s2820_s25 + $0x2e8] sm:$0xff] }
 0x458   : > { %v1751_v58 = vmul.f32 %v2512_v46, %v1703_v28  ;;  %v1752_v50 = vmul.f32 %v2513_v62, %v1703_v28 }
 0x459   : > { %2228 = vst [vmem:[%s4255_s17 + $0x220] sm:$0xff] %v1870_v33  ;;  %v1731_v7 = vpop.permute.xlu2 %1730  ;;  %v2536_v33 = vld [vmem:[%s2820_s25 + $0x330] sm:$0xff] }
 0x45a   : > { %2229 = vst [vmem:[%s4255_s17 + $0x228] sm:$0xff] %v1871_v0  ;;  %v1765_v24 = vmul.f32 %v2514_v56, %v1731_v7  ;;  %v1766_v55 = vmul.f32 %v2515_v39, %v1731_v7  ;;  %v2537_v0 = vld [vmem:[%s2820_s25 + $0x338] sm:$0xff] }
 0x45b   : > { %2206 = vst [vmem:[%s4255_s17 + $0x170] sm:$0xff] %v1751_v58  ;;  %v2538_v58 = vld [vmem:[%s2820_s25 + $0x2f0] sm:$0xff] }
 0x45c   : > { %2207 = vst [vmem:[%s4255_s17 + $0x178] sm:$0xff] %v1752_v50  ;;  %v2539_v50 = vld [vmem:[%s2820_s25 + $0x2f8] sm:$0xff] }
 0x45d   : > { %2220 = vst [vmem:[%s4255_s17 + $0x1e0] sm:$0xff] %v1765_v24  ;;  %1988 = vperm.xlu1 %2393, %v4218_v16   ;;  %v2540_v24 = vld [vmem:[%s2820_s25 + $0x30] sm:$0xff] }
 0x45e   : > { %2221 = vst [vmem:[%s4255_s17 + $0x1e8] sm:$0xff] %v1766_v55  ;;  %2394 = vset.pattern.permute.xlu2 %v2694_v52  ;;  %v2541_v55 = vld [vmem:[%s2820_s25 + $0x38] sm:$0xff] }
 0x45f   : > { %1984 = vperm.xlu2 %2394, %v4173_v4   ;;  %v1727_v21 = vpop.permute.xlu0 %1726  ;;  %v1572_v1 = vpop.permute.xlu1 %1571  ;;  %v2520_v4 = vld [vmem:[%s2820_s25 + $0x130] sm:$0xff] }
 0x460   : > { %v1763_v30 = vmul.f32 %v2516_v13, %v1727_v21  ;;  %v1764_v43 = vmul.f32 %v2517_v45, %v1727_v21  ;;  %v1625_v16 = vmul.f32 %v2518_v42, %v1572_v1  ;;  %v1626_v57 = vmul.f32 %v2519_v35, %v1572_v1  ;;  %v2542_v13 = vld [vmem:[%s2820_s25 + $0x190] sm:$0xff]  ;;  %v2543_v45 = vld [vmem:[%s2820_s25 + $0x198] sm:$0xff] }
 0x461   : > { %v1687_v52 = vpop.permute.xlu2 %1686 }
 0x462   : > { %2218 = vst [vmem:[%s4255_s17 + $0x1d0] sm:$0xff] %v1763_v30  ;;  %v1743_v54 = vmul.f32 %v2520_v4, %v1687_v52  ;;  %v1744_v41 = vmul.f32 %v2521_v17, %v1687_v52 }
 0x463   : > { %2219 = vst [vmem:[%s4255_s17 + $0x1d8] sm:$0xff] %v1764_v43 }
 0x464   : > { %1657 = vst [vmem:[%s4255_s17 + $0x80] sm:$0xff] %v1625_v16  ;;  %v2544_v16 = vld [vmem:[%s2820_s25 + $0x40] sm:$0xff] }
 0x465   : > { %1658 = vst [vmem:[%s4255_s17 + $0x88] sm:$0xff] %v1626_v57  ;;  %v2545_v57 = vld [vmem:[%s2820_s25 + $0x48] sm:$0xff] }
 0x466   : > { %2198 = vst [vmem:[%s4255_s17 + $0x130] sm:$0xff] %v1743_v54  ;;  %v2546_v54 = vld [vmem:[%s2820_s25 + $0x90] sm:$0xff] }
 0x467   : > { %2199 = vst [vmem:[%s4255_s17 + $0x138] sm:$0xff] %v1744_v41  ;;  %v1683_v22 = vpop.permute.xlu0 %1682  ;;  %v1602_v49 = vpop.permute.xlu1 %1601  ;;  %v2547_v41 = vld [vmem:[%s2820_s25 + $0x98] sm:$0xff] }
 0x468   : > { %v1741_v32 = vmul.f32 %v2522_v37, %v1683_v22  ;;  %v1742_v38 = vmul.f32 %v2523_v48, %v1683_v22  ;;  %v1637_v29 = vmul.f32 %v2524_v51, %v1602_v49  ;;  %v1638_v61 = vmul.f32 %v2525_v31, %v1602_v49  ;;  %v2548_v37 = vld [vmem:[%s2820_s25 + $0x1f0] sm:$0xff]  ;;  %v2549_v48 = vld [vmem:[%s2820_s25 + $0x1f8] sm:$0xff] }
 0x46a   : > { %2196 = vst [vmem:[%s4255_s17 + $0x120] sm:$0xff] %v1741_v32  ;;  %v1816_v14 = vpop.permute.xlu2 %1815 }
 0x46b   : > { %2197 = vst [vmem:[%s4255_s17 + $0x128] sm:$0xff] %v1742_v38  ;;  %v1872_v15 = vmul.f32 %v2526_v12, %v1816_v14  ;;  %v1873_v8 = vmul.f32 %v2527_v2, %v1816_v14 }
 0x46c   : > { %1669 = vst [vmem:[%s4255_s17 + $0xe0] sm:$0xff] %v1637_v29  ;;  %v2550_v29 = vld [vmem:[%s2820_s25 + $0x340] sm:$0xff] }
 0x46d   : > { %1670 = vst [vmem:[%s4255_s17 + $0xe8] sm:$0xff] %v1638_v61  ;;  %v2551_v61 = vld [vmem:[%s2820_s25 + $0x348] sm:$0xff] }
 0x46e   : > { %2230 = vst [vmem:[%s4255_s17 + $0x230] sm:$0xff] %v1872_v15  ;;  %v2552_v15 = vld [vmem:[%s2820_s25 + $0xf0] sm:$0xff] }
 0x46f   : > { %2231 = vst [vmem:[%s4255_s17 + $0x238] sm:$0xff] %v1873_v8  ;;  %v2553_v8 = vld [vmem:[%s2820_s25 + $0xf8] sm:$0xff] }
 0x470   : > { %v1836_v53 = vpop.permute.xlu0 %1835  ;;  %v1965_v25 = vpop.permute.xlu1 %1964 }
 0x471   : > { %v1882_v60 = vmul.f32 %v2528_v27, %v1836_v53  ;;  %v1883_v18 = vmul.f32 %v2529_v63, %v1836_v53  ;;  %v2011_v3 = vmul.f32 %v2530_v59, %v1965_v25  ;;  %v2012_v44 = vmul.f32 %v2531_v47, %v1965_v25  ;;  %v2554_v27 = vld [vmem:[%s2820_s25 + $0x140] sm:$0xff]  ;;  %v2555_v63 = vld [vmem:[%s2820_s25 + $0x148] sm:$0xff] }
 0x472   : > { %v1840_v36 = vpop.permute.xlu2 %1839 }
 0x473   : > { %2240 = vst [vmem:[%s4255_s17 + $0x280] sm:$0xff] %v1882_v60  ;;  %v1884_v26 = vmul.f32 %v2532_v10, %v1840_v36  ;;  %v1885_v5 = vmul.f32 %v2533_v20, %v1840_v36 }
 0x474   : > { %2241 = vst [vmem:[%s4255_s17 + $0x288] sm:$0xff] %v1883_v18 }
 0x475   : > { %2272 = vst [vmem:[%s4255_s17 + $0x380] sm:$0xff] %v2011_v3  ;;  %v2556_v3 = vld [vmem:[%s2820_s25 + $0xa0] sm:$0xff] }
 0x476   : > { %2273 = vst [vmem:[%s4255_s17 + $0x388] sm:$0xff] %v2012_v44  ;;  %v2557_v44 = vld [vmem:[%s2820_s25 + $0xa8] sm:$0xff] }
 0x477   : > { %2242 = vst [vmem:[%s4255_s17 + $0x290] sm:$0xff] %v1884_v26  ;;  %v2558_v26 = vld [vmem:[%s2820_s25 + $0x390] sm:$0xff] }
 0x478   : > { %2243 = vst [vmem:[%s4255_s17 + $0x298] sm:$0xff] %v1885_v5  ;;  %v1860_v23 = vpop.permute.xlu0 %1859  ;;  %v1945_v9 = vpop.permute.xlu1 %1944  ;;  %v2559_v5 = vld [vmem:[%s2820_s25 + $0x398] sm:$0xff] }
 0x479   : > { %v1894_v34 = vmul.f32 %v2534_v40, %v1860_v23  ;;  %v1895_v11 = vmul.f32 %v2535_v6, %v1860_v23  ;;  %v2001_v19 = vmul.f32 %v2536_v33, %v1945_v9  ;;  %v2002_v28 = vmul.f32 %v2537_v0, %v1945_v9  ;;  %v2560_v40 = vld [vmem:[%s2820_s25 + $0x240] sm:$0xff]  ;;  %v2561_v6 = vld [vmem:[%s2820_s25 + $0x248] sm:$0xff] }
 0x47a   : > { %v1864_v46 = vpop.permute.xlu2 %1863 }
 0x47b   : > { %2252 = vst [vmem:[%s4255_s17 + $0x2e0] sm:$0xff] %v1894_v34  ;;  %v1896_v62 = vmul.f32 %v2538_v58, %v1864_v46  ;;  %v1897_v7 = vmul.f32 %v2539_v50, %v1864_v46  ;;  %v2564_v50 = vld [vmem:[%s2820_s25 + $0x2a0] sm:$0xff] }
 0x47c   : > { %2253 = vst [vmem:[%s4255_s17 + $0x2e8] sm:$0xff] %v1895_v11 }
 0x47d   : > { %2262 = vst [vmem:[%s4255_s17 + $0x330] sm:$0xff] %v2001_v19  ;;  %v2562_v19 = vld [vmem:[%s2820_s25 + $0x3a0] sm:$0xff] }
 0x47e   : > { %2263 = vst [vmem:[%s4255_s17 + $0x338] sm:$0xff] %v2002_v28  ;;  %v2563_v28 = vld [vmem:[%s2820_s25 + $0x3a8] sm:$0xff] }
 0x47f   : > { %2254 = vst [vmem:[%s4255_s17 + $0x2f0] sm:$0xff] %v1896_v62 }
 0x480   : > { %2255 = vst [vmem:[%s4255_s17 + $0x2f8] sm:$0xff] %v1897_v7 }
 0x481   : > { %v1547_v56 = vpop.permute.xlu0 %1546 }
 0x482   : > { %v1615_v39 = vmul.f32 %v2540_v24, %v1547_v56  ;;  %v1616_v21 = vmul.f32 %v2541_v55, %v1547_v56  ;;  %v1711_v1 = vpop.permute.xlu1 %1710  ;;  %v2565_v56 = vld [vmem:[%s2820_s25 + $0x2a8] sm:$0xff] }
 0x483   : > { %v1755_v30 = vmul.f32 %v2542_v13, %v1711_v1  ;;  %v1756_v43 = vmul.f32 %v2543_v45, %v1711_v1 }
 0x484   : > { %1647 = vst [vmem:[%s4255_s17 + $0x30] sm:$0xff] %v1615_v39  ;;  %v1552_v42 = vpop.permute.xlu2 %1551  ;;  %v2566_v39 = vld [vmem:[%s2820_s25 + $0x1a0] sm:$0xff] }
 0x485   : > { %1648 = vst [vmem:[%s4255_s17 + $0x38] sm:$0xff] %v1616_v21  ;;  %v1617_v35 = vmul.f32 %v2544_v16, %v1552_v42  ;;  %v1618_v52 = vmul.f32 %v2545_v57, %v1552_v42  ;;  %v2567_v21 = vld [vmem:[%s2820_s25 + $0x1a8] sm:$0xff]  ;;  %v2570_v57 = vld [vmem:[%s2820_s25 + $0x50] sm:$0xff] }
 0x486   : > { %2210 = vst [vmem:[%s4255_s17 + $0x190] sm:$0xff] %v1755_v30  ;;  %v2568_v30 = vld [vmem:[%s2820_s25 + $0x150] sm:$0xff] }
 0x487   : > { %2211 = vst [vmem:[%s4255_s17 + $0x198] sm:$0xff] %v1756_v43  ;;  %v2569_v43 = vld [vmem:[%s2820_s25 + $0x158] sm:$0xff] }
 0x488   : > { %1649 = vst [vmem:[%s4255_s17 + $0x40] sm:$0xff] %v1617_v35 }
 0x489   : > { %1650 = vst [vmem:[%s4255_s17 + $0x48] sm:$0xff] %v1618_v52  ;;  %v1577_v4 = vpop.permute.xlu0 %1576 }
 0x48a   : > { %v1627_v17 = vmul.f32 %v2546_v54, %v1577_v4  ;;  %v1628_v22 = vmul.f32 %v2547_v41, %v1577_v4  ;;  %v1735_v49 = vpop.permute.xlu1 %1734  ;;  %v2571_v4 = vld [vmem:[%s2820_s25 + $0x58] sm:$0xff] }
 0x48b   : > { %v1767_v32 = vmul.f32 %v2548_v37, %v1735_v49  ;;  %v1768_v38 = vmul.f32 %v2549_v48, %v1735_v49 }
 0x48c   : > { %1659 = vst [vmem:[%s4255_s17 + $0x90] sm:$0xff] %v1627_v17  ;;  %v2572_v17 = vld [vmem:[%s2820_s25 + $0x250] sm:$0xff] }
 0x48d   : > { %1660 = vst [vmem:[%s4255_s17 + $0x98] sm:$0xff] %v1628_v22  ;;  %v1949_v51 = vpop.permute.xlu2 %1948  ;;  %v2573_v22 = vld [vmem:[%s2820_s25 + $0x258] sm:$0xff] }
 0x48e   : > { %2222 = vst [vmem:[%s4255_s17 + $0x1f0] sm:$0xff] %v1767_v32  ;;  %v2003_v31 = vmul.f32 %v2550_v29, %v1949_v51  ;;  %v2004_v14 = vmul.f32 %v2551_v61, %v1949_v51  ;;  %v2574_v32 = vld [vmem:[%s2820_s25 + $0x1b0] sm:$0xff] }
 0x48f   : > { %2223 = vst [vmem:[%s4255_s17 + $0x1f8] sm:$0xff] %v1768_v38  ;;  %v2575_v38 = vld [vmem:[%s2820_s25 + $0x1b8] sm:$0xff] }
 0x490   : > { %2264 = vst [vmem:[%s4255_s17 + $0x340] sm:$0xff] %v2003_v31  ;;  %v2576_v31 = vld [vmem:[%s2820_s25 + $0x2b0] sm:$0xff] }
 0x491   : > { %2265 = vst [vmem:[%s4255_s17 + $0x348] sm:$0xff] %v2004_v14  ;;  %v1607_v12 = vpop.permute.xlu0 %1606  ;;  %v2577_v14 = vld [vmem:[%s2820_s25 + $0x2b8] sm:$0xff] }
 0x492   : > { %v1639_v2 = vmul.f32 %v2552_v15, %v1607_v12  ;;  %v1640_v53 = vmul.f32 %v2553_v8, %v1607_v12  ;;  %v1691_v25 = vpop.permute.xlu1 %1690 }
 0x493   : > { %v1745_v60 = vmul.f32 %v2554_v27, %v1691_v25  ;;  %v1746_v18 = vmul.f32 %v2555_v63, %v1691_v25 }
 0x494   : > { %1671 = vst [vmem:[%s4255_s17 + $0xf0] sm:$0xff] %v1639_v2  ;;  %v2578_v2 = vld [vmem:[%s2820_s25 + $0x350] sm:$0xff] }
 0x495   : > { %1672 = vst [vmem:[%s4255_s17 + $0xf8] sm:$0xff] %v1640_v53  ;;  %v2579_v53 = vld [vmem:[%s2820_s25 + $0x358] sm:$0xff] }
 0x496   : > { %2200 = vst [vmem:[%s4255_s17 + $0x140] sm:$0xff] %v1745_v60  ;;  %v1582_v59 = vpop.permute.xlu2 %1581  ;;  %v2580_v60 = vld [vmem:[%s2820_s25 + $0x3d0] sm:$0xff] }
 0x497   : > { %2201 = vst [vmem:[%s4255_s17 + $0x148] sm:$0xff] %v1746_v18  ;;  %v1629_v47 = vmul.f32 %v2556_v3, %v1582_v59  ;;  %v1630_v36 = vmul.f32 %v2557_v44, %v1582_v59  ;;  %v2581_v18 = vld [vmem:[%s2820_s25 + $0x3d8] sm:$0xff] }
 0x499   : > { %1661 = vst [vmem:[%s4255_s17 + $0xa0] sm:$0xff] %v1629_v47  ;;  %v2582_v47 = vld [vmem:[%s2820_s25 + $0x3f0] sm:$0xff] }
 0x49a   : > { %1662 = vst [vmem:[%s4255_s17 + $0xa8] sm:$0xff] %v1630_v36  ;;  %v1969_v10 = vpop.permute.xlu0 %1968  ;;  %v2583_v36 = vld [vmem:[%s2820_s25 + $0x3f8] sm:$0xff] }
 0x49b   : > { %v2013_v20 = vmul.f32 %v2558_v26, %v1969_v10  ;;  %v2014_v23 = vmul.f32 %v2559_v5, %v1969_v10  ;;  %v1820_v9 = vpop.permute.xlu1 %1819 }
 0x49c   : > { %v1874_v34 = vmul.f32 %v2560_v40, %v1820_v9  ;;  %v1875_v11 = vmul.f32 %v2561_v6, %v1820_v9 }
 0x49d   : > { %2274 = vst [vmem:[%s4255_s17 + $0x390] sm:$0xff] %v2013_v20  ;;  %v2584_v20 = vld [vmem:[%s2820_s25 + $0xb0] sm:$0xff] }
 0x49e   : > { %2275 = vst [vmem:[%s4255_s17 + $0x398] sm:$0xff] %v2014_v23  ;;  %v2585_v23 = vld [vmem:[%s2820_s25 + $0xb8] sm:$0xff] }
 0x49f   : > { %2232 = vst [vmem:[%s4255_s17 + $0x240] sm:$0xff] %v1874_v34  ;;  %v1973_v33 = vpop.permute.xlu2 %1972  ;;  %v2586_v34 = vld [vmem:[%s2820_s25 + $0x3b0] sm:$0xff] }
 0x4a0   : > { %2233 = vst [vmem:[%s4255_s17 + $0x248] sm:$0xff] %v1875_v11  ;;  %v2015_v0 = vmul.f32 %v2562_v19, %v1973_v33  ;;  %v2016_v46 = vmul.f32 %v2563_v28, %v1973_v33  ;;  %v2587_v11 = vld [vmem:[%s2820_s25 + $0x3b8] sm:$0xff] }
 0x4a2   : > { %2276 = vst [vmem:[%s4255_s17 + $0x3a0] sm:$0xff] %v2015_v0  ;;  %v2588_v0 = vld [vmem:[%s2820_s25 + $0x3e0] sm:$0xff] }
 0x4a3   : > { %2277 = vst [vmem:[%s4255_s17 + $0x3a8] sm:$0xff] %v2016_v46  ;;  %v1844_v58 = vpop.permute.xlu1 %1843  ;;  %v1715_v62 = vpop.permute.xlu0 %1714  ;;  %v2589_v46 = vld [vmem:[%s2820_s25 + $0x3e8] sm:$0xff] }
 0x4a4   : > { %v1886_v7 = vmul.f32 %v2564_v50, %v1844_v58  ;;  %v1887_v24 = vmul.f32 %v2565_v56, %v1844_v58  ;;  %v1757_v55 = vmul.f32 %v2566_v39, %v1715_v62  ;;  %v1758_v1 = vmul.f32 %v2567_v21, %v1715_v62 }
 0x4a6   : > { %2244 = vst [vmem:[%s4255_s17 + $0x2a0] sm:$0xff] %v1886_v7 }
 0x4a7   : > { %2245 = vst [vmem:[%s4255_s17 + $0x2a8] sm:$0xff] %v1887_v24 }
 0x4a8   : > { %2212 = vst [vmem:[%s4255_s17 + $0x1a0] sm:$0xff] %v1757_v55  ;;  %v1695_v13 = vpop.permute.xlu2 %1694 }
 0x4a9   : > { %2213 = vst [vmem:[%s4255_s17 + $0x1a8] sm:$0xff] %v1758_v1  ;;  %v1747_v45 = vmul.f32 %v2568_v30, %v1695_v13  ;;  %v1748_v42 = vmul.f32 %v2569_v43, %v1695_v13 }
 0x4ab   : > { %2202 = vst [vmem:[%s4255_s17 + $0x150] sm:$0xff] %v1747_v45 }
 0x4ac   : > { %2203 = vst [vmem:[%s4255_s17 + $0x158] sm:$0xff] %v1748_v42  ;;  %v1557_v16 = vpop.permute.xlu1 %1556  ;;  %v1824_v35 = vpop.permute.xlu0 %1823 }
 0x4ad   : > { %v1619_v52 = vmul.f32 %v2570_v57, %v1557_v16  ;;  %v1620_v54 = vmul.f32 %v2571_v4, %v1557_v16  ;;  %v1876_v41 = vmul.f32 %v2572_v17, %v1824_v35  ;;  %v1877_v49 = vmul.f32 %v2573_v22, %v1824_v35 }
 0x4af   : > { %1651 = vst [vmem:[%s4255_s17 + $0x50] sm:$0xff] %v1619_v52 }
 0x4b0   : > { %1652 = vst [vmem:[%s4255_s17 + $0x58] sm:$0xff] %v1620_v54  ;;  %v1719_v37 = vpop.permute.xlu2 %1718 }
 0x4b1   : > { %2234 = vst [vmem:[%s4255_s17 + $0x250] sm:$0xff] %v1876_v41  ;;  %v1759_v48 = vmul.f32 %v2574_v32, %v1719_v37  ;;  %v1760_v51 = vmul.f32 %v2575_v38, %v1719_v37 }
 0x4b2   : > { %2235 = vst [vmem:[%s4255_s17 + $0x258] sm:$0xff] %v1877_v49 }
 0x4b3   : > { %2214 = vst [vmem:[%s4255_s17 + $0x1b0] sm:$0xff] %v1759_v48 }
 0x4b4   : > { %2215 = vst [vmem:[%s4255_s17 + $0x1b8] sm:$0xff] %v1760_v51  ;;  %v1848_v29 = vpop.permute.xlu0 %1847 }
 0x4b5   : > { %v1888_v61 = vmul.f32 %v2576_v31, %v1848_v29  ;;  %v1889_v12 = vmul.f32 %v2577_v14, %v1848_v29  ;;  %v1953_v15 = vpop.permute.xlu1 %1952 }
 0x4b6   : > { %v2005_v8 = vmul.f32 %v2578_v2, %v1953_v15  ;;  %v2006_v25 = vmul.f32 %v2579_v53, %v1953_v15 }
 0x4b7   : > { %2246 = vst [vmem:[%s4255_s17 + $0x2b0] sm:$0xff] %v1888_v61 }
 0x4b8   : > { %2247 = vst [vmem:[%s4255_s17 + $0x2b8] sm:$0xff] %v1889_v12 }
 0x4b9   : > { %2266 = vst [vmem:[%s4255_s17 + $0x350] sm:$0xff] %v2005_v8  ;;  %v1985_v27 = vpop.permute.xlu2 %1984 }
 0x4ba   : > { %2267 = vst [vmem:[%s4255_s17 + $0x358] sm:$0xff] %v2006_v25  ;;  %v2021_v63 = vmul.f32 %v2580_v60, %v1985_v27  ;;  %v2022_v59 = vmul.f32 %v2581_v18, %v1985_v27 }
 0x4bc   : > { %2282 = vst [vmem:[%s4255_s17 + $0x3d0] sm:$0xff] %v2021_v63 }
 0x4bd   : > { %2283 = vst [vmem:[%s4255_s17 + $0x3d8] sm:$0xff] %v2022_v59  ;;  %v1993_v3 = vpop.permute.xlu0 %1992 }
 0x4be   : > { %v2025_v44 = vmul.f32 %v2582_v47, %v1993_v3  ;;  %v2026_v10 = vmul.f32 %v2583_v36, %v1993_v3  ;;  %v1587_v26 = vpop.permute.xlu1 %1586 }
 0x4bf   : > { %v1631_v5 = vmul.f32 %v2584_v20, %v1587_v26  ;;  %v1632_v9 = vmul.f32 %v2585_v23, %v1587_v26 }
 0x4c0   : > { %2286 = vst [vmem:[%s4255_s17 + $0x3f0] sm:$0xff] %v2025_v44 }
 0x4c1   : > { %2287 = vst [vmem:[%s4255_s17 + $0x3f8] sm:$0xff] %v2026_v10 }
 0x4c2   : > { %1663 = vst [vmem:[%s4255_s17 + $0xb0] sm:$0xff] %v1631_v5 }
 0x4c3   : > { %1664 = vst [vmem:[%s4255_s17 + $0xb8] sm:$0xff] %v1632_v9 }
 0x4c7   : > { %v1977_v40 = vpop.permute.xlu1 %1976 }
 0x4c8   : > { %v2017_v6 = vmul.f32 %v2586_v34, %v1977_v40  ;;  %v2018_v33 = vmul.f32 %v2587_v11, %v1977_v40 }
 0x4ca   : > { %2278 = vst [vmem:[%s4255_s17 + $0x3b0] sm:$0xff] %v2017_v6 }
 0x4cb   : > { %2279 = vst [vmem:[%s4255_s17 + $0x3b8] sm:$0xff] %v2018_v33 }
 0x4cf   : > { %v1989_v19 = vpop.permute.xlu1 %1988 }
 0x4d0   : > { %v2023_v28 = vmul.f32 %v2588_v0, %v1989_v19  ;;  %v2024_v58 = vmul.f32 %v2589_v46, %v1989_v19 }
 0x4d2   : > { %2284 = vst [vmem:[%s4255_s17 + $0x3e0] sm:$0xff] %v2023_v28 }
 0x4d3   : > { %2285 = vst [vmem:[%s4255_s17 + $0x3e8] sm:$0xff] %v2024_v58 }
 0x4d4   : > { %2647 = shalt.err (!%p2644_p4)
}
 0x4d5   : > { %s2696_s12 = smov 256   ;;  %s2697_s25 = smov 16  }
 0x4d6   : > { %2302 = dma.vmem_to_hbm [thread:$0]  (%p2778_p11), %s2075_s9, 16384, %s2077_s10, %s2061_s22, %s2696_s12, %s2696_s12, %s2697_s25  }
 0x4d7 PF: > { %s2091_s17 = sand.u32 1, %s2674_s18   ;;  %p5004_p7 = scmp.ge.s32.totalorder %s2686_s21, 2 }
 0x4d8   : > { %s2092_s14 = scalar_lea.sflag [#allocation4], %s2091_s17 }
 0x4d9   : > { %p2309_p5 = pnand %p5004_p7, %p2782_p12 }
 0x4db   : > { %p2310_p8 = pneg %p2309_p5 }
 0x4dd   : > { %2669 = dma.done.wait (%p2310_p8), %s2092_s14, 16384  }
 0x4de   : > { %2671 = vsyncadd (%p2310_p8), %s2092_s14, 4294950912  ;;  %p18_p10 = scmp.ge.s32.totalorder %s2753_s24, 4   ;;  %s5005_s18 = smov %s2678_s19 }
 0x4df   : > { %s5006_s19 = smov %s2682_s20  ;;  %s5007_s20 = smov %s2765_s27 }
 0x4e0   : > { %s5008_s21 = smov %s2753_s24  ;;  %20 = sbr.rel (!%p18_p10) target bundleno = 5 (0x5), region = 88 }
 0x4e5   :  { %2098 = vsyncpa [#allocation3], 1 }
 0x4e6   :  { %2100 = vsyncpa [#allocation3 + $0x1], 1 }
 0x4e7   :  { %2101 = vsyncpa [#allocation4], 1 }
 0x4e8   :  { %2103 = vsyncpa [#allocation4 + $0x1], 1 }

</bundles_post_ra>
